<compile_context>
chip_gen: v7x
topology: tpu7x:2x2x1
jax: 0.10.0
libtpu: 0.0.40
codegen_flags: <defaults>
</compile_context>

<pallas_src>
import functools

import jax
import jax.numpy as jnp
import numpy as np
from jax.experimental import pallas as pl
from jax.experimental.pallas import tpu as pltpu


# ---------------------------------------------------------------------------
# small helpers
# ---------------------------------------------------------------------------
def _round_up(x, m):
    return ((x + m - 1) // m) * m


def _pick_tile(dim, target, align=128):
    """Largest multiple of `align` <= target that divides dim, else dim."""
    if dim <= target:
        return dim
    t = (target // align) * align
    while t >= align:
        if dim % t == 0:
            return t
        t -= align
    return dim


@functools.lru_cache(maxsize=None)
def _vmem_limit_bytes():
    # Portable VMEM budget: ~3/4 of physical, capped at 100 MiB.
    # (v5e/v6e: 128 MiB physical -> 96/100 MiB;  v7x: 64 MiB -> 48 MiB.)
    try:
        cap = pltpu.get_tpu_info().vmem_capacity_bytes
        return int(min(cap * 3 // 4, 100 * 1024 * 1024))
    except Exception:
        return None  # fall back to compiler default


def fold_bn(gamma, beta, running_mean, running_var, eps=1e-5):
    scale = gamma / jnp.sqrt(running_var + eps)
    bias = beta - running_mean * scale
    return scale.astype(jnp.float32), bias.astype(jnp.float32)


# ---------------------------------------------------------------------------
# Fused matmul + folded-BN + (residual | fused downsample) + ReLU
# ---------------------------------------------------------------------------
def _make_fused_kernel(*, res_mode, relu):
    """res_mode: 'none' | 'add' (precomputed residual) | 'downsample'."""

    def kernel(*refs):
        if res_mode == "add":
            x_ref, w_ref, scale_ref, bias_ref, res_ref, o_ref, acc_ref = refs
        elif res_mode == "downsample":
            (x_ref, w_ref, scale_ref, bias_ref,
             xs_ref, wd_ref, scd_ref, bid_ref, o_ref, acc_ref) = refs
        else:
            x_ref, w_ref, scale_ref, bias_ref, o_ref, acc_ref = refs

        k = pl.program_id(2)

        @pl.when(k == 0)
        def _init():
            acc_ref[...] = jnp.zeros_like(acc_ref)

        acc_ref[...] += jnp.dot(x_ref[...], w_ref[...],
                                preferred_element_type=jnp.float32)

        @pl.when(k == pl.num_programs(2) - 1)
        def _finalize():
            y = acc_ref[...] * scale_ref[...] + bias_ref[...]
            if res_mode == "add":
                y = y + res_ref[...].astype(jnp.float32)
            elif res_mode == "downsample":
                r = jnp.dot(xs_ref[...], wd_ref[...],
                            preferred_element_type=jnp.float32)
                y = y + (r * scd_ref[...] + bid_ref[...])
            if relu:
                y = jnp.maximum(y, 0.0)
            o_ref[...] = y.astype(o_ref.dtype)

    return kernel


def fused_matmul_bn_act(x2d, w, scale, bias, *, residual=None, downsample=None,
                        relu=True, out_dtype=None, tm=256, tn=512, tk=512,
                        compute_dtype=jnp.bfloat16):
    """x2d: (M, K), w: (K, N), scale/bias: (N,).
       residual: optional (M, N) added before ReLU.
       downsample: optional (xs2d, wd, scale_d, bias_d) - a 1x1 conv + BN
       residual branch computed inside the kernel (never materialized)."""
    M, K = x2d.shape
    Kw, Nc = w.shape
    assert K == Kw
    out_dtype = out_dtype or compute_dtype
    cbytes = jnp.dtype(compute_dtype).itemsize

    tm_eff = min(_round_up(tm, 8), _round_up(M, 8))
    M_pad = _round_up(M, tm_eff)
    tn_eff = _pick_tile(Nc, tn)
    tk_eff = _pick_tile(K, tk)
    gm, gn, nk = M_pad // tm_eff, Nc // tn_eff, K // tk_eff

    x2d = x2d.astype(compute_dtype)
    w = w.astype(compute_dtype)
    scale2 = scale.reshape(1, Nc).astype(jnp.float32)
    bias2 = bias.reshape(1, Nc).astype(jnp.float32)
    if M_pad != M:
        x2d = jnp.pad(x2d, ((0, M_pad - M), (0, 0)))

    in_specs = [
        pl.BlockSpec((tm_eff, tk_eff), lambda i, j, k: (i, k)),
        pl.BlockSpec((tk_eff, tn_eff), lambda i, j, k: (k, j)),
        pl.BlockSpec((1, tn_eff), lambda i, j, k: (0, j)),
        pl.BlockSpec((1, tn_eff), lambda i, j, k: (0, j)),
    ]
    args = [x2d, w, scale2, bias2]
    flops = 2 * M * K * Nc
    bytes_accessed = ((M_pad * K + K * Nc) * cbytes + 2 * Nc * 4
                      + M_pad * Nc * jnp.dtype(out_dtype).itemsize)

    if residual is not None:
        assert downsample is None
        res = residual.astype(compute_dtype)
        if M_pad != M:
            res = jnp.pad(res, ((0, M_pad - M), (0, 0)))
        in_specs.append(pl.BlockSpec((tm_eff, tn_eff), lambda i, j, k: (i, j)))
        args.append(res)
        res_mode = "add"
        bytes_accessed += M_pad * Nc * cbytes
    elif downsample is not None:
        xs, wd, scd, bid = downsample
        Kd = xs.shape[1]
        assert wd.shape == (Kd, Nc)
        xs = xs.astype(compute_dtype)
        wd = wd.astype(compute_dtype)
        if M_pad != M:
            xs = jnp.pad(xs, ((0, M_pad - M), (0, 0)))
        in_specs += [
            pl.BlockSpec((tm_eff, Kd), lambda i, j, k: (i, 0)),
            pl.BlockSpec((Kd, tn_eff), lambda i, j, k: (0, j)),
            pl.BlockSpec((1, tn_eff), lambda i, j, k: (0, j)),
            pl.BlockSpec((1, tn_eff), lambda i, j, k: (0, j)),
        ]
        args += [xs, wd,
                 scd.reshape(1, Nc).astype(jnp.float32),
                 bid.reshape(1, Nc).astype(jnp.float32)]
        res_mode = "downsample"
        flops += 2 * M * Kd * Nc
        bytes_accessed += (M_pad * Kd + Kd * Nc) * cbytes + 2 * Nc * 4
    else:
        res_mode = "none"

    out = pl.pallas_call(
        _make_fused_kernel(res_mode=res_mode, relu=relu),
        out_shape=jax.ShapeDtypeStruct((M_pad, Nc), out_dtype),
        grid=(gm, gn, nk),
        in_specs=in_specs,
        out_specs=pl.BlockSpec((tm_eff, tn_eff), lambda i, j, k: (i, j)),
        scratch_shapes=[pltpu.VMEM((tm_eff, tn_eff), jnp.float32)],
        compiler_params=pltpu.CompilerParams(
            dimension_semantics=("parallel", "parallel", "arbitrary"),
            vmem_limit_bytes=_vmem_limit_bytes()),
        cost_estimate=pl.CostEstimate(flops=int(flops), transcendentals=0,
                                      bytes_accessed=int(bytes_accessed)),
    )(*args)
    if M_pad != M:
        out = out[:M]
    return out


# ---------------------------------------------------------------------------
# 3x3 conv (stride 1, pad 1) + folded BN + ReLU, no materialized im2col.
# Per batch element, the zero-padded image is flattened to (Hp*Wp, C) rows
# (with Wp+1 guard rows on both sides); each tap (dy,dx) is a constant row
# shift dy*Wp+dx, so the conv is nine shifted (Hp*Wp, C) @ (C, Cout) matmuls
# accumulated in a f32 VMEM scratch.  Border rows are garbage and are skipped
# when the interior rows are stored (fused extraction).
# ---------------------------------------------------------------------------
def _conv3x3_kernel(x_ref, w_ref, scale_ref, bias_ref, o_ref, acc_ref,
                    *, Hp, Wp, H, W):
    PW = Hp * Wp
    for t in range(9):
        dy, dx = divmod(t, 3)
        off = dy * Wp + dx
        xt = x_ref[0, off:off + PW, :]
        part = jnp.dot(xt, w_ref[t], preferred_element_type=jnp.float32)
        if t == 0:
            acc_ref[...] = part
        else:
            acc_ref[...] += part
    y = acc_ref[...] * scale_ref[...] + bias_ref[...]
    y = jnp.maximum(y, 0.0).astype(o_ref.dtype)
    for h in range(H):
        src = (h + 1) * Wp + 1
        o_ref[0, h * W:(h + 1) * W, :] = y[src:src + W, :]


def conv3x3_bn_relu(x2d, w2_flat, scale, bias, *, N, H, W,
                    compute_dtype=jnp.bfloat16, out_dtype=None):
    """x2d: (N*H*W, C) NHWC-flattened, w2_flat: (9*C, Cout) in (ky,kx,ci) order.
       Returns (N*H*W, Cout).  stride=1, padding=1 only."""
    C = x2d.shape[1]
    Cout = w2_flat.shape[1]
    assert w2_flat.shape[0] == 9 * C
    out_dtype = out_dtype or compute_dtype
    Hp, Wp = H + 2, W + 2
    PW = Hp * Wp
    G = PW + 2 * (Wp + 1)

    x_nhwc = x2d.reshape(N, H, W, C).astype(compute_dtype)
    xpad = jnp.pad(x_nhwc, ((0, 0), (1, 1), (1, 1), (0, 0)))
    xg = jnp.pad(xpad.reshape(N, PW, C), ((0, 0), (Wp + 1, Wp + 1), (0, 0)))
    w_taps = w2_flat.reshape(9, C, Cout).astype(compute_dtype)
    scale2 = scale.reshape(1, Cout).astype(jnp.float32)
    bias2 = bias.reshape(1, Cout).astype(jnp.float32)

    cbytes = jnp.dtype(compute_dtype).itemsize
    flops = 2 * N * H * W * 9 * C * Cout
    bytes_accessed = (N * G * C * cbytes + 9 * C * Cout * cbytes
                      + N * H * W * Cout * jnp.dtype(out_dtype).itemsize)

    out = pl.pallas_call(
        functools.partial(_conv3x3_kernel, Hp=Hp, Wp=Wp, H=H, W=W),
        out_shape=jax.ShapeDtypeStruct((N, H * W, Cout), out_dtype),
        grid=(N,),
        in_specs=[
            pl.BlockSpec((1, G, C), lambda n: (n, 0, 0)),
            pl.BlockSpec((9, C, Cout), lambda n: (0, 0, 0)),
            pl.BlockSpec((1, Cout), lambda n: (0, 0)),
            pl.BlockSpec((1, Cout), lambda n: (0, 0)),
        ],
        out_specs=pl.BlockSpec((1, H * W, Cout), lambda n: (n, 0, 0)),
        scratch_shapes=[pltpu.VMEM((PW, Cout), jnp.float32)],
        compiler_params=pltpu.CompilerParams(
            dimension_semantics=("parallel",),
            vmem_limit_bytes=_vmem_limit_bytes()),
        cost_estimate=pl.CostEstimate(flops=int(flops), transcendentals=0,
                                      bytes_accessed=int(bytes_accessed)),
    )(xg, w_taps, scale2, bias2)
    return out.reshape(N * H * W, Cout)


# ---------------------------------------------------------------------------
# Glue: im2col fallback for stride > 1 3x3 conv
# ---------------------------------------------------------------------------
def im2col_3x3(x_nhwc, stride):
    N, H, W, C = x_nhwc.shape
    Ho = (H + 2 - 3) // stride + 1
    Wo = (W + 2 - 3) // stride + 1
    xp = jnp.pad(x_nhwc, ((0, 0), (1, 1), (1, 1), (0, 0)))
    slabs = []
    for dy in range(3):
        for dx in range(3):
            slabs.append(xp[:, dy:dy + (Ho - 1) * stride + 1:stride,
                            dx:dx + (Wo - 1) * stride + 1:stride, :])
    return jnp.concatenate(slabs, axis=-1), Ho, Wo


# ---------------------------------------------------------------------------
# Bottleneck forward
# ---------------------------------------------------------------------------
@functools.partial(jax.jit,
                   static_argnames=("stride", "has_downsample", "compute_dtype"))
def bottleneck_forward(x_nchw, params, *, stride=1, has_downsample=False,
                       compute_dtype=jnp.bfloat16):
    N, Cin, H, W = x_nchw.shape
    out_dtype = x_nchw.dtype
    # TODO(synk): offer NHWC in/out to avoid the two layout transposes when the
    # caller's pipeline is NHWC-native.
    x = jnp.transpose(x_nchw, (0, 2, 3, 1))  # NCHW -> NHWC
    x2d = x.reshape(N * H * W, Cin)

    planes = params["w1"].shape[1]
    cexp = 4 * planes

    # --- conv1 (1x1) + bn1 + relu ---
    sc1, bi1 = fold_bn(params["bn1_gamma"], params["bn1_beta"],
                       params["bn1_mean"], params["bn1_var"])
    out1 = fused_matmul_bn_act(x2d, params["w1"], sc1, bi1, relu=True,
                               out_dtype=compute_dtype,
                               compute_dtype=compute_dtype)

    # --- conv2 (3x3, stride, pad=1) + bn2 + relu ---
    sc2, bi2 = fold_bn(params["bn2_gamma"], params["bn2_beta"],
                       params["bn2_mean"], params["bn2_var"])
    if stride == 1:
        out2 = conv3x3_bn_relu(out1, params["w2"], sc2, bi2, N=N, H=H, W=W,
                               compute_dtype=compute_dtype)
        Ho, Wo = H, W
    else:
        # TODO(synk): strided 3x3 still uses a materialized im2col feeding the
        # fused Pallas matmul; a strided in-kernel tap reduction would remove
        # the extra HBM traffic.
        patches, Ho, Wo = im2col_3x3(out1.reshape(N, H, W, planes), stride)
        out2 = fused_matmul_bn_act(patches.reshape(N * Ho * Wo, 9 * planes),
                                   params["w2"], sc2, bi2, relu=True,
                                   out_dtype=compute_dtype,
                                   compute_dtype=compute_dtype)

    # --- conv3 (1x1) + bn3 + residual + relu ---
    sc3, bi3 = fold_bn(params["bn3_gamma"], params["bn3_beta"],
                       params["bn3_mean"], params["bn3_var"])
    if has_downsample:
        xs = x[:, ::stride, ::stride, :]
        assert xs.shape[1] == Ho and xs.shape[2] == Wo
        sc_d, bi_d = fold_bn(params["bn_d_gamma"], params["bn_d_beta"],
                             params["bn_d_mean"], params["bn_d_var"])
        out3 = fused_matmul_bn_act(
            out2, params["w3"], sc3, bi3,
            downsample=(xs.reshape(N * Ho * Wo, Cin), params["w_d"], sc_d, bi_d),
            relu=True, out_dtype=out_dtype, compute_dtype=compute_dtype)
    else:
        assert stride == 1 and Cin == cexp, \
            "identity residual requires stride=1 and in_channels == 4*planes"
        out3 = fused_matmul_bn_act(out2, params["w3"], sc3, bi3,
                                   residual=x2d, relu=True,
                                   out_dtype=out_dtype,
                                   compute_dtype=compute_dtype)

    out = out3.reshape(N, Ho, Wo, cexp)
    return jnp.transpose(out, (0, 3, 1, 2))  # NHWC -> NCHW


# ---------------------------------------------------------------------------
# Deterministic parameter init + pure-JAX reference
# ---------------------------------------------------------------------------
def init_params(key, in_channels, planes, *, downsample=False):
    cexp = 4 * planes
    ks = jax.random.split(key, 10)

    def bn_params(k, c):
        k1, k2, k3, k4 = jax.random.split(k, 4)
        return (1.0 + 0.1 * jax.random.normal(k1, (c,), jnp.float32),
                0.1 * jax.random.normal(k2, (c,), jnp.float32),
                0.05 * jax.random.normal(k3, (c,), jnp.float32),
                1.0 + 0.2 * jax.random.uniform(k4, (c,), jnp.float32))

    # conv1: OIHW (planes, in, 1, 1) -> (in, planes)
    w1 = 0.1 * jax.random.normal(ks[0], (in_channels, planes), jnp.float32)
    # conv2: OIHW (planes, planes, 3, 3) -> flattened HWIO (9*planes, planes)
    w2_oihw = 0.1 * jax.random.normal(ks[1], (planes, planes, 3, 3), jnp.float32)
    w2 = jnp.transpose(w2_oihw, (2, 3, 1, 0)).reshape(9 * planes, planes)
    # conv3: OIHW (4p, planes, 1, 1) -> (planes, 4p)
    w3 = 0.1 * jax.random.normal(ks[2], (planes, cexp), jnp.float32)

    g1, b1, m1, v1 = bn_params(ks[3], planes)
    g2, b2, m2, v2 = bn_params(ks[4], planes)
    g3, b3, m3, v3 = bn_params(ks[5], cexp)

    p = dict(w1=w1, w2=w2, w3=w3,
             bn1_gamma=g1, bn1_beta=b1, bn1_mean=m1, bn1_var=v1,
             bn2_gamma=g2, bn2_beta=b2, bn2_mean=m2, bn2_var=v2,
             bn3_gamma=g3, bn3_beta=b3, bn3_mean=m3, bn3_var=v3)
    if downsample:
        p["w_d"] = 0.1 * jax.random.normal(ks[6], (in_channels, cexp),
                                           jnp.float32)
        gd, bd, md, vd = bn_params(ks[7], cexp)
        p.update(bn_d_gamma=gd, bn_d_beta=bd, bn_d_mean=md, bn_d_var=vd)
    return p


def reference_forward(x_nchw, params, *, stride=1, has_downsample=False):
    """Pure JAX (lax.conv) f32 reference of the same eval-mode bottleneck."""
    x = jnp.transpose(x_nchw, (0, 2, 3, 1))
    planes = params["w1"].shape[1]
    hi = jax.lax.Precision.HIGHEST

    def bn(y, g, b, m, v):
        return (y - m) / jnp.sqrt(v + 1e-5) * g + b

    out = jnp.einsum("nhwc,cp->nhwp", x, params["w1"], precision=hi)
    out = jax.nn.relu(bn(out, params["bn1_gamma"], params["bn1_beta"],
                         params["bn1_mean"], params["bn1_var"]))
    w2 = params["w2"].reshape(3, 3, planes, planes)
    out = jax.lax.conv_general_dilated(
        out, w2, window_strides=(stride, stride), padding=((1, 1), (1, 1)),
        dimension_numbers=("NHWC", "HWIO", "NHWC"), precision=hi)
    out = jax.nn.relu(bn(out, params["bn2_gamma"], params["bn2_beta"],
                         params["bn2_mean"], params["bn2_var"]))
    out = jnp.einsum("nhwp,pc->nhwc", out, params["w3"], precision=hi)
    out = bn(out, params["bn3_gamma"], params["bn3_beta"],
             params["bn3_mean"], params["bn3_var"])
    if has_downsample:
        xs = x[:, ::stride, ::stride, :]
        res = jnp.einsum("nhwc,co->nhwo", xs, params["w_d"], precision=hi)
        res = bn(res, params["bn_d_gamma"], params["bn_d_beta"],
                 params["bn_d_mean"], params["bn_d_var"])
    else:
        res = x
    out = jax.nn.relu(out + res)
    return jnp.transpose(out, (0, 3, 1, 2))


if __name__ == "__main__":
    key = jax.random.PRNGKey(0)
    kx1, kp1, kx2, kp2 = jax.random.split(key, 4)

    # Case 1: identity residual, stride=1 (in_channels == 4*planes).
    N, Cin, H, W, planes = 2, 16, 8, 8, 4
    x1 = jax.random.normal(kx1, (N, Cin, H, W), jnp.float32)
    p1 = init_params(kp1, Cin, planes, downsample=False)
    out1 = jax.block_until_ready(
        bottleneck_forward(x1, p1, stride=1, has_downsample=False))
    ref1 = jax.block_until_ready(
        reference_forward(x1, p1, stride=1, has_downsample=False))
    np.testing.assert_allclose(np.asarray(out1), np.asarray(ref1),
                               rtol=3e-2, atol=3e-2)
    assert out1.shape == (N, 4 * planes, H, W)

    # Case 2: projection (downsample) residual fused into conv3, stride=2.
    N2, Cin2, H2, W2, planes2 = 2, 16, 8, 8, 8
    x2 = jax.random.normal(kx2, (N2, Cin2, H2, W2), jnp.float32)
    p2 = init_params(kp2, Cin2, planes2, downsample=True)
    out2 = jax.block_until_ready(
        bottleneck_forward(x2, p2, stride=2, has_downsample=True))
    ref2 = jax.block_until_ready(
        reference_forward(x2, p2, stride=2, has_downsample=True))
    np.testing.assert_allclose(np.asarray(out2), np.asarray(ref2),
                               rtol=3e-2, atol=3e-2)
    assert out2.shape == (N2, 4 * planes2, 4, 4)

    print("KERNEL_OK")
</pallas_src>

<mosaic_0001>
module attributes {stable_mosaic.version = 11 : i64} {
  func.func @kernel(%arg0: i32, %arg1: i32, %arg2: i32, %arg3: memref<128x16xbf16, #tpu.memory_space<vmem>>, %arg4: memref<16x4xbf16, #tpu.memory_space<vmem>>, %arg5: memref<1x4xf32, #tpu.memory_space<vmem>>, %arg6: memref<1x4xf32, #tpu.memory_space<vmem>>, %arg7: memref<128x4xbf16, #tpu.memory_space<vmem>>, %arg8: memref<128x4xf32, #tpu.memory_space<vmem>>) attributes {dimension_semantics = [#tpu.dimension_semantics<parallel>, #tpu.dimension_semantics<parallel>, #tpu.dimension_semantics<arbitrary>], iteration_bounds = array<i64: 1, 1, 1>, scalar_prefetch = 0 : i64, scratch_operands = 1 : i64, tpu.core_type = #tpu.core_type<tc>, window_params = [{transform_indices = @transform_0, window_bounds = array<i64: 128, 16>}, {transform_indices = @transform_1, window_bounds = array<i64: 16, 4>}, {transform_indices = @transform_2, window_bounds = array<i64: 1, 4>}, {transform_indices = @transform_3, window_bounds = array<i64: 1, 4>}, {transform_indices = @transform_4, window_bounds = array<i64: 128, 4>}]} {
    %c0_i32 = arith.constant 0 : i32
    %0 = arith.cmpi eq, %arg2, %c0_i32 : i32
    %1 = arith.extui %0 : i1 to i32
    %c0_i32_0 = arith.constant 0 : i32
    %2 = arith.cmpi ne, %1, %c0_i32_0 : i32
    scf.if %2 {
      %cst_10 = arith.constant 0.000000e+00 : f32
      %12 = vector.broadcast %cst_10 : f32 to vector<128x4xf32>
      %c0_11 = arith.constant 0 : index
      %c0_12 = arith.constant 0 : index
      %13 = vector.load %arg8[%c0_11, %c0_12] : memref<128x4xf32, #tpu.memory_space<vmem>>, vector<128x4xf32>
      tpu.vector_store %arg8[%c0_11, %c0_12], %12 {strides = array<i32>} : memref<128x4xf32, #tpu.memory_space<vmem>>, vector<128x4xf32>,
    } else {
    }
    %c0 = arith.constant 0 : index
    %c0_1 = arith.constant 0 : index
    %3 = vector.load %arg8[%c0, %c0_1] : memref<128x4xf32, #tpu.memory_space<vmem>>, vector<128x4xf32>
    %c0_2 = arith.constant 0 : index
    %c0_3 = arith.constant 0 : index
    %4 = vector.load %arg3[%c0_2, %c0_3] : memref<128x16xbf16, #tpu.memory_space<vmem>>, vector<128x16xbf16>
    %c0_4 = arith.constant 0 : index
    %c0_5 = arith.constant 0 : index
    %5 = vector.load %arg4[%c0_4, %c0_5] : memref<16x4xbf16, #tpu.memory_space<vmem>>, vector<16x4xbf16>
    %cst = arith.constant dense<0.000000e+00> : vector<128x4xf32>
    %6 = tpu.matmul %4, %5, %cst {dimension_numbers = #tpu.dot_dimension_numbers<[1], [0], [0], [1], [0, 0, 1, 1], [], []>} : vector<128x16xbf16>, vector<16x4xbf16>, vector<128x4xf32> -> vector<128x4xf32>
    %7 = arith.addf %3, %6 : vector<128x4xf32>
    %c0_6 = arith.constant 0 : index
    %c0_7 = arith.constant 0 : index
    %8 = vector.load %arg8[%c0_6, %c0_7] : memref<128x4xf32, #tpu.memory_space<vmem>>, vector<128x4xf32>
    tpu.vector_store %arg8[%c0_6, %c0_7], %7 {strides = array<i32>} : memref<128x4xf32, #tpu.memory_space<vmem>>, vector<128x4xf32>,
    %c0_i32_8 = arith.constant 0 : i32
    %9 = arith.cmpi eq, %arg2, %c0_i32_8 : i32
    %10 = arith.extui %9 : i1 to i32
    %c0_i32_9 = arith.constant 0 : i32
    %11 = arith.cmpi ne, %10, %c0_i32_9 : i32
    scf.if %11 {
      %c0_10 = arith.constant 0 : index
      %c0_11 = arith.constant 0 : index
      %12 = vector.load %arg8[%c0_10, %c0_11] : memref<128x4xf32, #tpu.memory_space<vmem>>, vector<128x4xf32>
      %c0_12 = arith.constant 0 : index
      %c0_13 = arith.constant 0 : index
      %13 = vector.load %arg5[%c0_12, %c0_13] : memref<1x4xf32, #tpu.memory_space<vmem>>, vector<1x4xf32>
      %14 = vector.broadcast %13 : vector<1x4xf32> to vector<128x4xf32>
      %15 = arith.mulf %12, %14 : vector<128x4xf32>
      %c0_14 = arith.constant 0 : index
      %c0_15 = arith.constant 0 : index
      %16 = vector.load %arg6[%c0_14, %c0_15] : memref<1x4xf32, #tpu.memory_space<vmem>>, vector<1x4xf32>
      %17 = vector.broadcast %16 : vector<1x4xf32> to vector<128x4xf32>
      %18 = arith.addf %15, %17 : vector<128x4xf32>
      %cst_16 = arith.constant 0.000000e+00 : f32
      %19 = vector.broadcast %cst_16 : f32 to vector<128x4xf32>
      %20 = arith.maximumf %18, %19 : vector<128x4xf32>
      %21 = arith.truncf %20 : vector<128x4xf32> to vector<128x4xbf16>
      %c0_17 = arith.constant 0 : index
      %c0_18 = arith.constant 0 : index
      %22 = vector.load %arg7[%c0_17, %c0_18] : memref<128x4xbf16, #tpu.memory_space<vmem>>, vector<128x4xbf16>
      tpu.vector_store %arg7[%c0_17, %c0_18], %21 {strides = array<i32>} : memref<128x4xbf16, #tpu.memory_space<vmem>>, vector<128x4xbf16>,
    } else {
    }
    return
  }
  func.func @transform_0(%arg0: i32, %arg1: i32, %arg2: i32) -> (i32, i32) {
    %c0_i32 = arith.constant 0 : i32
    return %arg0, %arg2 : i32, i32
  }
  func.func @transform_1(%arg0: i32, %arg1: i32, %arg2: i32) -> (i32, i32) {
    %c0_i32 = arith.constant 0 : i32
    return %arg2, %arg1 : i32, i32
  }
  func.func @transform_2(%arg0: i32, %arg1: i32, %arg2: i32) -> (i32, i32) {
    %c0_i32 = arith.constant 0 : i32
    %c0_i32_0 = arith.constant 0 : i32
    return %c0_i32, %arg1 : i32, i32
  }
  func.func @transform_3(%arg0: i32, %arg1: i32, %arg2: i32) -> (i32, i32) {
    %c0_i32 = arith.constant 0 : i32
    %c0_i32_0 = arith.constant 0 : i32
    return %c0_i32, %arg1 : i32, i32
  }
  func.func @transform_4(%arg0: i32, %arg1: i32, %arg2: i32) -> (i32, i32) {
    %c0_i32 = arith.constant 0 : i32
    return %arg0, %arg1 : i32, i32
  }
}

module attributes {stable_mosaic.version = 11 : i64} {
  func.func @kernel(%arg0: i32, %arg1: i32, %arg2: i32, %arg3: memref<128x4xbf16, #tpu.memory_space<vmem>>, %arg4: memref<4x16xbf16, #tpu.memory_space<vmem>>, %arg5: memref<1x16xf32, #tpu.memory_space<vmem>>, %arg6: memref<1x16xf32, #tpu.memory_space<vmem>>, %arg7: memref<128x16xbf16, #tpu.memory_space<vmem>>, %arg8: memref<128x16xf32, #tpu.memory_space<vmem>>, %arg9: memref<128x16xf32, #tpu.memory_space<vmem>>) attributes {dimension_semantics = [#tpu.dimension_semantics<parallel>, #tpu.dimension_semantics<parallel>, #tpu.dimension_semantics<arbitrary>], iteration_bounds = array<i64: 1, 1, 1>, scalar_prefetch = 0 : i64, scratch_operands = 1 : i64, tpu.core_type = #tpu.core_type<tc>, window_params = [{transform_indices = @transform_0, window_bounds = array<i64: 128, 4>}, {transform_indices = @transform_1, window_bounds = array<i64: 4, 16>}, {transform_indices = @transform_2, window_bounds = array<i64: 1, 16>}, {transform_indices = @transform_3, window_bounds = array<i64: 1, 16>}, {transform_indices = @transform_4, window_bounds = array<i64: 128, 16>}, {transform_indices = @transform_5, window_bounds = array<i64: 128, 16>}]} {
    %c0_i32 = arith.constant 0 : i32
    %0 = arith.cmpi eq, %arg2, %c0_i32 : i32
    %1 = arith.extui %0 : i1 to i32
    %c0_i32_0 = arith.constant 0 : i32
    %2 = arith.cmpi ne, %1, %c0_i32_0 : i32
    scf.if %2 {
      %cst_10 = arith.constant 0.000000e+00 : f32
      %12 = vector.broadcast %cst_10 : f32 to vector<128x16xf32>
      %c0_11 = arith.constant 0 : index
      %c0_12 = arith.constant 0 : index
      %13 = vector.load %arg9[%c0_11, %c0_12] : memref<128x16xf32, #tpu.memory_space<vmem>>, vector<128x16xf32>
      tpu.vector_store %arg9[%c0_11, %c0_12], %12 {strides = array<i32>} : memref<128x16xf32, #tpu.memory_space<vmem>>, vector<128x16xf32>,
    } else {
    }
    %c0 = arith.constant 0 : index
    %c0_1 = arith.constant 0 : index
    %3 = vector.load %arg9[%c0, %c0_1] : memref<128x16xf32, #tpu.memory_space<vmem>>, vector<128x16xf32>
    %c0_2 = arith.constant 0 : index
    %c0_3 = arith.constant 0 : index
    %4 = vector.load %arg3[%c0_2, %c0_3] : memref<128x4xbf16, #tpu.memory_space<vmem>>, vector<128x4xbf16>
    %c0_4 = arith.constant 0 : index
    %c0_5 = arith.constant 0 : index
    %5 = vector.load %arg4[%c0_4, %c0_5] : memref<4x16xbf16, #tpu.memory_space<vmem>>, vector<4x16xbf16>
    %cst = arith.constant dense<0.000000e+00> : vector<128x16xf32>
    %6 = tpu.matmul %4, %5, %cst {dimension_numbers = #tpu.dot_dimension_numbers<[1], [0], [0], [1], [0, 0, 1, 1], [], []>} : vector<128x4xbf16>, vector<4x16xbf16>, vector<128x16xf32> -> vector<128x16xf32>
    %7 = arith.addf %3, %6 : vector<128x16xf32>
    %c0_6 = arith.constant 0 : index
    %c0_7 = arith.constant 0 : index
    %8 = vector.load %arg9[%c0_6, %c0_7] : memref<128x16xf32, #tpu.memory_space<vmem>>, vector<128x16xf32>
    tpu.vector_store %arg9[%c0_6, %c0_7], %7 {strides = array<i32>} : memref<128x16xf32, #tpu.memory_space<vmem>>, vector<128x16xf32>,
    %c0_i32_8 = arith.constant 0 : i32
    %9 = arith.cmpi eq, %arg2, %c0_i32_8 : i32
    %10 = arith.extui %9 : i1 to i32
    %c0_i32_9 = arith.constant 0 : i32
    %11 = arith.cmpi ne, %10, %c0_i32_9 : i32
    scf.if %11 {
      %c0_10 = arith.constant 0 : index
      %c0_11 = arith.constant 0 : index
      %12 = vector.load %arg9[%c0_10, %c0_11] : memref<128x16xf32, #tpu.memory_space<vmem>>, vector<128x16xf32>
      %c0_12 = arith.constant 0 : index
      %c0_13 = arith.constant 0 : index
      %13 = vector.load %arg5[%c0_12, %c0_13] : memref<1x16xf32, #tpu.memory_space<vmem>>, vector<1x16xf32>
      %14 = vector.broadcast %13 : vector<1x16xf32> to vector<128x16xf32>
      %15 = arith.mulf %12, %14 : vector<128x16xf32>
      %c0_14 = arith.constant 0 : index
      %c0_15 = arith.constant 0 : index
      %16 = vector.load %arg6[%c0_14, %c0_15] : memref<1x16xf32, #tpu.memory_space<vmem>>, vector<1x16xf32>
      %17 = vector.broadcast %16 : vector<1x16xf32> to vector<128x16xf32>
      %18 = arith.addf %15, %17 : vector<128x16xf32>
      %c0_16 = arith.constant 0 : index
      %c0_17 = arith.constant 0 : index
      %19 = vector.load %arg7[%c0_16, %c0_17] : memref<128x16xbf16, #tpu.memory_space<vmem>>, vector<128x16xbf16>
      %20 = arith.extf %19 : vector<128x16xbf16> to vector<128x16xf32>
      %21 = arith.addf %18, %20 : vector<128x16xf32>
      %cst_18 = arith.constant 0.000000e+00 : f32
      %22 = vector.broadcast %cst_18 : f32 to vector<128x16xf32>
      %23 = arith.maximumf %21, %22 : vector<128x16xf32>
      %c0_19 = arith.constant 0 : index
      %c0_20 = arith.constant 0 : index
      %24 = vector.load %arg8[%c0_19, %c0_20] : memref<128x16xf32, #tpu.memory_space<vmem>>, vector<128x16xf32>
      tpu.vector_store %arg8[%c0_19, %c0_20], %23 {strides = array<i32>} : memref<128x16xf32, #tpu.memory_space<vmem>>, vector<128x16xf32>,
    } else {
    }
    return
  }
  func.func @transform_0(%arg0: i32, %arg1: i32, %arg2: i32) -> (i32, i32) {
    %c0_i32 = arith.constant 0 : i32
    return %arg0, %arg2 : i32, i32
  }
  func.func @transform_1(%arg0: i32, %arg1: i32, %arg2: i32) -> (i32, i32) {
    %c0_i32 = arith.constant 0 : i32
    return %arg2, %arg1 : i32, i32
  }
  func.func @transform_2(%arg0: i32, %arg1: i32, %arg2: i32) -> (i32, i32) {
    %c0_i32 = arith.constant 0 : i32
    %c0_i32_0 = arith.constant 0 : i32
    return %c0_i32, %arg1 : i32, i32
  }
  func.func @transform_3(%arg0: i32, %arg1: i32, %arg2: i32) -> (i32, i32) {
    %c0_i32 = arith.constant 0 : i32
    %c0_i32_0 = arith.constant 0 : i32
    return %c0_i32, %arg1 : i32, i32
  }
  func.func @transform_4(%arg0: i32, %arg1: i32, %arg2: i32) -> (i32, i32) {
    %c0_i32 = arith.constant 0 : i32
    return %arg0, %arg1 : i32, i32
  }
  func.func @transform_5(%arg0: i32, %arg1: i32, %arg2: i32) -> (i32, i32) {
    %c0_i32 = arith.constant 0 : i32
    return %arg0, %arg1 : i32, i32
  }
}

module attributes {stable_mosaic.version = 11 : i64} {
  func.func @_conv3x3_kernel(%arg0: i32, %arg1: memref<1x122x4xbf16, #tpu.memory_space<vmem>>, %arg2: memref<9x4x4xbf16, #tpu.memory_space<vmem>>, %arg3: memref<1x4xf32, #tpu.memory_space<vmem>>, %arg4: memref<1x4xf32, #tpu.memory_space<vmem>>, %arg5: memref<1x64x4xbf16, #tpu.memory_space<vmem>>, %arg6: memref<100x4xf32, #tpu.memory_space<vmem>>) attributes {dimension_semantics = [#tpu.dimension_semantics<parallel>], iteration_bounds = array<i64: 2>, scalar_prefetch = 0 : i64, scratch_operands = 1 : i64, tpu.core_type = #tpu.core_type<tc>, window_params = [{transform_indices = @transform_0, window_bounds = array<i64: 1, 122, 4>}, {pipeline_mode = #tpu.pipeline_mode<synchronous>, transform_indices = @transform_1, window_bounds = array<i64: 9, 4, 4>}, {pipeline_mode = #tpu.pipeline_mode<synchronous>, transform_indices = @transform_2, window_bounds = array<i64: 1, 4>}, {pipeline_mode = #tpu.pipeline_mode<synchronous>, transform_indices = @transform_3, window_bounds = array<i64: 1, 4>}, {transform_indices = @transform_4, window_bounds = array<i64: 1, 64, 4>}]} {
    %c0 = arith.constant 0 : index
    %c0_0 = arith.constant 0 : index
    %c0_1 = arith.constant 0 : index
    %0 = vector.load %arg1[%c0, %c0_0, %c0_1] : memref<1x122x4xbf16, #tpu.memory_space<vmem>>, vector<1x100x4xbf16>
    %1 = vector.shape_cast %0 : vector<1x100x4xbf16> to vector<100x4xbf16>
    %c0_2 = arith.constant 0 : index
    %c0_3 = arith.constant 0 : index
    %c0_4 = arith.constant 0 : index
    %2 = vector.load %arg2[%c0_2, %c0_3, %c0_4] : memref<9x4x4xbf16, #tpu.memory_space<vmem>>, vector<1x4x4xbf16>
    %3 = vector.shape_cast %2 : vector<1x4x4xbf16> to vector<4x4xbf16>
    %cst = arith.constant dense<0.000000e+00> : vector<100x4xf32>
    %4 = tpu.matmul %1, %3, %cst {dimension_numbers = #tpu.dot_dimension_numbers<[1], [0], [0], [1], [0, 0, 1, 1], [], []>} : vector<100x4xbf16>, vector<4x4xbf16>, vector<100x4xf32> -> vector<100x4xf32>
    %c0_5 = arith.constant 0 : index
    %c0_6 = arith.constant 0 : index
    %5 = vector.load %arg6[%c0_5, %c0_6] : memref<100x4xf32, #tpu.memory_space<vmem>>, vector<100x4xf32>
    tpu.vector_store %arg6[%c0_5, %c0_6], %4 {strides = array<i32>} : memref<100x4xf32, #tpu.memory_space<vmem>>, vector<100x4xf32>,
    %c0_7 = arith.constant 0 : index
    %c1 = arith.constant 1 : index
    %c0_8 = arith.constant 0 : index
    %6 = vector.load %arg1[%c0_7, %c1, %c0_8] : memref<1x122x4xbf16, #tpu.memory_space<vmem>>, vector<1x100x4xbf16>
    %7 = vector.shape_cast %6 : vector<1x100x4xbf16> to vector<100x4xbf16>
    %c1_9 = arith.constant 1 : index
    %c0_10 = arith.constant 0 : index
    %c0_11 = arith.constant 0 : index
    %8 = vector.load %arg2[%c1_9, %c0_10, %c0_11] : memref<9x4x4xbf16, #tpu.memory_space<vmem>>, vector<1x4x4xbf16>
    %9 = vector.shape_cast %8 : vector<1x4x4xbf16> to vector<4x4xbf16>
    %cst_12 = arith.constant dense<0.000000e+00> : vector<100x4xf32>
    %10 = tpu.matmul %7, %9, %cst_12 {dimension_numbers = #tpu.dot_dimension_numbers<[1], [0], [0], [1], [0, 0, 1, 1], [], []>} : vector<100x4xbf16>, vector<4x4xbf16>, vector<100x4xf32> -> vector<100x4xf32>
    %c0_13 = arith.constant 0 : index
    %c0_14 = arith.constant 0 : index
    %11 = vector.load %arg6[%c0_13, %c0_14] : memref<100x4xf32, #tpu.memory_space<vmem>>, vector<100x4xf32>
    %12 = arith.addf %11, %10 : vector<100x4xf32>
    %c0_15 = arith.constant 0 : index
    %c0_16 = arith.constant 0 : index
    %13 = vector.load %arg6[%c0_15, %c0_16] : memref<100x4xf32, #tpu.memory_space<vmem>>, vector<100x4xf32>
    tpu.vector_store %arg6[%c0_15, %c0_16], %12 {strides = array<i32>} : memref<100x4xf32, #tpu.memory_space<vmem>>, vector<100x4xf32>,
    %c0_17 = arith.constant 0 : index
    %c2 = arith.constant 2 : index
    %c0_18 = arith.constant 0 : index
    %14 = vector.load %arg1[%c0_17, %c2, %c0_18] : memref<1x122x4xbf16, #tpu.memory_space<vmem>>, vector<1x100x4xbf16>
    %15 = vector.shape_cast %14 : vector<1x100x4xbf16> to vector<100x4xbf16>
    %c2_19 = arith.constant 2 : index
    %c0_20 = arith.constant 0 : index
    %c0_21 = arith.constant 0 : index
    %16 = vector.load %arg2[%c2_19, %c0_20, %c0_21] : memref<9x4x4xbf16, #tpu.memory_space<vmem>>, vector<1x4x4xbf16>
    %17 = vector.shape_cast %16 : vector<1x4x4xbf16> to vector<4x4xbf16>
    %cst_22 = arith.constant dense<0.000000e+00> : vector<100x4xf32>
    %18 = tpu.matmul %15, %17, %cst_22 {dimension_numbers = #tpu.dot_dimension_numbers<[1], [0], [0], [1], [0, 0, 1, 1], [], []>} : vector<100x4xbf16>, vector<4x4xbf16>, vector<100x4xf32> -> vector<100x4xf32>
    %c0_23 = arith.constant 0 : index
    %c0_24 = arith.constant 0 : index
    %19 = vector.load %arg6[%c0_23, %c0_24] : memref<100x4xf32, #tpu.memory_space<vmem>>, vector<100x4xf32>
    %20 = arith.addf %19, %18 : vector<100x4xf32>
    %c0_25 = arith.constant 0 : index
    %c0_26 = arith.constant 0 : index
    %21 = vector.load %arg6[%c0_25, %c0_26] : memref<100x4xf32, #tpu.memory_space<vmem>>, vector<100x4xf32>
    tpu.vector_store %arg6[%c0_25, %c0_26], %20 {strides = array<i32>} : memref<100x4xf32, #tpu.memory_space<vmem>>, vector<100x4xf32>,
    %c0_27 = arith.constant 0 : index
    %c10 = arith.constant 10 : index
    %c0_28 = arith.constant 0 : index
    %22 = vector.load %arg1[%c0_27, %c10, %c0_28] : memref<1x122x4xbf16, #tpu.memory_space<vmem>>, vector<1x100x4xbf16>
    %23 = vector.shape_cast %22 : vector<1x100x4xbf16> to vector<100x4xbf16>
    %c3 = arith.constant 3 : index
    %c0_29 = arith.constant 0 : index
    %c0_30 = arith.constant 0 : index
    %24 = vector.load %arg2[%c3, %c0_29, %c0_30] : memref<9x4x4xbf16, #tpu.memory_space<vmem>>, vector<1x4x4xbf16>
    %25 = vector.shape_cast %24 : vector<1x4x4xbf16> to vector<4x4xbf16>
    %cst_31 = arith.constant dense<0.000000e+00> : vector<100x4xf32>
    %26 = tpu.matmul %23, %25, %cst_31 {dimension_numbers = #tpu.dot_dimension_numbers<[1], [0], [0], [1], [0, 0, 1, 1], [], []>} : vector<100x4xbf16>, vector<4x4xbf16>, vector<100x4xf32> -> vector<100x4xf32>
    %c0_32 = arith.constant 0 : index
    %c0_33 = arith.constant 0 : index
    %27 = vector.load %arg6[%c0_32, %c0_33] : memref<100x4xf32, #tpu.memory_space<vmem>>, vector<100x4xf32>
    %28 = arith.addf %27, %26 : vector<100x4xf32>
    %c0_34 = arith.constant 0 : index
    %c0_35 = arith.constant 0 : index
    %29 = vector.load %arg6[%c0_34, %c0_35] : memref<100x4xf32, #tpu.memory_space<vmem>>, vector<100x4xf32>
    tpu.vector_store %arg6[%c0_34, %c0_35], %28 {strides = array<i32>} : memref<100x4xf32, #tpu.memory_space<vmem>>, vector<100x4xf32>,
    %c0_36 = arith.constant 0 : index
    %c11 = arith.constant 11 : index
    %c0_37 = arith.constant 0 : index
    %30 = vector.load %arg1[%c0_36, %c11, %c0_37] : memref<1x122x4xbf16, #tpu.memory_space<vmem>>, vector<1x100x4xbf16>
    %31 = vector.shape_cast %30 : vector<1x100x4xbf16> to vector<100x4xbf16>
    %c4 = arith.constant 4 : index
    %c0_38 = arith.constant 0 : index
    %c0_39 = arith.constant 0 : index
    %32 = vector.load %arg2[%c4, %c0_38, %c0_39] : memref<9x4x4xbf16, #tpu.memory_space<vmem>>, vector<1x4x4xbf16>
    %33 = vector.shape_cast %32 : vector<1x4x4xbf16> to vector<4x4xbf16>
    %cst_40 = arith.constant dense<0.000000e+00> : vector<100x4xf32>
    %34 = tpu.matmul %31, %33, %cst_40 {dimension_numbers = #tpu.dot_dimension_numbers<[1], [0], [0], [1], [0, 0, 1, 1], [], []>} : vector<100x4xbf16>, vector<4x4xbf16>, vector<100x4xf32> -> vector<100x4xf32>
    %c0_41 = arith.constant 0 : index
    %c0_42 = arith.constant 0 : index
    %35 = vector.load %arg6[%c0_41, %c0_42] : memref<100x4xf32, #tpu.memory_space<vmem>>, vector<100x4xf32>
    %36 = arith.addf %35, %34 : vector<100x4xf32>
    %c0_43 = arith.constant 0 : index
    %c0_44 = arith.constant 0 : index
    %37 = vector.load %arg6[%c0_43, %c0_44] : memref<100x4xf32, #tpu.memory_space<vmem>>, vector<100x4xf32>
    tpu.vector_store %arg6[%c0_43, %c0_44], %36 {strides = array<i32>} : memref<100x4xf32, #tpu.memory_space<vmem>>, vector<100x4xf32>,
    %c0_45 = arith.constant 0 : index
    %c12 = arith.constant 12 : index
    %c0_46 = arith.constant 0 : index
    %38 = vector.load %arg1[%c0_45, %c12, %c0_46] : memref<1x122x4xbf16, #tpu.memory_space<vmem>>, vector<1x100x4xbf16>
    %39 = vector.shape_cast %38 : vector<1x100x4xbf16> to vector<100x4xbf16>
    %c5 = arith.constant 5 : index
    %c0_47 = arith.constant 0 : index
    %c0_48 = arith.constant 0 : index
    %40 = vector.load %arg2[%c5, %c0_47, %c0_48] : memref<9x4x4xbf16, #tpu.memory_space<vmem>>, vector<1x4x4xbf16>
    %41 = vector.shape_cast %40 : vector<1x4x4xbf16> to vector<4x4xbf16>
    %cst_49 = arith.constant dense<0.000000e+00> : vector<100x4xf32>
    %42 = tpu.matmul %39, %41, %cst_49 {dimension_numbers = #tpu.dot_dimension_numbers<[1], [0], [0], [1], [0, 0, 1, 1], [], []>} : vector<100x4xbf16>, vector<4x4xbf16>, vector<100x4xf32> -> vector<100x4xf32>
    %c0_50 = arith.constant 0 : index
    %c0_51 = arith.constant 0 : index
    %43 = vector.load %arg6[%c0_50, %c0_51] : memref<100x4xf32, #tpu.memory_space<vmem>>, vector<100x4xf32>
    %44 = arith.addf %43, %42 : vector<100x4xf32>
    %c0_52 = arith.constant 0 : index
    %c0_53 = arith.constant 0 : index
    %45 = vector.load %arg6[%c0_52, %c0_53] : memref<100x4xf32, #tpu.memory_space<vmem>>, vector<100x4xf32>
    tpu.vector_store %arg6[%c0_52, %c0_53], %44 {strides = array<i32>} : memref<100x4xf32, #tpu.memory_space<vmem>>, vector<100x4xf32>,
    %c0_54 = arith.constant 0 : index
    %c20 = arith.constant 20 : index
    %c0_55 = arith.constant 0 : index
    %46 = vector.load %arg1[%c0_54, %c20, %c0_55] : memref<1x122x4xbf16, #tpu.memory_space<vmem>>, vector<1x100x4xbf16>
    %47 = vector.shape_cast %46 : vector<1x100x4xbf16> to vector<100x4xbf16>
    %c6 = arith.constant 6 : index
    %c0_56 = arith.constant 0 : index
    %c0_57 = arith.constant 0 : index
    %48 = vector.load %arg2[%c6, %c0_56, %c0_57] : memref<9x4x4xbf16, #tpu.memory_space<vmem>>, vector<1x4x4xbf16>
    %49 = vector.shape_cast %48 : vector<1x4x4xbf16> to vector<4x4xbf16>
    %cst_58 = arith.constant dense<0.000000e+00> : vector<100x4xf32>
    %50 = tpu.matmul %47, %49, %cst_58 {dimension_numbers = #tpu.dot_dimension_numbers<[1], [0], [0], [1], [0, 0, 1, 1], [], []>} : vector<100x4xbf16>, vector<4x4xbf16>, vector<100x4xf32> -> vector<100x4xf32>
    %c0_59 = arith.constant 0 : index
    %c0_60 = arith.constant 0 : index
    %51 = vector.load %arg6[%c0_59, %c0_60] : memref<100x4xf32, #tpu.memory_space<vmem>>, vector<100x4xf32>
    %52 = arith.addf %51, %50 : vector<100x4xf32>
    %c0_61 = arith.constant 0 : index
    %c0_62 = arith.constant 0 : index
    %53 = vector.load %arg6[%c0_61, %c0_62] : memref<100x4xf32, #tpu.memory_space<vmem>>, vector<100x4xf32>
    tpu.vector_store %arg6[%c0_61, %c0_62], %52 {strides = array<i32>} : memref<100x4xf32, #tpu.memory_space<vmem>>, vector<100x4xf32>,
    %c0_63 = arith.constant 0 : index
    %c21 = arith.constant 21 : index
    %c0_64 = arith.constant 0 : index
    %54 = vector.load %arg1[%c0_63, %c21, %c0_64] : memref<1x122x4xbf16, #tpu.memory_space<vmem>>, vector<1x100x4xbf16>
    %55 = vector.shape_cast %54 : vector<1x100x4xbf16> to vector<100x4xbf16>
    %c7 = arith.constant 7 : index
    %c0_65 = arith.constant 0 : index
    %c0_66 = arith.constant 0 : index
    %56 = vector.load %arg2[%c7, %c0_65, %c0_66] : memref<9x4x4xbf16, #tpu.memory_space<vmem>>, vector<1x4x4xbf16>
    %57 = vector.shape_cast %56 : vector<1x4x4xbf16> to vector<4x4xbf16>
    %cst_67 = arith.constant dense<0.000000e+00> : vector<100x4xf32>
    %58 = tpu.matmul %55, %57, %cst_67 {dimension_numbers = #tpu.dot_dimension_numbers<[1], [0], [0], [1], [0, 0, 1, 1], [], []>} : vector<100x4xbf16>, vector<4x4xbf16>, vector<100x4xf32> -> vector<100x4xf32>
    %c0_68 = arith.constant 0 : index
    %c0_69 = arith.constant 0 : index
    %59 = vector.load %arg6[%c0_68, %c0_69] : memref<100x4xf32, #tpu.memory_space<vmem>>, vector<100x4xf32>
    %60 = arith.addf %59, %58 : vector<100x4xf32>
    %c0_70 = arith.constant 0 : index
    %c0_71 = arith.constant 0 : index
    %61 = vector.load %arg6[%c0_70, %c0_71] : memref<100x4xf32, #tpu.memory_space<vmem>>, vector<100x4xf32>
    tpu.vector_store %arg6[%c0_70, %c0_71], %60 {strides = array<i32>} : memref<100x4xf32, #tpu.memory_space<vmem>>, vector<100x4xf32>,
    %c0_72 = arith.constant 0 : index
    %c22 = arith.constant 22 : index
    %c0_73 = arith.constant 0 : index
    %62 = vector.load %arg1[%c0_72, %c22, %c0_73] : memref<1x122x4xbf16, #tpu.memory_space<vmem>>, vector<1x100x4xbf16>
    %63 = vector.shape_cast %62 : vector<1x100x4xbf16> to vector<100x4xbf16>
    %c8 = arith.constant 8 : index
    %c0_74 = arith.constant 0 : index
    %c0_75 = arith.constant 0 : index
    %64 = vector.load %arg2[%c8, %c0_74, %c0_75] : memref<9x4x4xbf16, #tpu.memory_space<vmem>>, vector<1x4x4xbf16>
    %65 = vector.shape_cast %64 : vector<1x4x4xbf16> to vector<4x4xbf16>
    %cst_76 = arith.constant dense<0.000000e+00> : vector<100x4xf32>
    %66 = tpu.matmul %63, %65, %cst_76 {dimension_numbers = #tpu.dot_dimension_numbers<[1], [0], [0], [1], [0, 0, 1, 1], [], []>} : vector<100x4xbf16>, vector<4x4xbf16>, vector<100x4xf32> -> vector<100x4xf32>
    %c0_77 = arith.constant 0 : index
    %c0_78 = arith.constant 0 : index
    %67 = vector.load %arg6[%c0_77, %c0_78] : memref<100x4xf32, #tpu.memory_space<vmem>>, vector<100x4xf32>
    %68 = arith.addf %67, %66 : vector<100x4xf32>
    %c0_79 = arith.constant 0 : index
    %c0_80 = arith.constant 0 : index
    %69 = vector.load %arg6[%c0_79, %c0_80] : memref<100x4xf32, #tpu.memory_space<vmem>>, vector<100x4xf32>
    tpu.vector_store %arg6[%c0_79, %c0_80], %68 {strides = array<i32>} : memref<100x4xf32, #tpu.memory_space<vmem>>, vector<100x4xf32>,
    %c0_81 = arith.constant 0 : index
    %c0_82 = arith.constant 0 : index
    %70 = vector.load %arg6[%c0_81, %c0_82] : memref<100x4xf32, #tpu.memory_space<vmem>>, vector<100x4xf32>
    %c0_83 = arith.constant 0 : index
    %c0_84 = arith.constant 0 : index
    %71 = vector.load %arg3[%c0_83, %c0_84] : memref<1x4xf32, #tpu.memory_space<vmem>>, vector<1x4xf32>
    %72 = vector.broadcast %71 : vector<1x4xf32> to vector<100x4xf32>
    %73 = arith.mulf %70, %72 : vector<100x4xf32>
    %c0_85 = arith.constant 0 : index
    %c0_86 = arith.constant 0 : index
    %74 = vector.load %arg4[%c0_85, %c0_86] : memref<1x4xf32, #tpu.memory_space<vmem>>, vector<1x4xf32>
    %75 = vector.broadcast %74 : vector<1x4xf32> to vector<100x4xf32>
    %76 = arith.addf %73, %75 : vector<100x4xf32>
    %cst_87 = arith.constant 0.000000e+00 : f32
    %77 = vector.broadcast %cst_87 : f32 to vector<100x4xf32>
    %78 = arith.maximumf %76, %77 : vector<100x4xf32>
    %79 = arith.truncf %78 : vector<100x4xf32> to vector<100x4xbf16>
    %80 = vector.extract_strided_slice %79 {offsets = [11, 0], sizes = [8, 4], strides = [1, 1]} : vector<100x4xbf16> to vector<8x4xbf16>
    %c0_88 = arith.constant 0 : index
    %c0_89 = arith.constant 0 : index
    %c0_90 = arith.constant 0 : index
    %81 = vector.load %arg5[%c0_88, %c0_89, %c0_90] : memref<1x64x4xbf16, #tpu.memory_space<vmem>>, vector<1x8x4xbf16>
    %82 = vector.shape_cast %81 : vector<1x8x4xbf16> to vector<8x4xbf16>
    %83 = vector.shape_cast %80 : vector<8x4xbf16> to vector<1x8x4xbf16>
    tpu.vector_store %arg5[%c0_88, %c0_89, %c0_90], %83 {strides = array<i32>} : memref<1x64x4xbf16, #tpu.memory_space<vmem>>, vector<1x8x4xbf16>,
    %84 = vector.extract_strided_slice %79 {offsets = [21, 0], sizes = [8, 4], strides = [1, 1]} : vector<100x4xbf16> to vector<8x4xbf16>
    %c0_91 = arith.constant 0 : index
    %c8_92 = arith.constant 8 : index
    %c0_93 = arith.constant 0 : index
    %85 = vector.load %arg5[%c0_91, %c8_92, %c0_93] : memref<1x64x4xbf16, #tpu.memory_space<vmem>>, vector<1x8x4xbf16>
    %86 = vector.shape_cast %85 : vector<1x8x4xbf16> to vector<8x4xbf16>
    %87 = vector.shape_cast %84 : vector<8x4xbf16> to vector<1x8x4xbf16>
    tpu.vector_store %arg5[%c0_91, %c8_92, %c0_93], %87 {strides = array<i32>} : memref<1x64x4xbf16, #tpu.memory_space<vmem>>, vector<1x8x4xbf16>,
    %88 = vector.extract_strided_slice %79 {offsets = [31, 0], sizes = [8, 4], strides = [1, 1]} : vector<100x4xbf16> to vector<8x4xbf16>
    %c0_94 = arith.constant 0 : index
    %c16 = arith.constant 16 : index
    %c0_95 = arith.constant 0 : index
    %89 = vector.load %arg5[%c0_94, %c16, %c0_95] : memref<1x64x4xbf16, #tpu.memory_space<vmem>>, vector<1x8x4xbf16>
    %90 = vector.shape_cast %89 : vector<1x8x4xbf16> to vector<8x4xbf16>
    %91 = vector.shape_cast %88 : vector<8x4xbf16> to vector<1x8x4xbf16>
    tpu.vector_store %arg5[%c0_94, %c16, %c0_95], %91 {strides = array<i32>} : memref<1x64x4xbf16, #tpu.memory_space<vmem>>, vector<1x8x4xbf16>,
    %92 = vector.extract_strided_slice %79 {offsets = [41, 0], sizes = [8, 4], strides = [1, 1]} : vector<100x4xbf16> to vector<8x4xbf16>
    %c0_96 = arith.constant 0 : index
    %c24 = arith.constant 24 : index
    %c0_97 = arith.constant 0 : index
    %93 = vector.load %arg5[%c0_96, %c24, %c0_97] : memref<1x64x4xbf16, #tpu.memory_space<vmem>>, vector<1x8x4xbf16>
    %94 = vector.shape_cast %93 : vector<1x8x4xbf16> to vector<8x4xbf16>
    %95 = vector.shape_cast %92 : vector<8x4xbf16> to vector<1x8x4xbf16>
    tpu.vector_store %arg5[%c0_96, %c24, %c0_97], %95 {strides = array<i32>} : memref<1x64x4xbf16, #tpu.memory_space<vmem>>, vector<1x8x4xbf16>,
    %96 = vector.extract_strided_slice %79 {offsets = [51, 0], sizes = [8, 4], strides = [1, 1]} : vector<100x4xbf16> to vector<8x4xbf16>
    %c0_98 = arith.constant 0 : index
    %c32 = arith.constant 32 : index
    %c0_99 = arith.constant 0 : index
    %97 = vector.load %arg5[%c0_98, %c32, %c0_99] : memref<1x64x4xbf16, #tpu.memory_space<vmem>>, vector<1x8x4xbf16>
    %98 = vector.shape_cast %97 : vector<1x8x4xbf16> to vector<8x4xbf16>
    %99 = vector.shape_cast %96 : vector<8x4xbf16> to vector<1x8x4xbf16>
    tpu.vector_store %arg5[%c0_98, %c32, %c0_99], %99 {strides = array<i32>} : memref<1x64x4xbf16, #tpu.memory_space<vmem>>, vector<1x8x4xbf16>,
    %100 = vector.extract_strided_slice %79 {offsets = [61, 0], sizes = [8, 4], strides = [1, 1]} : vector<100x4xbf16> to vector<8x4xbf16>
    %c0_100 = arith.constant 0 : index
    %c40 = arith.constant 40 : index
    %c0_101 = arith.constant 0 : index
    %101 = vector.load %arg5[%c0_100, %c40, %c0_101] : memref<1x64x4xbf16, #tpu.memory_space<vmem>>, vector<1x8x4xbf16>
    %102 = vector.shape_cast %101 : vector<1x8x4xbf16> to vector<8x4xbf16>
    %103 = vector.shape_cast %100 : vector<8x4xbf16> to vector<1x8x4xbf16>
    tpu.vector_store %arg5[%c0_100, %c40, %c0_101], %103 {strides = array<i32>} : memref<1x64x4xbf16, #tpu.memory_space<vmem>>, vector<1x8x4xbf16>,
    %104 = vector.extract_strided_slice %79 {offsets = [71, 0], sizes = [8, 4], strides = [1, 1]} : vector<100x4xbf16> to vector<8x4xbf16>
    %c0_102 = arith.constant 0 : index
    %c48 = arith.constant 48 : index
    %c0_103 = arith.constant 0 : index
    %105 = vector.load %arg5[%c0_102, %c48, %c0_103] : memref<1x64x4xbf16, #tpu.memory_space<vmem>>, vector<1x8x4xbf16>
    %106 = vector.shape_cast %105 : vector<1x8x4xbf16> to vector<8x4xbf16>
    %107 = vector.shape_cast %104 : vector<8x4xbf16> to vector<1x8x4xbf16>
    tpu.vector_store %arg5[%c0_102, %c48, %c0_103], %107 {strides = array<i32>} : memref<1x64x4xbf16, #tpu.memory_space<vmem>>, vector<1x8x4xbf16>,
    %108 = vector.extract_strided_slice %79 {offsets = [81, 0], sizes = [8, 4], strides = [1, 1]} : vector<100x4xbf16> to vector<8x4xbf16>
    %c0_104 = arith.constant 0 : index
    %c56 = arith.constant 56 : index
    %c0_105 = arith.constant 0 : index
    %109 = vector.load %arg5[%c0_104, %c56, %c0_105] : memref<1x64x4xbf16, #tpu.memory_space<vmem>>, vector<1x8x4xbf16>
    %110 = vector.shape_cast %109 : vector<1x8x4xbf16> to vector<8x4xbf16>
    %111 = vector.shape_cast %108 : vector<8x4xbf16> to vector<1x8x4xbf16>
    tpu.vector_store %arg5[%c0_104, %c56, %c0_105], %111 {strides = array<i32>} : memref<1x64x4xbf16, #tpu.memory_space<vmem>>, vector<1x8x4xbf16>,
    return
  }
  func.func @transform_0(%arg0: i32) -> (i32, i32, i32) {
    %c0_i32 = arith.constant 0 : i32
    %c0_i32_0 = arith.constant 0 : i32
    %c0_i32_1 = arith.constant 0 : i32
    return %arg0, %c0_i32, %c0_i32_0 : i32, i32, i32
  }
  func.func @transform_1(%arg0: i32) -> (i32, i32, i32) {
    %c0_i32 = arith.constant 0 : i32
    %c0_i32_0 = arith.constant 0 : i32
    %c0_i32_1 = arith.constant 0 : i32
    %c0_i32_2 = arith.constant 0 : i32
    return %c0_i32, %c0_i32_0, %c0_i32_1 : i32, i32, i32
  }
  func.func @transform_2(%arg0: i32) -> (i32, i32) {
    %c0_i32 = arith.constant 0 : i32
    %c0_i32_0 = arith.constant 0 : i32
    %c0_i32_1 = arith.constant 0 : i32
    return %c0_i32, %c0_i32_0 : i32, i32
  }
  func.func @transform_3(%arg0: i32) -> (i32, i32) {
    %c0_i32 = arith.constant 0 : i32
    %c0_i32_0 = arith.constant 0 : i32
    %c0_i32_1 = arith.constant 0 : i32
    return %c0_i32, %c0_i32_0 : i32, i32
  }
  func.func @transform_4(%arg0: i32) -> (i32, i32, i32) {
    %c0_i32 = arith.constant 0 : i32
    %c0_i32_0 = arith.constant 0 : i32
    %c0_i32_1 = arith.constant 0 : i32
    return %arg0, %c0_i32, %c0_i32_0 : i32, i32, i32
  }
}

</mosaic_0001>

<bundles_post_ra>
// kernel: bottleneck_forward.3
= control target key start
LH: loop header
LB: loop body
LE: loop exit
PB: predicated region body
PF: predicated region fallthrough
CT: control target
= control target key end

     0   :  { %vm22_vm0 = vcmask 31744   ;;  %v530_v1 = vmov 0.0   ;;  %vm119_vm1 = vcmask 130048   ;;  %vm419_vm2 = vcmask 27648   ;;  %s729_s1 = inlined_call_operand.vmem [shape: bf16[16,4], index: 1, kind: input, shape index: {}]   ;;  %s730_s0 = inlined_call_operand.vmem [shape: bf16[128,16], index: 0, kind: input, shape index: {}]   ;;  %s731_s2 = inlined_call_operand.vmem [shape: f32[1,4], index: 2, kind: input, shape index: {}]   ;;  %s732_s3 = inlined_call_operand.vmem [shape: f32[1,4], index: 3, kind: input, shape index: {}]   ;;  %s733_s4 = inlined_call_operand.vmem [shape: bf16[128,4], index: 4, kind: output, shape index: {}]  }
   0x1   :  { %v521_v0 = vld [vmem:[%s729_s1] sm:$0xff]   ;;  %25 = vst.msk [vmem:[#allocation2 + $0x10] sm:$0xff] %vm22_vm0, %v530_v1  ;;  %23 = vst.msk [vmem:[#allocation2] sm:$0xff] %vm22_vm0, %v530_v1  ;;  %v524_v4 = vld [vmem:[%s730_s0 + $0x8] sm:$0xff]  }
   0x2   :  { %24 = vst.msk [vmem:[#allocation2 + $0x8] sm:$0xff] %vm22_vm0, %v530_v1  ;;  %26 = vst.msk [vmem:[#allocation2 + $0x18] sm:$0xff] %vm22_vm0, %v530_v1  ;;  %v522_v2 = vld [vmem:[%s730_s0] sm:$0xff]   ;;  %500 = vmatprep.subr.bf16.mxu0 %v521_v0  ;;  %518 = vmatprep.subr.bf16.mxu1 %v521_v0  ;;  %v525_v5 = vld [vmem:[%s730_s0 + $0x28] sm:$0xff]  }
   0x3   :  { %27 = vst.msk [vmem:[#allocation2 + $0x20] sm:$0xff] %vm22_vm0, %v530_v1  ;;  %28 = vst.msk [vmem:[#allocation2 + $0x28] sm:$0xff] %vm22_vm0, %v530_v1  ;;  %v523_v3 = vld [vmem:[%s730_s0 + $0x20] sm:$0xff]   ;;  %501 = vmatpush3.bf16.msra.mxu0 %v521_v0  ;;  %519 = vmatpush3.bf16.msra.mxu1 %v521_v0  ;;  %v526_v6 = vld [vmem:[%s730_s0 + $0x10] sm:$0xff]  }
   0x4   :  { %29 = vst.msk [vmem:[#allocation2 + $0x30] sm:$0xff] %vm22_vm0, %v530_v1  ;;  %30 = vst.msk [vmem:[#allocation2 + $0x38] sm:$0xff] %vm22_vm0, %v530_v1  ;;  %502 = vmatprep.mubr.msk.bf16.mxu0 %vm119_vm1, %v522_v2  ;;  %510 = vmatprep.mubr.msk.bf16.mxu1 %vm119_vm1, %v523_v3  ;;  %v527_v7 = vld [vmem:[%s730_s0 + $0x30] sm:$0xff]   ;;  %v528_v8 = vld [vmem:[%s730_s0 + $0x18] sm:$0xff]  }
   0x5   :  { %31 = vst.msk [vmem:[#allocation2 + $0x40] sm:$0xff] %vm22_vm0, %v530_v1  ;;  %32 = vst.msk [vmem:[#allocation2 + $0x48] sm:$0xff] %vm22_vm0, %v530_v1  ;;  %v529_v9 = vld [vmem:[%s730_s0 + $0x38] sm:$0xff]   ;;  %v618_v38 = vld [vmem:[%s731_s2] ss:$0 sm:$0xff] }
   0x6   :  { %33 = vst.msk [vmem:[#allocation2 + $0x50] sm:$0xff] %vm22_vm0, %v530_v1  ;;  %34 = vst.msk [vmem:[#allocation2 + $0x58] sm:$0xff] %vm22_vm0, %v530_v1  ;;  %503 = vmatmul.mubr.msk.bf16.vlgmr.msra.gmra.mrb[0].mxu0 %vm119_vm1, %v524_v4  ;;  %511 = vmatmul.mubr.msk.bf16.vlgmr.msra.gmra.mrb[0].mxu1 %vm119_vm1, %v525_v5  ;;  %v623_v43 = vld [vmem:[%s732_s3] ss:$0 sm:$0xff] }
   0x7   :  { %35 = vst.msk [vmem:[#allocation2 + $0x60] sm:$0xff] %vm22_vm0, %v530_v1  ;;  %36 = vst.msk [vmem:[#allocation2 + $0x68] sm:$0xff] %vm22_vm0, %v530_v1  ;;  %506 = vmatprep.mubr.msk.bf16.mxu0 %vm119_vm1, %v526_v6  ;;  %514 = vmatprep.mubr.msk.bf16.mxu1 %vm119_vm1, %v527_v7 }
   0x8   :  { %37 = vst.msk [vmem:[#allocation2 + $0x70] sm:$0xff] %vm22_vm0, %v530_v1  ;;  %38 = vst.msk [vmem:[#allocation2 + $0x78] sm:$0xff] %vm22_vm0, %v530_v1  ;;  %v41_v10 = vld [vmem:[#allocation2 + $0x10] sm:$0xff]  ;;  %v39_v12 = vld [vmem:[#allocation2] sm:$0xff] }
   0x9   :  { %v42_v16 = vld [vmem:[#allocation2 + $0x18] sm:$0xff]  ;;  %v40_v22 = vld [vmem:[#allocation2 + $0x8] sm:$0xff] }
   0xa   :  { %v43_v36 = vld [vmem:[#allocation2 + $0x20] sm:$0xff]  ;;  %v44_v48 = vld [vmem:[#allocation2 + $0x28] sm:$0xff] }
   0xb   :  { %v45_v34 = vld [vmem:[#allocation2 + $0x30] sm:$0xff]  ;;  %v46_v41 = vld [vmem:[#allocation2 + $0x38] sm:$0xff] }
   0xc   :  { %v47_v13 = vld [vmem:[#allocation2 + $0x40] sm:$0xff]  ;;  %v48_v23 = vld [vmem:[#allocation2 + $0x48] sm:$0xff] }
   0xd   :  { %v49_v11 = vld [vmem:[#allocation2 + $0x50] sm:$0xff]  ;;  %v50_v17 = vld [vmem:[#allocation2 + $0x58] sm:$0xff] }
   0xe   :  { %507 = vmatmul.mubr.msk.bf16.gmra.mrb[4].mxu0 %vm119_vm1, %v528_v8  ;;  %515 = vmatmul.mubr.msk.bf16.gmra.mrb[4].mxu1 %vm119_vm1, %v529_v9  ;;  %v51_v37 = vld [vmem:[#allocation2 + $0x60] sm:$0xff]  ;;  %v52_v49 = vld [vmem:[#allocation2 + $0x68] sm:$0xff] }
   0xf   :  { %v53_v35 = vld [vmem:[#allocation2 + $0x70] sm:$0xff]  ;;  %v54_v42 = vld [vmem:[#allocation2 + $0x78] sm:$0xff] }
  0xd9   :  { %v504_v14 = vpop.f32.mrb[0].mxu0  ;;  %v512_v15 = vpop.f32.mrb[0].mxu1 }
  0xda   :  { %v243_v18 = vadd.f32 %v504_v14, %v41_v10  ;;  %v251_v19 = vadd.f32 %v512_v15, %v49_v11  ;;  %v178_v20 = vpop.f32.mrb[1].mxu0  ;;  %v210_v21 = vpop.f32.mrb[1].mxu1 }
  0xdb   :  { %v241_v24 = vadd.f32 %v178_v20, %v39_v12  ;;  %v249_v25 = vadd.f32 %v210_v21, %v47_v13  ;;  %v505_v26 = vpop.f32.mrb[2].mxu0  ;;  %v513_v27 = vpop.f32.mrb[2].mxu1 }
  0xdc   :  { %260 = vst.msk [vmem:[#allocation2 + $0x10] sm:$0xff] %vm22_vm0, %v243_v18  ;;  %268 = vst.msk [vmem:[#allocation2 + $0x50] sm:$0xff] %vm22_vm0, %v251_v19  ;;  %v244_v28 = vadd.f32 %v505_v26, %v42_v16  ;;  %v252_v29 = vadd.f32 %v513_v27, %v50_v17  ;;  %v181_v30 = vpop.f32.mrb[3].mxu0  ;;  %v213_v31 = vpop.f32.mrb[3].mxu1 }
  0xdd   :  { %258 = vst.msk [vmem:[#allocation2] sm:$0xff] %vm22_vm0, %v241_v24  ;;  %266 = vst.msk [vmem:[#allocation2 + $0x40] sm:$0xff] %vm22_vm0, %v249_v25  ;;  %v242_v32 = vadd.f32 %v181_v30, %v40_v22  ;;  %v250_v33 = vadd.f32 %v213_v31, %v48_v23 }
  0xde   :  { %261 = vst.msk [vmem:[#allocation2 + $0x18] sm:$0xff] %vm22_vm0, %v244_v28  ;;  %269 = vst.msk [vmem:[#allocation2 + $0x58] sm:$0xff] %vm22_vm0, %v252_v29 }
  0xdf   :  { %259 = vst.msk [vmem:[#allocation2 + $0x8] sm:$0xff] %vm22_vm0, %v242_v32  ;;  %267 = vst.msk [vmem:[#allocation2 + $0x48] sm:$0xff] %vm22_vm0, %v250_v33 }
  0xe1   :  { %v508_v39 = vpop.f32.mrb[4].mxu0  ;;  %v516_v40 = vpop.f32.mrb[4].mxu1 }
  0xe2   :  { %v247_v44 = vadd.f32 %v508_v39, %v45_v34  ;;  %v255_v45 = vadd.f32 %v516_v40, %v53_v35  ;;  %v194_v46 = vpop.f32.mrb[5].mxu0  ;;  %v226_v47 = vpop.f32.mrb[5].mxu1 }
  0xe3   :  { %v279_v50 = vld [vmem:[#allocation2 + $0x10] sm:$0xff]  ;;  %v245_v52 = vadd.f32 %v194_v46, %v43_v36  ;;  %v253_v53 = vadd.f32 %v226_v47, %v51_v37  ;;  %v509_v54 = vpop.f32.mrb[6].mxu0  ;;  %v517_v55 = vpop.f32.mrb[6].mxu1 }
  0xe4   :  { %v287_v51 = vld [vmem:[#allocation2 + $0x50] sm:$0xff]  ;;  %v302_v56 = vmul.f32 %v618_v38, %v279_v50  ;;  %v277_v58 = vld [vmem:[#allocation2] sm:$0xff]  ;;  %264 = vst.msk [vmem:[#allocation2 + $0x30] sm:$0xff] %vm22_vm0, %v247_v44  ;;  %272 = vst.msk [vmem:[#allocation2 + $0x70] sm:$0xff] %vm22_vm0, %v255_v45  ;;  %v248_v60 = vadd.f32 %v509_v54, %v46_v41  ;;  %v256_v61 = vadd.f32 %v517_v55, %v54_v42  ;;  %v197_v62 = vpop.f32.mrb[7].mxu0  ;;  %v229_v63 = vpop.f32.mrb[7].mxu1 }
  0xe5   :  { %v310_v57 = vmul.f32 %v618_v38, %v287_v51  ;;  %v285_v59 = vld [vmem:[#allocation2 + $0x40] sm:$0xff]  ;;  %v300_v0 = vmul.f32 %v618_v38, %v277_v58  ;;  %v280_v2 = vld [vmem:[#allocation2 + $0x18] sm:$0xff]  ;;  %262 = vst.msk [vmem:[#allocation2 + $0x20] sm:$0xff] %vm22_vm0, %v245_v52  ;;  %270 = vst.msk [vmem:[#allocation2 + $0x60] sm:$0xff] %vm22_vm0, %v253_v53  ;;  %v246_v4 = vadd.f32 %v197_v62, %v44_v48 }
  0xe6   :  { %v308_v1 = vmul.f32 %v618_v38, %v285_v59  ;;  %v288_v3 = vld [vmem:[#allocation2 + $0x58] sm:$0xff]  ;;  %v254_v5 = vadd.f32 %v229_v63, %v52_v49  ;;  %v325_v6 = vadd.f32 %v623_v43, %v302_v56  ;;  %v303_v8 = vmul.f32 %v618_v38, %v280_v2  ;;  %v278_v10 = vld [vmem:[#allocation2 + $0x8] sm:$0xff]  ;;  %265 = vst.msk [vmem:[#allocation2 + $0x38] sm:$0xff] %vm22_vm0, %v248_v60 }
  0xe7   :  { %v333_v7 = vadd.f32 %v623_v43, %v310_v57  ;;  %v311_v9 = vmul.f32 %v618_v38, %v288_v3  ;;  %v286_v11 = vld [vmem:[#allocation2 + $0x48] sm:$0xff]  ;;  %273 = vst.msk [vmem:[#allocation2 + $0x78] sm:$0xff] %vm22_vm0, %v256_v61  ;;  %v323_v12 = vadd.f32 %v623_v43, %v300_v0  ;;  %v301_v14 = vmul.f32 %v618_v38, %v278_v10 }
  0xe8   :  { %v331_v13 = vadd.f32 %v623_v43, %v308_v1  ;;  %v309_v15 = vmul.f32 %v618_v38, %v286_v11  ;;  %263 = vst.msk [vmem:[#allocation2 + $0x28] sm:$0xff] %vm22_vm0, %v246_v4  ;;  %271 = vst.msk [vmem:[#allocation2 + $0x68] sm:$0xff] %vm22_vm0, %v254_v5  ;;  %v341_v16 = vmax.f32 %v325_v6, 0.0  ;;  %v326_v18 = vadd.f32 %v623_v43, %v303_v8 }
  0xe9   :  { %v349_v17 = vmax.f32 %v333_v7, 0.0  ;;  %v334_v19 = vadd.f32 %v623_v43, %v311_v9  ;;  %v339_v20 = vmax.f32 %v323_v12, 0.0  ;;  %v324_v22 = vadd.f32 %v623_v43, %v301_v14 }
  0xea   :  { %v347_v21 = vmax.f32 %v331_v13, 0.0  ;;  %v332_v23 = vadd.f32 %v623_v43, %v309_v15  ;;  %v477_v24 = vpack.c.bf16 %v341_v16, %v341_v16  ;;  %v342_v26 = vmax.f32 %v326_v18, 0.0 }
  0xeb   :  { %v485_v25 = vpack.c.bf16 %v349_v17, %v349_v17  ;;  %v350_v27 = vmax.f32 %v334_v19, 0.0  ;;  %v475_v28 = vpack.c.bf16 %v339_v20, %v339_v20  ;;  %v340_v30 = vmax.f32 %v324_v22, 0.0  ;;  %v283_v32 = vld [vmem:[#allocation2 + $0x30] sm:$0xff] }
  0xec   :  { %v483_v29 = vpack.c.bf16 %v347_v21, %v347_v21  ;;  %v348_v31 = vmax.f32 %v332_v23, 0.0  ;;  %v291_v33 = vld [vmem:[#allocation2 + $0x70] sm:$0xff]  ;;  %422 = vst.msk [vmem:[%s733_s4 + $0x8] sm:$0xf] %vm419_vm2, %v477_v24  ;;  %v478_v34 = vpack.c.bf16 %v342_v26, %v342_v26  ;;  %v306_v36 = vmul.f32 %v618_v38, %v283_v32  ;;  %v281_v39 = vld [vmem:[#allocation2 + $0x20] sm:$0xff] }
  0xed   :  { %430 = vst.msk [vmem:[%s733_s4 + $0x28] sm:$0xf] %vm419_vm2, %v485_v25  ;;  %v486_v35 = vpack.c.bf16 %v350_v27, %v350_v27  ;;  %v314_v37 = vmul.f32 %v618_v38, %v291_v33  ;;  %v289_v40 = vld [vmem:[#allocation2 + $0x60] sm:$0xff]  ;;  %420 = vst.msk [vmem:[%s733_s4] sm:$0xf] %vm419_vm2, %v475_v28  ;;  %v476_v41 = vpack.c.bf16 %v340_v30, %v340_v30  ;;  %v284_v46 = vld [vmem:[#allocation2 + $0x38] sm:$0xff] }
  0xee   :  { %428 = vst.msk [vmem:[%s733_s4 + $0x20] sm:$0xf] %vm419_vm2, %v483_v29  ;;  %v484_v42 = vpack.c.bf16 %v348_v31, %v348_v31  ;;  %v304_v44 = vmul.f32 %v618_v38, %v281_v39  ;;  %v312_v45 = vmul.f32 %v618_v38, %v289_v40  ;;  %v292_v47 = vld [vmem:[#allocation2 + $0x78] sm:$0xff]  ;;  %423 = vst.msk [vmem:[%s733_s4 + $0xc] sm:$0xf] %vm419_vm2, %v478_v34 }
  0xef   :  { %431 = vst.msk [vmem:[%s733_s4 + $0x2c] sm:$0xf] %vm419_vm2, %v486_v35  ;;  %v329_v48 = vadd.f32 %v623_v43, %v306_v36  ;;  %v337_v49 = vadd.f32 %v623_v43, %v314_v37  ;;  %v307_v50 = vmul.f32 %v618_v38, %v284_v46  ;;  %v315_v51 = vmul.f32 %v618_v38, %v292_v47  ;;  %v282_v52 = vld [vmem:[#allocation2 + $0x28] sm:$0xff] }
  0xf0   :  { %v290_v53 = vld [vmem:[#allocation2 + $0x68] sm:$0xff]  ;;  %421 = vst.msk [vmem:[%s733_s4 + $0x4] sm:$0xf] %vm419_vm2, %v476_v41  ;;  %429 = vst.msk [vmem:[%s733_s4 + $0x24] sm:$0xf] %vm419_vm2, %v484_v42  ;;  %v327_v54 = vadd.f32 %v623_v43, %v304_v44  ;;  %v335_v55 = vadd.f32 %v623_v43, %v312_v45  ;;  %v305_v56 = vmul.f32 %v618_v38, %v282_v52 }
  0xf1   :  { %v313_v57 = vmul.f32 %v618_v38, %v290_v53  ;;  %v345_v58 = vmax.f32 %v329_v48, 0.0  ;;  %v353_v59 = vmax.f32 %v337_v49, 0.0  ;;  %v330_v60 = vadd.f32 %v623_v43, %v307_v50 }
  0xf2   :  { %v338_v61 = vadd.f32 %v623_v43, %v315_v51  ;;  %v343_v62 = vmax.f32 %v327_v54, 0.0  ;;  %v351_v63 = vmax.f32 %v335_v55, 0.0  ;;  %v328_v0 = vadd.f32 %v623_v43, %v305_v56 }
  0xf3   :  { %v336_v1 = vadd.f32 %v623_v43, %v313_v57  ;;  %v481_v2 = vpack.c.bf16 %v345_v58, %v345_v58  ;;  %v489_v3 = vpack.c.bf16 %v353_v59, %v353_v59  ;;  %v346_v4 = vmax.f32 %v330_v60, 0.0 }
  0xf4   :  { %v354_v5 = vmax.f32 %v338_v61, 0.0  ;;  %v479_v6 = vpack.c.bf16 %v343_v62, %v343_v62  ;;  %v487_v7 = vpack.c.bf16 %v351_v63, %v351_v63  ;;  %v344_v8 = vmax.f32 %v328_v0, 0.0 }
  0xf5   :  { %v352_v38 = vmax.f32 %v336_v1, 0.0  ;;  %426 = vst.msk [vmem:[%s733_s4 + $0x18] sm:$0xf] %vm419_vm2, %v481_v2  ;;  %434 = vst.msk [vmem:[%s733_s4 + $0x38] sm:$0xf] %vm419_vm2, %v489_v3  ;;  %v482_v9 = vpack.c.bf16 %v346_v4, %v346_v4 }
  0xf6   :  { %v490_v43 = vpack.c.bf16 %v354_v5, %v354_v5  ;;  %424 = vst.msk [vmem:[%s733_s4 + $0x10] sm:$0xf] %vm419_vm2, %v479_v6  ;;  %432 = vst.msk [vmem:[%s733_s4 + $0x30] sm:$0xf] %vm419_vm2, %v487_v7  ;;  %v480_v10 = vpack.c.bf16 %v344_v8, %v344_v8 }
  0xf7   :  { %v488_v11 = vpack.c.bf16 %v352_v38, %v352_v38  ;;  %427 = vst.msk [vmem:[%s733_s4 + $0x1c] sm:$0xf] %vm419_vm2, %v482_v9 }
  0xf8   :  { %435 = vst.msk [vmem:[%s733_s4 + $0x3c] sm:$0xf] %vm419_vm2, %v490_v43  ;;  %425 = vst.msk [vmem:[%s733_s4 + $0x14] sm:$0xf] %vm419_vm2, %v480_v10 }
  0xf9   :  { %433 = vst.msk [vmem:[%s733_s4 + $0x34] sm:$0xf] %vm419_vm2, %v488_v11 }

// kernel: bottleneck_forward.5
= control target key start
LH: loop header
LB: loop body
LE: loop exit
PB: predicated region body
PF: predicated region fallthrough
CT: control target
= control target key end

     0   :  { %vm141_vm0 = vcmask 1041408   ;;  %vm116_vm1 = vcmask 31744   ;;  %vm26_vm2 = vcmask 130048   ;;  %v560_v6 = vmov 0.0   ;;  %s819_s0 = inlined_call_operand.vmem [shape: bf16[128,4], index: 0, kind: input, shape index: {}]   ;;  %s820_s1 = inlined_call_operand.vmem [shape: bf16[4,16], index: 1, kind: input, shape index: {}]   ;;  %s821_s2 = inlined_call_operand.vmem [shape: f32[1,16], index: 2, kind: input, shape index: {}]   ;;  %s822_s3 = inlined_call_operand.vmem [shape: f32[1,16], index: 3, kind: input, shape index: {}]   ;;  %s823_s4 = inlined_call_operand.vmem [shape: bf16[128,16], index: 4, kind: input, shape index: {}]   ;;  %s824_s5 = inlined_call_operand.hbm [shape: f32[128,16], index: 5, kind: output, shape index: {}]  }
   0x1   :  { %v75_v0 = vld [vmem:[%s820_s1] sm:$0x3]  ;;  %v530_v4 = vld [vmem:[%s819_s0 + $0x8] sm:$0xff]   ;;  %29 = vst.msk [vmem:[#allocation2 + $0x10] sm:$0xff] %vm26_vm2, %v560_v6  ;;  %27 = vst.msk [vmem:[#allocation2] sm:$0xff] %vm26_vm2, %v560_v6 }
   0x2   :  { %v528_v1 = vld [vmem:[%s819_s0] sm:$0xff]   ;;  %522 = vmatprep.subr.msk.bf16.mxu0 %vm141_vm0, %v75_v0  ;;  %523 = vmatprep.subr.msk.bf16.mxu1 %vm141_vm0, %v75_v0  ;;  %v143_v2 = vsel %vm141_vm0, %v75_v0, 0  ;;  %v531_v5 = vld [vmem:[%s819_s0 + $0x28] sm:$0xff]   ;;  %28 = vst.msk [vmem:[#allocation2 + $0x8] sm:$0xff] %vm26_vm2, %v560_v6  ;;  %30 = vst.msk [vmem:[#allocation2 + $0x18] sm:$0xff] %vm26_vm2, %v560_v6 }
   0x3   :  { %503 = vmatpush3.bf16.msra.mxu0 %v143_v2  ;;  %521 = vmatpush3.bf16.msra.mxu1 %v143_v2  ;;  %v529_v3 = vld [vmem:[%s819_s0 + $0x20] sm:$0xff]   ;;  %31 = vst.msk [vmem:[#allocation2 + $0x20] sm:$0xff] %vm26_vm2, %v560_v6  ;;  %32 = vst.msk [vmem:[#allocation2 + $0x28] sm:$0xff] %vm26_vm2, %v560_v6  ;;  %v532_v7 = vld [vmem:[%s819_s0 + $0x10] sm:$0xff]  }
   0x4   :  { %504 = vmatprep.mubr.msk.bf16.mxu0 %vm116_vm1, %v528_v1  ;;  %512 = vmatprep.mubr.msk.bf16.mxu1 %vm116_vm1, %v529_v3  ;;  %33 = vst.msk [vmem:[#allocation2 + $0x30] sm:$0xff] %vm26_vm2, %v560_v6  ;;  %34 = vst.msk [vmem:[#allocation2 + $0x38] sm:$0xff] %vm26_vm2, %v560_v6  ;;  %v533_v8 = vld [vmem:[%s819_s0 + $0x30] sm:$0xff]  }
   0x5   :  { %35 = vst.msk [vmem:[#allocation2 + $0x40] sm:$0xff] %vm26_vm2, %v560_v6  ;;  %36 = vst.msk [vmem:[#allocation2 + $0x48] sm:$0xff] %vm26_vm2, %v560_v6 }
   0x6   :  { %37 = vst.msk [vmem:[#allocation2 + $0x50] sm:$0xff] %vm26_vm2, %v560_v6  ;;  %38 = vst.msk [vmem:[#allocation2 + $0x58] sm:$0xff] %vm26_vm2, %v560_v6  ;;  %505 = vmatmul.mubr.msk.bf16.vlgmr.msra.gmra.mrb[0].mxu0 %vm116_vm1, %v530_v4  ;;  %513 = vmatmul.mubr.msk.bf16.vlgmr.msra.gmra.mrb[0].mxu1 %vm116_vm1, %v531_v5 }
   0x7   :  { %39 = vst.msk [vmem:[#allocation2 + $0x60] sm:$0xff] %vm26_vm2, %v560_v6  ;;  %40 = vst.msk [vmem:[#allocation2 + $0x68] sm:$0xff] %vm26_vm2, %v560_v6  ;;  %508 = vmatprep.mubr.msk.bf16.mxu0 %vm116_vm1, %v532_v7  ;;  %516 = vmatprep.mubr.msk.bf16.mxu1 %vm116_vm1, %v533_v8 }
   0x8   :  { %41 = vst.msk [vmem:[#allocation2 + $0x70] sm:$0xff] %vm26_vm2, %v560_v6  ;;  %42 = vst.msk [vmem:[#allocation2 + $0x78] sm:$0xff] %vm26_vm2, %v560_v6 }
   0x9   :  { %10 = vsyncpa [#allocation4], 0  ;;  %v534_v9 = vld [vmem:[%s819_s0 + $0x18] sm:$0xff]   ;;  %v45_v11 = vld [vmem:[#allocation2 + $0x10] sm:$0xff] }
   0xa   :  { %v535_v10 = vld [vmem:[%s819_s0 + $0x38] sm:$0xff]   ;;  %v43_v13 = vld [vmem:[#allocation2] sm:$0xff]  ;;  %v44_v21 = vld [vmem:[#allocation2 + $0x8] sm:$0xff] }
   0xb   :  { %v46_v16 = vld [vmem:[#allocation2 + $0x18] sm:$0xff]  ;;  %v649_v27 = vld [vmem:[%s823_s4 + $0x8] sm:$0xff]   ;;  %v661_v33 = vld [vmem:[%s823_s4] sm:$0xff]  }
   0xc   :  { %v51_v15 = vld [vmem:[#allocation2 + $0x40] sm:$0xff]  ;;  %v52_v26 = vld [vmem:[#allocation2 + $0x48] sm:$0xff]  ;;  %v673_v39 = vld [vmem:[%s823_s4 + $0x18] sm:$0xff]   ;;  %v460_v41 = vunpack.c.l.bf16 %v649_v27  ;;  %v456_v46 = vunpack.c.l.bf16 %v661_v33  ;;  %v461_v48 = vunpack.c.h.bf16 %v649_v27  ;;  %v457_v53 = vunpack.c.h.bf16 %v661_v33 }
   0xd   :  { %v53_v12 = vld [vmem:[#allocation2 + $0x50] sm:$0xff]  ;;  %v54_v20 = vld [vmem:[#allocation2 + $0x58] sm:$0xff]  ;;  %v654_v28 = vld [vmem:[%s823_s4 + $0x28] sm:$0xff]   ;;  %v468_v56 = vunpack.c.l.bf16 %v673_v39  ;;  %v469_v1 = vunpack.c.h.bf16 %v673_v39 }
   0xe   :  { %509 = vmatmul.mubr.msk.bf16.gmra.mrb[4].mxu0 %vm116_vm1, %v534_v9  ;;  %517 = vmatmul.mubr.msk.bf16.gmra.mrb[4].mxu1 %vm116_vm1, %v535_v10  ;;  %v666_v34 = vld [vmem:[%s823_s4 + $0x20] sm:$0xff]   ;;  %v678_v40 = vld [vmem:[%s823_s4 + $0x38] sm:$0xff]   ;;  %v476_v42 = vunpack.c.l.bf16 %v654_v28  ;;  %v49_v43 = vld [vmem:[#allocation2 + $0x30] sm:$0xff]  ;;  %v477_v49 = vunpack.c.h.bf16 %v654_v28 }
   0xf   :  { %v687_v44 = vld [vmem:[%s823_s4 + $0x10] sm:$0xff]   ;;  %v472_v47 = vunpack.c.l.bf16 %v666_v34  ;;  %v47_v51 = vld [vmem:[#allocation2 + $0x20] sm:$0xff]  ;;  %v473_v54 = vunpack.c.h.bf16 %v666_v34  ;;  %v484_v57 = vunpack.c.l.bf16 %v678_v40  ;;  %v50_v59 = vld [vmem:[#allocation2 + $0x38] sm:$0xff]  ;;  %v485_v10 = vunpack.c.h.bf16 %v678_v40 }
  0x10   :  { %v692_v45 = vld [vmem:[%s823_s4 + $0x30] sm:$0xff]   ;;  %v702_v52 = vld [vmem:[%s821_s2] ss:$0 sm:$0xff]  ;;  %v464_v63 = vunpack.c.l.bf16 %v687_v44  ;;  %v58_v2 = vld [vmem:[#allocation2 + $0x78] sm:$0xff] }
  0x11   :  { %v57_v50 = vld [vmem:[#allocation2 + $0x70] sm:$0xff]  ;;  %v55_v58 = vld [vmem:[#allocation2 + $0x60] sm:$0xff]  ;;  %v480_v0 = vunpack.c.l.bf16 %v692_v45  ;;  %v48_v3 = vld [vmem:[#allocation2 + $0x28] sm:$0xff] }
  0x12   :  { %v714_v5 = vld [vmem:[%s822_s3] ss:$0 sm:$0xff]  ;;  %s561_s3 = smov [#allocation3]  }
  0x13   :  { %s425_s26 = sshll.u32 %s561_s3, 4  ;;  %s426_s26 = int_to_ptr.vmem [resolvable:$true] %s425_s26 }
  0x14   :  { %s536_s27 = scalar_lea.vmem %s426_s26, 2048  ;;  %p541_p1 = scmp.lt.s32.totalorder %s426_s26, %s426_s26 }
  0x15   :  { %p537_p0 = scmp.ne.s32.totalorder %s426_s26, %s536_s27  ;;  %p542_p2 = scmp.lt.s32.totalorder %s536_s27, %s536_s27 }
  0x17   :  { %p543_p3 = por %p542_p2, %p541_p1 }
  0x19   :  { %p544_p4 = pnand %p543_p3, %p537_p0 }
  0xd9   :  { %v506_v14 = vpop.f32.mrb[0].mxu0  ;;  %v514_v18 = vpop.f32.mrb[0].mxu1 }
  0xda   :  { %v244_v17 = vadd.f32 %v506_v14, %v45_v11  ;;  %v179_v19 = vpop.f32.mrb[1].mxu0  ;;  %v252_v22 = vadd.f32 %v514_v18, %v53_v12  ;;  %v211_v24 = vpop.f32.mrb[1].mxu1  ;;  %v465_v11 = vunpack.c.h.bf16 %v687_v44  ;;  %v56_v12 = vld [vmem:[#allocation2 + $0x68] sm:$0xff] }
  0xdb   :  { %v242_v23 = vadd.f32 %v179_v19, %v43_v13  ;;  %v507_v25 = vpop.f32.mrb[2].mxu0  ;;  %v250_v29 = vadd.f32 %v211_v24, %v51_v15  ;;  %v515_v31 = vpop.f32.mrb[2].mxu1 }
  0xdc   :  { %261 = vst.msk [vmem:[#allocation2 + $0x10] sm:$0xff] %vm26_vm2, %v244_v17  ;;  %v245_v30 = vadd.f32 %v507_v25, %v46_v16  ;;  %v182_v32 = vpop.f32.mrb[3].mxu0  ;;  %269 = vst.msk [vmem:[#allocation2 + $0x50] sm:$0xff] %vm26_vm2, %v252_v22  ;;  %v253_v35 = vadd.f32 %v515_v31, %v54_v20  ;;  %v214_v37 = vpop.f32.mrb[3].mxu1  ;;  %v481_v20 = vunpack.c.h.bf16 %v692_v45 }
  0xdd   :  { %259 = vst.msk [vmem:[#allocation2] sm:$0xff] %vm26_vm2, %v242_v23  ;;  %v243_v36 = vadd.f32 %v182_v32, %v44_v21  ;;  %267 = vst.msk [vmem:[#allocation2 + $0x40] sm:$0xff] %vm26_vm2, %v250_v29  ;;  %v251_v38 = vadd.f32 %v214_v37, %v52_v26 }
  0xde   :  { %262 = vst.msk [vmem:[#allocation2 + $0x18] sm:$0xff] %vm26_vm2, %v245_v30  ;;  %270 = vst.msk [vmem:[#allocation2 + $0x58] sm:$0xff] %vm26_vm2, %v253_v35 }
  0xdf   :  { %260 = vst.msk [vmem:[#allocation2 + $0x8] sm:$0xff] %vm26_vm2, %v243_v36  ;;  %268 = vst.msk [vmem:[#allocation2 + $0x48] sm:$0xff] %vm26_vm2, %v251_v38 }
  0xe1   :  { %v510_v55 = vpop.f32.mrb[4].mxu0  ;;  %v518_v61 = vpop.f32.mrb[4].mxu1 }
  0xe2   :  { %v248_v60 = vadd.f32 %v510_v55, %v49_v43  ;;  %v195_v62 = vpop.f32.mrb[5].mxu0  ;;  %v256_v6 = vadd.f32 %v518_v61, %v57_v50  ;;  %v227_v8 = vpop.f32.mrb[5].mxu1 }
  0xe3   :  { %v280_v4 = vld [vmem:[#allocation2 + $0x10] sm:$0xff]  ;;  %v246_v7 = vadd.f32 %v195_v62, %v47_v51  ;;  %v511_v9 = vpop.f32.mrb[6].mxu0  ;;  %v254_v16 = vadd.f32 %v227_v8, %v55_v58  ;;  %v519_v18 = vpop.f32.mrb[6].mxu1 }
  0xe4   :  { %v303_v13 = vmul.f32 %v702_v52, %v280_v4  ;;  %v288_v14 = vld [vmem:[#allocation2 + $0x50] sm:$0xff]  ;;  %v278_v15 = vld [vmem:[#allocation2] sm:$0xff]  ;;  %265 = vst.msk [vmem:[#allocation2 + $0x30] sm:$0xff] %vm26_vm2, %v248_v60  ;;  %v249_v17 = vadd.f32 %v511_v9, %v50_v59  ;;  %v198_v19 = vpop.f32.mrb[7].mxu0  ;;  %273 = vst.msk [vmem:[#allocation2 + $0x70] sm:$0xff] %vm26_vm2, %v256_v6  ;;  %v257_v25 = vadd.f32 %v519_v18, %v58_v2  ;;  %v230_v29 = vpop.f32.mrb[7].mxu1 }
  0xe5   :  { %v311_v21 = vmul.f32 %v702_v52, %v288_v14  ;;  %v301_v22 = vmul.f32 %v702_v52, %v278_v15  ;;  %v286_v23 = vld [vmem:[#allocation2 + $0x40] sm:$0xff]  ;;  %v281_v24 = vld [vmem:[#allocation2 + $0x18] sm:$0xff]  ;;  %263 = vst.msk [vmem:[#allocation2 + $0x20] sm:$0xff] %vm26_vm2, %v246_v7  ;;  %v247_v26 = vadd.f32 %v198_v19, %v48_v3  ;;  %271 = vst.msk [vmem:[#allocation2 + $0x60] sm:$0xff] %vm26_vm2, %v254_v16 }
  0xe6   :  { %v326_v30 = vadd.f32 %v714_v5, %v303_v13  ;;  %v309_v31 = vmul.f32 %v702_v52, %v286_v23  ;;  %v304_v32 = vmul.f32 %v702_v52, %v281_v24  ;;  %v289_v35 = vld [vmem:[#allocation2 + $0x58] sm:$0xff]  ;;  %v279_v36 = vld [vmem:[#allocation2 + $0x8] sm:$0xff]  ;;  %266 = vst.msk [vmem:[#allocation2 + $0x38] sm:$0xff] %vm26_vm2, %v249_v17  ;;  %v255_v37 = vadd.f32 %v230_v29, %v56_v12 }
  0xe7   :  { %v334_v38 = vadd.f32 %v714_v5, %v311_v21  ;;  %v324_v43 = vadd.f32 %v714_v5, %v301_v22  ;;  %v312_v50 = vmul.f32 %v702_v52, %v289_v35  ;;  %v302_v51 = vmul.f32 %v702_v52, %v279_v36  ;;  %v287_v55 = vld [vmem:[#allocation2 + $0x48] sm:$0xff]  ;;  %274 = vst.msk [vmem:[#allocation2 + $0x78] sm:$0xff] %vm26_vm2, %v257_v25 }
  0xe8   :  { %264 = vst.msk [vmem:[#allocation2 + $0x28] sm:$0xff] %vm26_vm2, %v247_v26  ;;  %v374_v58 = vadd.f32 %v460_v41, %v326_v30  ;;  %v332_v59 = vadd.f32 %v714_v5, %v309_v31  ;;  %v327_v60 = vadd.f32 %v714_v5, %v304_v32  ;;  %v310_v61 = vmul.f32 %v702_v52, %v287_v55 }
  0xe9   :  { %272 = vst.msk [vmem:[#allocation2 + $0x68] sm:$0xff] %vm26_vm2, %v255_v37  ;;  %v382_v62 = vadd.f32 %v476_v42, %v334_v38  ;;  %v372_v2 = vadd.f32 %v456_v46, %v324_v43  ;;  %v335_v3 = vadd.f32 %v714_v5, %v312_v50  ;;  %v325_v4 = vadd.f32 %v714_v5, %v302_v51 }
  0xea   :  { %v390_v6 = vmax.f32 %v374_v58, 0.0  ;;  %v380_v41 = vadd.f32 %v472_v47, %v332_v59  ;;  %v375_v7 = vadd.f32 %v461_v48, %v327_v60  ;;  %v333_v8 = vadd.f32 %v714_v5, %v310_v61 }
  0xeb   :  { %v398_v9 = vmax.f32 %v382_v62, 0.0  ;;  %v388_v12 = vmax.f32 %v372_v2, 0.0  ;;  %v383_v42 = vadd.f32 %v477_v49, %v335_v3  ;;  %v373_v46 = vadd.f32 %v457_v53, %v325_v4  ;;  %v284_v13 = vld [vmem:[#allocation2 + $0x30] sm:$0xff] }
  0xec   :  { %406 = vst.msk [vmem:[#allocation3 + $0x10] sm:$0xff] %vm26_vm2, %v390_v6  ;;  %v396_v14 = vmax.f32 %v380_v41, 0.0  ;;  %v391_v15 = vmax.f32 %v375_v7, 0.0  ;;  %v381_v47 = vadd.f32 %v473_v54, %v333_v8  ;;  %v307_v27 = vmul.f32 %v702_v52, %v284_v13  ;;  %v292_v48 = vld [vmem:[#allocation2 + $0x70] sm:$0xff]  ;;  %v282_v16 = vld [vmem:[#allocation2 + $0x20] sm:$0xff] }
  0xed   :  { %414 = vst.msk [vmem:[#allocation3 + $0x50] sm:$0xff] %vm26_vm2, %v398_v9  ;;  %404 = vst.msk [vmem:[#allocation3] sm:$0xff] %vm26_vm2, %v388_v12  ;;  %v399_v28 = vmax.f32 %v383_v42, 0.0  ;;  %v389_v49 = vmax.f32 %v373_v46, 0.0  ;;  %v315_v33 = vmul.f32 %v702_v52, %v292_v48  ;;  %v305_v53 = vmul.f32 %v702_v52, %v282_v16  ;;  %v290_v17 = vld [vmem:[#allocation2 + $0x60] sm:$0xff]  ;;  %v285_v18 = vld [vmem:[#allocation2 + $0x38] sm:$0xff] }
  0xee   :  { %412 = vst.msk [vmem:[#allocation3 + $0x40] sm:$0xff] %vm26_vm2, %v396_v14  ;;  %407 = vst.msk [vmem:[#allocation3 + $0x18] sm:$0xff] %vm26_vm2, %v391_v15  ;;  %v397_v34 = vmax.f32 %v381_v47, 0.0  ;;  %v330_v54 = vadd.f32 %v714_v5, %v307_v27  ;;  %v313_v19 = vmul.f32 %v702_v52, %v290_v17  ;;  %v308_v21 = vmul.f32 %v702_v52, %v285_v18  ;;  %v293_v22 = vld [vmem:[#allocation2 + $0x78] sm:$0xff] }
  0xef   :  { %v283_v23 = vld [vmem:[#allocation2 + $0x28] sm:$0xff]  ;;  %415 = vst.msk [vmem:[#allocation3 + $0x58] sm:$0xff] %vm26_vm2, %v399_v28  ;;  %405 = vst.msk [vmem:[#allocation3 + $0x8] sm:$0xff] %vm26_vm2, %v389_v49  ;;  %v338_v24 = vadd.f32 %v714_v5, %v315_v33  ;;  %v328_v25 = vadd.f32 %v714_v5, %v305_v53  ;;  %v316_v26 = vmul.f32 %v702_v52, %v293_v22 }
  0xf0   :  { %v306_v29 = vmul.f32 %v702_v52, %v283_v23  ;;  %v291_v30 = vld [vmem:[#allocation2 + $0x68] sm:$0xff]  ;;  %413 = vst.msk [vmem:[#allocation3 + $0x48] sm:$0xff] %vm26_vm2, %v397_v34  ;;  %v378_v31 = vadd.f32 %v468_v56, %v330_v54  ;;  %v336_v32 = vadd.f32 %v714_v5, %v313_v19  ;;  %v331_v35 = vadd.f32 %v714_v5, %v308_v21 }
  0xf1   :  { %v314_v36 = vmul.f32 %v702_v52, %v291_v30  ;;  %v386_v37 = vadd.f32 %v484_v57, %v338_v24  ;;  %v376_v38 = vadd.f32 %v464_v63, %v328_v25  ;;  %v339_v43 = vadd.f32 %v714_v5, %v316_v26 }
  0xf2   :  { %v329_v50 = vadd.f32 %v714_v5, %v306_v29  ;;  %v394_v51 = vmax.f32 %v378_v31, 0.0  ;;  %v384_v56 = vadd.f32 %v480_v0, %v336_v32  ;;  %v379_v55 = vadd.f32 %v469_v1, %v331_v35 }
  0xf3   :  { %v337_v58 = vadd.f32 %v714_v5, %v314_v36  ;;  %v402_v52 = vmax.f32 %v386_v37, 0.0  ;;  %v392_v57 = vmax.f32 %v376_v38, 0.0  ;;  %v387_v63 = vadd.f32 %v485_v10, %v339_v43 }
  0xf4   :  { %v377_v59 = vadd.f32 %v465_v11, %v329_v50  ;;  %410 = vst.msk [vmem:[#allocation3 + $0x30] sm:$0xff] %vm26_vm2, %v394_v51  ;;  %v400_v60 = vmax.f32 %v384_v56, 0.0  ;;  %v395_v61 = vmax.f32 %v379_v55, 0.0 }
  0xf5   :  { %v385_v39 = vadd.f32 %v481_v20, %v337_v58  ;;  %418 = vst.msk [vmem:[#allocation3 + $0x70] sm:$0xff] %vm26_vm2, %v402_v52  ;;  %408 = vst.msk [vmem:[#allocation3 + $0x20] sm:$0xff] %vm26_vm2, %v392_v57  ;;  %v403_v0 = vmax.f32 %v387_v63, 0.0 }
  0xf6   :  { %v393_v1 = vmax.f32 %v377_v59, 0.0  ;;  %416 = vst.msk [vmem:[#allocation3 + $0x60] sm:$0xff] %vm26_vm2, %v400_v60  ;;  %411 = vst.msk [vmem:[#allocation3 + $0x38] sm:$0xff] %vm26_vm2, %v395_v61 }
  0xf7   :  { %v401_v40 = vmax.f32 %v385_v39, 0.0  ;;  %419 = vst.msk [vmem:[#allocation3 + $0x78] sm:$0xff] %vm26_vm2, %v403_v0 }
  0xf8   :  { %409 = vst.msk [vmem:[#allocation3 + $0x28] sm:$0xff] %vm26_vm2, %v393_v1 }
  0xf9   :  { %417 = vst.msk [vmem:[#allocation3 + $0x68] sm:$0xff] %vm26_vm2, %v401_v40 }
  0xfa   :  { %547 = shalt.err (!%p544_p4)
}
  0xfb   :  { %s548_s30 = scalar_lea.hbm %s824_s5, 2048 }
  0xfc   :  { %p549_p5 = scmp.ne.s32.totalorder %s824_s5, %s548_s30  ;;  %p552_p6 = scmp.lt.u32.totalorder %s548_s30, %s824_s5 }
  0xfe   :  { %p554_p7 = pnand %p552_p6, %p549_p5 }
 0x100   :  { %557 = shalt.err (!%p554_p7)
}
 0x101   :  { %s562_s0 = smov 128   ;;  %s563_s10 = smov 8  }
 0x102   :  { %431 = dma.vmem_to_hbm [thread:$0]  %s426_s26, 2048, %s824_s5, [#allocation4], %s562_s0, %s562_s0, %s563_s10  }
 0x103   :  { %558 = dma.done.wait [#allocation4], 2048  }
 0x104   :  { %559 = vsyncadd [#allocation4], 4294965248 }
 0x105   :  { %435 = vsyncpa [#allocation4], 1 }

// kernel: bottleneck_forward.4
= control target key start
LH: loop header
LB: loop body
LE: loop exit
PB: predicated region body
PF: predicated region fallthrough
CT: control target
= control target key end

     0   :  { %s3133_s15 = smov 0   ;;  %s3717_s0 = inlined_call_operand.vmem [shape: bf16[2,122,4], index: 0, kind: input, shape index: {}]   ;;  %s3718_s1 = inlined_call_operand.vmem [shape: bf16[9,4,4], index: 1, kind: input, shape index: {}]   ;;  %s3719_s2 = inlined_call_operand.vmem [shape: f32[1,4], index: 2, kind: input, shape index: {}]   ;;  %s3720_s3 = inlined_call_operand.vmem [shape: f32[1,4], index: 3, kind: input, shape index: {}]   ;;  %s3721_s4 = inlined_call_operand.vmem [shape: bf16[2,64,4], index: 4, kind: output, shape index: {}]  }
   0x1 LB: > { %s2508_s16 = sadd.s32 4294967295, %s3104_s15   ;;  %p2512_p0 = scmp.ge.s32.totalorder %s3104_s15, 1  ;;  %s3104_s15 = sphi %s3133_s15, %s14_s15  }
   0x2   : > { %p162_p1 = scmp.lt.s32.totalorder %s3104_s15, 3 }
   0x4   : > { %p163_p2 = pnand %p2512_p0, %p162_p1 }
   0x5   : > { %v212_v0 = vld [vmem:[%s3718_s1] sm:$0x3] (!%p163_p2)  ;;  %vm268_vm0 = vcmask (!%p163_p2), 1041408   ;;  %p188_p3 = scmp.lt.s32.totalorder (!%p163_p2), %s2508_s16, 1  ;;  %v3106_v1 = vmov (!%p163_p2), 0.0   ;;  %vm3107_vm1 = vmmov (!%p163_p2), 0  }
   0x6   : > { %166 = sbr.rel (%p163_p2) target bundleno = 501 (0x1f5), region = 36  ;;  %3023 = vmatprep.subr.bf16.mxu1 (!%p163_p2), %v3106_v1  ;;  %2753 = vmatprep.subr.bf16.mxu0 (!%p163_p2), %v3106_v1  ;;  %v270_v2 = vsel (!%p163_p2), %vm268_vm0, %v212_v0, 0  ;;  %v2546_v3 = vld [vmem:[%s3718_s1 + $0x4] sm:$0x3] (!%p163_p2)  ;;  %v2531_v4 = vld [vmem:[%s3718_s1 + $0x2] sm:$0x3] (!%p163_p2) }
   0x7   : > { %3024 = vmatpush3.bf16.msra.mxu1 (!%p163_p2), %v270_v2  ;;  %2754 = vmatpush3.bf16.msra.mxu0 (!%p163_p2), %v270_v2  ;;  %vm246_vm2 = vcmask (!%p163_p2), 31744   ;;  %v713_v6 = vsel (!%p163_p2), %vm268_vm0, %v2546_v3, 0  ;;  %v500_v8 = vsel (!%p163_p2), %vm268_vm0, %v2531_v4, 0  ;;  %vm422_vm3 = vsmask.f32 (!%p163_p2), 7424 }
   0x8   : > { %2755 = vmatprep.mubr.msk.bf16.mxu0 (!%p163_p2), %vm3107_vm1, %v3106_v1  ;;  %2771 = vmatprep.mubr.msk.bf16.mxu1 (!%p163_p2), %vm3107_vm1, %v3106_v1  ;;  %v2561_v24 = vld [vmem:[%s3718_s1 + $0x6] sm:$0x3] (!%p163_p2)  ;;  %vm677_vm4 = vcmask (!%p163_p2), 1046528   ;;  %v2576_v35 = vld [vmem:[%s3718_s1 + $0x8] sm:$0x3] (!%p163_p2)  ;;  %vm1364_vm6 = vcmask (!%p163_p2), 1045504  }
   0x9   : > { %2783 = vmatprep.subr.bf16.mxu1 (!%p163_p2), %v3106_v1  ;;  %2813 = vmatprep.subr.bf16.mxu0 (!%p163_p2), %v3106_v1  ;;  %v925_v29 = vsel (!%p163_p2), %vm268_vm0, %v2561_v24, 0  ;;  %v1187_v40 = vsel (!%p163_p2), %vm268_vm0, %v2576_v35, 0  ;;  %vm1102_vm5 = vsmask.f32 (!%p163_p2), 6400  ;;  %vm1792_vm7 = vsmask.f32 (!%p163_p2), 5376 }
   0xa   : > { %vm2057_vm8 = vcmask (!%p163_p2), 1044480   ;;  %vm372_vm9 = vcmask (!%p163_p2), 27648   ;;  %vm2296_vm10 = vsmask.f32 (!%p163_p2), 2304  ;;  %vm2297_vm11 = vsmask.f32 (!%p163_p2), 6416 }
   0xb   : > { %vm2321_vm12 = vsmask.f32 (!%p163_p2), 1280  ;;  %vm2322_vm13 = vsmask.f32 (!%p163_p2), 5392  ;;  %vm3625_vm14 = vmor (!%p163_p2), %vm2296_vm10, %vm2297_vm11 }
   0xc   : > { %vm3645_vm15 = vmor (!%p163_p2), %vm2321_vm12, %vm2322_vm13 }
   0xd   : > { %s3731_s16 = smov (!%p188_p3, %s2508_s16), 1 }
   0xe   : > { %s2668_s21 = sshll.u32 %s3731_s16, 6  ;;  %s2669_s19 = sshll.u32 %s3731_s16, 5 }
   0xf   : > { %s3165_s26 = scalar_lea.vmem %s3717_s0, %s2668_s21  ;;  %s3637_s21 = scalar_lea.vmem %s3721_s4, %s2669_s19 }
  0x10   : > { %v3035_v5 = vld [vmem:[%s3165_s26] sm:$0xff]   ;;  %v3037_v9 = vld [vmem:[%s3165_s26 + $0x8] sm:$0xff]   ;;  %v3040_v14 = vld [vmem:[%s3165_s26 + $0x30] ss:$0 sps:$4 sm:$0x33]  }
  0x11   : > { %v3036_v7 = vld [vmem:[%s3165_s26 + $0x20] sm:$0xff]   ;;  %2756 = vmatmul.mubr.msk.bf16.vlgmr.msra.gmra.mrb[0].mxu0 %vm246_vm2, %v3035_v5  ;;  %v3038_v10 = vld [vmem:[%s3165_s26 + $0x28] sm:$0xff]   ;;  %v3039_v15 = vld [vmem:[%s3165_s26 + $0x10] sm:$0xff]  }
  0x12   : > { %2772 = vmatmul.mubr.msk.bf16.vlgmr.msra.gmra.mrb[0].mxu1 %vm246_vm2, %v3036_v7  ;;  %2814 = vmatpush3.bf16.msra.mxu0 %v713_v6  ;;  %v3042_v11 = vld [vmem:[%s3165_s26] sm:$0xff]   ;;  %v3043_v12 = vld [vmem:[%s3165_s26 + $0x8] sm:$0xff]   ;;  %v3044_v21 = vld [vmem:[%s3165_s26 + $0x10] sm:$0xff]  }
  0x13   : > { %2784 = vmatpush3.bf16.msra.mxu1 %v500_v8  ;;  %2759 = vmatprep.mubr.msk.bf16.mxu0 %vm3107_vm1, %v3106_v1  ;;  %v426_v13 = vshll.u32 %v3042_v11, 16  ;;  %v424_v16 = vshrl.u32 %v3042_v11, 16  ;;  %v431_v18 = vshll.u32 %v3043_v12, 16  ;;  %v3046_v22 = vld [vmem:[%s3165_s26 + $0x8] sm:$0xff]   ;;  %v3041_v23 = vld [vmem:[%s3165_s26 + $0x18] sm:$0xff]   ;;  %v435_v27 = vshrl.u32 %v3043_v12, 16 }
  0x14   : > { %2775 = vmatprep.mubr.msk.bf16.mxu1 %vm3107_vm1, %v3106_v1  ;;  %2843 = vmatprep.subr.bf16.mxu1 %v3106_v1  ;;  %v3045_v25 = vld [vmem:[%s3165_s26] sm:$0xfe]   ;;  %v439_v28 = vshll.u32 %v3044_v21, 16  ;;  %v679_v30 = vrot.slane %v3046_v22, 1  ;;  %v3047_v32 = vld [vmem:[%s3165_s26 + $0x18] sm:$0xff]   ;;  %v3048_v38 = vld [vmem:[%s3165_s26 + $0x10] sm:$0xff]  }
  0x15   : > { %2873 = vmatprep.subr.bf16.mxu0 %v3106_v1  ;;  %v428_v17 = vrot.slane %v426_v13, 1  ;;  %v433_v20 = vrot.slane %v431_v18, 1  ;;  %v678_v31 = vrot.slane %v3045_v25, 1  ;;  %v447_v37 = vshll.u32 %v3047_v32, 16  ;;  %v3049_v44 = vld [vmem:[%s3165_s26 + $0x20] sm:$0xff]   ;;  %v3050_v47 = vld [vmem:[%s3165_s26 + $0x18] sm:$0xff]  }
  0x16   : > { %v441_v34 = vrot.slane %v439_v28, 1  ;;  %v443_v41 = vshrl.u32 %v3044_v21, 16  ;;  %v681_v43 = vrot.slane %v3048_v38, 1  ;;  %v451_v49 = vshrl.u32 %v3047_v32, 16  ;;  %v3051_v54 = vld [vmem:[%s3165_s26 + $0x28] sm:$0xff]   ;;  %v3052_v56 = vld [vmem:[%s3165_s26 + $0x20] sm:$0xff]  }
  0x17   : > { %v429_v19 = vor.u32 %v428_v17, %v424_v16  ;;  %v437_v33 = vor.u32 %v435_v27, %v433_v20  ;;  %v680_v36 = vsel %vm677_vm4, %v678_v31, %v679_v30  ;;  %v449_v42 = vrot.slane %v447_v37, 1  ;;  %v3053_v60 = vld [vmem:[%s3165_s26 + $0x30] ss:$0 sps:$4 sm:$0x77]   ;;  %v3054_v0 = vld [vmem:[%s3165_s26 + $0x28] sm:$0xff]   ;;  %v3062_v31 = vld [vmem:[%s3165_s26 + $0x14] sm:$0xff]  }
  0x18   : > { %v445_v45 = vor.u32 %v443_v41, %v441_v34  ;;  %v682_v46 = vsel %vm677_vm4, %v679_v30, %v681_v43  ;;  %v455_v50 = vshll.u32 %v3049_v44, 16  ;;  %v683_v51 = vrot.slane %v3050_v47, 1  ;;  %v3059_v16 = vld [vmem:[%s3165_s26 + $0x4] sm:$0xfe]   ;;  %v3060_v17 = vld [vmem:[%s3165_s26 + $0xc] sm:$0xff]   ;;  %v3061_v47 = vld [vmem:[%s3165_s26 + $0x1c] sm:$0xff]  }
  0x19   : > { %2760 = vmatmul.mubr.msk.bf16.gmra.mrb[4].mxu0 %vm246_vm2, %v3037_v9  ;;  %v434_v26 = vsel %vm422_vm3, %v429_v19, %v433_v20  ;;  %v442_v39 = vsel %vm422_vm3, %v437_v33, %v441_v34  ;;  %v453_v52 = vor.u32 %v451_v49, %v449_v42  ;;  %v459_v58 = vshrl.u32 %v3049_v44, 16  ;;  %v3055_v9 = vld [vmem:[%s3165_s26 + $0x30] ss:$0 sps:$4 sm:$0x77]   ;;  %v3056_v18 = vld [vmem:[%s3165_s26 + $0x4] sm:$0xfe]  }
  0x1a   : > { %2776 = vmatmul.mubr.msk.bf16.gmra.mrb[4].mxu1 %vm246_vm2, %v3038_v10  ;;  %2763 = vmatprep.mubr.msk.bf16.mxu0 %vm3107_vm1, %v3106_v1  ;;  %v450_v48 = vsel %vm422_vm3, %v445_v45, %v449_v42  ;;  %v457_v53 = vrot.slane %v455_v50, 1  ;;  %v684_v55 = vsel %vm677_vm4, %v681_v43, %v683_v51  ;;  %v463_v59 = vshll.u32 %v3051_v54, 16  ;;  %v3057_v19 = vld [vmem:[%s3165_s26 + $0xc] sm:$0xff]   ;;  %v3058_v33 = vld [vmem:[%s3165_s26 + $0x14] sm:$0xff]   ;;  %v3064_v44 = vld [vmem:[%s3165_s26 + $0x1c] sm:$0xff]  }
  0x1b   : > { %2779 = vmatprep.mubr.msk.bf16.mxu1 %vm3107_vm1, %v3106_v1  ;;  %v685_v61 = vrot.slane %v3052_v56, 1  ;;  %v467_v4 = vshrl.u32 %v3051_v54, 16  ;;  %v471_v5 = vshll.u32 %v3053_v60, 16  ;;  %v687_v6 = vrot.slane %v3054_v0, 1 }
  0x1c   : > { %v458_v57 = vsel %vm422_vm3, %v453_v52, %v457_v53  ;;  %v461_v62 = vor.u32 %v459_v58, %v457_v53  ;;  %v465_v63 = vrot.slane %v463_v59, 1  ;;  %v475_v12 = vshrl.u32 %v3053_v60, 16 }
  0x1d   : > { %v686_v2 = vsel %vm677_vm4, %v683_v51, %v685_v61  ;;  %v473_v8 = vrot.slane %v471_v5, 1  ;;  %v688_v10 = vsel %vm677_vm4, %v685_v61, %v687_v6  ;;  %v689_v13 = vrot.slane %v3055_v9, 1 }
  0x1e   : > { %v466_v3 = vsel %vm422_vm3, %v461_v62, %v465_v63  ;;  %v469_v7 = vor.u32 %v467_v4, %v465_v63  ;;  %v1104_v20 = vshrl.u32 %v3059_v16, 16  ;;  %v1107_v21 = vshll.u32 %v3059_v16, 16  ;;  %v3065_v4 = vld [vmem:[%s3165_s26 + $0x2c] sm:$0xff]  }
  0x1f   : > { %v1112_v22 = vshrl.u32 %v3060_v17, 16  ;;  %v890_v24 = vrot.slane %v3056_v18, 1  ;;  %v891_v25 = vrot.slane %v3057_v19, 1  ;;  %v1121_v37 = vshrl.u32 %v3062_v31, 16 }
  0x20   : > { %v474_v11 = vsel %vm422_vm3, %v469_v7, %v473_v8  ;;  %v1106_v27 = vrot.slane %v1104_v20, 1  ;;  %v1109_v28 = vrot.slane %v1107_v21, 2  ;;  %v1124_v38 = vshll.u32 %v3062_v31, 16  ;;  %v3074_v31 = vld [vmem:[%s3165_s26 + $0x10] sm:$0xff]  }
  0x21   : > { %2764 = vmatmul.mubr.msk.bf16.gmra.mrb[8].mxu0 %vm246_vm2, %v3039_v15  ;;  %v690_v15 = vsel %vm677_vm4, %v687_v6, %v689_v13  ;;  %v892_v32 = vsel %vm677_vm4, %v890_v24, %v891_v25  ;;  %v1123_v42 = vrot.slane %v1121_v37, 1  ;;  %v1130_v49 = vshrl.u32 %v3064_v44, 16 }
  0x22   : > { %2780 = vmatmul.mubr.msk.bf16.gmra.mrb[8].mxu1 %vm246_vm2, %v3040_v14  ;;  %2767 = vmatprep.mubr.msk.bf16.mxu0 %vm3107_vm1, %v3106_v1  ;;  %v477_v14 = vor.u32 %v475_v12, %v473_v8  ;;  %v1110_v35 = vor.u32 %v1109_v28, %v1106_v27  ;;  %v1126_v43 = vrot.slane %v1124_v38, 2  ;;  %v1133_v50 = vshll.u32 %v3064_v44, 16  ;;  %v3069_v12 = vld [vmem:[%s3165_s26 + $0x34] ss:$0 sps:$4 sm:$0xff]   ;;  %v2636_v38 = vld [vmem:[%s3718_s1 + $0x10] sm:$0x3] }
  0x23   : > { %2785 = vmatprep.mubr.msk.bf16.mxu1 %vm3107_vm1, %v3106_v1  ;;  %v895_v51 = vrot.slane %v3061_v47, 1  ;;  %v1132_v53 = vrot.slane %v1130_v49, 1  ;;  %v899_v8 = vrot.slane %v3065_v4, 1  ;;  %v1157_v16 = vshrl.u32 %v3069_v12, 16  ;;  %v3078_v47 = vld [vmem:[%s3165_s26 + $0x20] sm:$0xff]  }
  0x24   : > { %v1135_v54 = vrot.slane %v1133_v50, 2  ;;  %v3077_v49 = vld [vmem:[%s3165_s26 + $0x24] sm:$0xff]   ;;  %v1582_v50 = vrot.slane %v3078_v47, 2  ;;  %v3093_v47 = vld [vmem:[%s3165_s26 + $0x30] sm:$0xff]   ;;  %vm2362_vm3 = vsmask.f32 3328 }
  0x25   : > { %v1159_v20 = vrot.slane %v1157_v16, 1  ;;  %v3084_v4 = vld [vmem:[%s3165_s26 + $0x8] sm:$0xfc]   ;;  %v3086_v16 = vld [vmem:[%s3165_s26 + $0x18] sm:$0xff]  }
  0x26   : > { %v1136_v58 = vor.u32 %v1135_v54, %v1132_v53  ;;  %v3080_v53 = vld [vmem:[%s3165_s26 + $0x28] sm:$0xff]  }
  0x29   : > { %2768 = vmatmul.mubr.msk.bf16.gmra.mrb[12].mxu0 %vm246_vm2, %v3041_v23  ;;  %v1115_v23 = vshll.u32 %v3060_v17, 16  ;;  %v1160_v17 = vshll.u32 %v3069_v12, 16 }
  0x2a   : > { %2786 = vmatmul.mubr.msk.bf16.vlgmr.msra.gmra.mrb[12].mxu1 %vm246_vm2, %v434_v26  ;;  %2815 = vmatprep.mubr.msk.bf16.mxu0 %vm3107_vm1, %v3106_v1  ;;  %v2591_v26 = vld [vmem:[%s3718_s1 + $0xa] sm:$0x3] }
  0x2b   : > { %2844 = vmatpush3.bf16.msra.mxu1 %v925_v29  ;;  %2789 = vmatprep.mubr.msk.bf16.mxu1 %vm3107_vm1, %v3106_v1  ;;  %v1114_v29 = vrot.slane %v1112_v22, 1  ;;  %v1117_v30 = vrot.slane %v1115_v23, 2  ;;  %v1400_v34 = vsel %vm268_vm0, %v2591_v26, 0  ;;  %v1162_v21 = vrot.slane %v1160_v17, 2  ;;  %v3071_v26 = vld [vmem:[%s3165_s26 + $0xc] sm:$0xff]  }
  0x2c   : > { %2903 = vmatprep.subr.bf16.mxu1 %v3106_v1  ;;  %v1366_v28 = vrot.slane %v3071_v26, 2  ;;  %v3089_v26 = vld [vmem:[%s3165_s26 + $0x20] sm:$0xff]  }
  0x2d   : > { %v1163_v23 = vor.u32 %v1162_v21, %v1159_v20  ;;  %v1814_v20 = vshll.u32 %v3086_v16, 16  ;;  %v3087_v21 = vld [vmem:[%s3165_s26 + $0x8] sm:$0xf8]  }
  0x31   : > { %2816 = vmatmul.mubr.msk.bf16.vlgmr.msra.gmra.mrb[16].mxu0 %vm246_vm2, %v680_v36  ;;  %v1118_v36 = vor.u32 %v1117_v30, %v1114_v29  ;;  %v2621_v29 = vld [vmem:[%s3718_s1 + $0xe] sm:$0x3] }
  0x32   : > { %2790 = vmatmul.mubr.msk.bf16.gmra.mrb[16].mxu1 %vm246_vm2, %v442_v39  ;;  %2874 = vmatpush3.bf16.msra.mxu0 %v1187_v40  ;;  %v893_v39 = vrot.slane %v3058_v33, 1  ;;  %v2606_v40 = vld [vmem:[%s3718_s1 + $0xc] sm:$0x3]  ;;  %v3072_v33 = vld [vmem:[%s3165_s26 + $0x14] sm:$0xff]  }
  0x33   : > { %2793 = vmatprep.mubr.msk.bf16.mxu1 %vm3107_vm1, %v3106_v1  ;;  %2819 = vmatprep.mubr.msk.bf16.mxu0 %vm3107_vm1, %v3106_v1  ;;  %v1119_v41 = vsel %vm1102_vm5, %v1110_v35, %v1118_v36  ;;  %v3073_v30 = vld [vmem:[%s3165_s26 + $0x8] sm:$0xfc]   ;;  %v1368_v37 = vrot.slane %v3072_v33, 2  ;;  %v3090_v33 = vld [vmem:[%s3165_s26 + $0x18] sm:$0xff]  }
  0x34   : > { %2933 = vmatprep.subr.bf16.mxu0 %v3106_v1  ;;  %v894_v45 = vsel %vm677_vm4, %v891_v25, %v893_v39  ;;  %v896_v56 = vsel %vm677_vm4, %v893_v39, %v895_v51  ;;  %v3070_v25 = vld [vmem:[%s3165_s26 + $0x4] sm:$0xfc]   ;;  %v1577_v35 = vrot.slane %v3073_v30, 2  ;;  %v1820_v30 = vshrl.u32 %v3089_v26, 16 }
  0x35   : > { %v1365_v27 = vrot.slane %v3070_v25, 2  ;;  %v1816_v25 = vrot.slane %v1814_v20, 3 }
  0x39   : > { %2820 = vmatmul.mubr.msk.bf16.gmra.mrb[20].mxu0 %vm246_vm2, %v682_v46  ;;  %v1612_v46 = vsel %vm268_vm0, %v2606_v40, 0  ;;  %v3076_v40 = vld [vmem:[%s3165_s26 + $0x18] sm:$0xff]  }
  0x3a   : > { %2794 = vmatmul.mubr.msk.bf16.gmra.mrb[20].mxu1 %vm246_vm2, %v450_v48  ;;  %2823 = vmatprep.mubr.msk.bf16.mxu0 %vm3107_vm1, %v3106_v1  ;;  %v1127_v48 = vor.u32 %v1126_v43, %v1123_v42  ;;  %v2093_v42 = vsel %vm268_vm0, %v2636_v38, 0  ;;  %v3075_v43 = vld [vmem:[%s3165_s26 + $0x1c] sm:$0xff]   ;;  %v1580_v44 = vrot.slane %v3076_v40, 2  ;;  %v2061_v38 = vrot.slane %v3090_v33, 3 }
  0x3b   : > { %2797 = vmatprep.mubr.msk.bf16.mxu1 %vm3107_vm1, %v3106_v1 }
  0x3c   : > { %v1128_v52 = vsel %vm1102_vm5, %v1118_v36, %v1127_v48  ;;  %v1137_v62 = vsel %vm1102_vm5, %v1127_v48, %v1136_v58  ;;  %v1578_v36 = vrot.slane %v3074_v31, 2  ;;  %v1823_v31 = vshll.u32 %v3089_v26, 16 }
  0x3e   : > { %v1579_v39 = vsel %vm1364_vm6, %v1577_v35, %v1578_v36  ;;  %v1822_v35 = vrot.slane %v1820_v30, 2 }
  0x41   : > { %2824 = vmatmul.mubr.msk.bf16.gmra.mrb[24].mxu0 %vm246_vm2, %v684_v55  ;;  %v3066_v55 = vld [vmem:[%s3165_s26 + $0x24] sm:$0xff]  }
  0x42   : > { %2798 = vmatmul.mubr.msk.bf16.gmra.mrb[24].mxu1 %vm246_vm2, %v458_v57  ;;  %2827 = vmatprep.mubr.msk.bf16.mxu0 %vm3107_vm1, %v3106_v1  ;;  %v3063_v57 = vld [vmem:[%s3165_s26 + $0x24] sm:$0xff]   ;;  %v1139_v59 = vshrl.u32 %v3066_v55, 16  ;;  %v1142_v60 = vshll.u32 %v3066_v55, 16  ;;  %v3079_v55 = vld [vmem:[%s3165_s26 + $0x2c] sm:$0xff]  }
  0x43   : > { %2801 = vmatprep.mubr.msk.bf16.mxu1 %vm3107_vm1, %v3106_v1  ;;  %v897_v61 = vrot.slane %v3063_v57, 1  ;;  %v1374_v57 = vrot.slane %v3079_v55, 2 }
  0x44   : > { %v1141_v63 = vrot.slane %v1139_v59, 1  ;;  %v1144_v0 = vrot.slane %v1142_v60, 2  ;;  %v3082_v59 = vld [vmem:[%s3165_s26 + $0x30] sm:$0xff]  }
  0x46   : > { %v1145_v5 = vor.u32 %v1144_v0, %v1141_v63 }
  0x48   : > { %v1146_v9 = vsel %vm1102_vm5, %v1136_v58, %v1145_v5 }
  0x49   : > { %2828 = vmatmul.mubr.msk.bf16.gmra.mrb[28].mxu0 %vm246_vm2, %v686_v2  ;;  %v3068_v2 = vld [vmem:[%s3165_s26 + $0x2c] sm:$0xff]  }
  0x4a   : > { %2802 = vmatmul.mubr.msk.bf16.gmra.mrb[28].mxu1 %vm246_vm2, %v466_v3  ;;  %2831 = vmatprep.mubr.msk.bf16.mxu0 %vm3107_vm1, %v3106_v1  ;;  %v898_v3 = vsel %vm677_vm4, %v895_v51, %v897_v61  ;;  %v1148_v6 = vshrl.u32 %v3068_v2, 16  ;;  %v1151_v7 = vshll.u32 %v3068_v2, 16  ;;  %v1372_v51 = vrot.slane %v3077_v49, 2  ;;  %v3083_v2 = vld [vmem:[%s3165_s26 + $0x38] ss:$0 sps:$4 sm:$0xff]  }
  0x4b   : > { %2805 = vmatprep.mubr.msk.bf16.mxu1 %vm3107_vm1, %v3106_v1 }
  0x4c   : > { %v1375_v60 = vsel %vm1364_vm6, %v1372_v51, %v1374_v57 }
  0x51   : > { %2832 = vmatmul.mubr.msk.bf16.gmra.mrb[32].mxu0 %vm246_vm2, %v688_v10  ;;  %v1150_v10 = vrot.slane %v1148_v6, 1  ;;  %v1588_v6 = vrot.slane %v3083_v2, 2 }
  0x52   : > { %2806 = vmatmul.mubr.msk.bf16.gmra.mrb[32].mxu1 %vm246_vm2, %v474_v11  ;;  %2835 = vmatprep.mubr.msk.bf16.mxu0 %vm3107_vm1, %v3106_v1  ;;  %v1153_v11 = vrot.slane %v1151_v7, 2  ;;  %v1794_v7 = vshrl.u32 %v3084_v4, 16 }
  0x53   : > { %2809 = vmatprep.mubr.msk.bf16.mxu1 %vm3107_vm1, %v3106_v1 }
  0x54   : > { %v1796_v12 = vrot.slane %v1794_v7, 2 }
  0x59   : > { %2836 = vmatmul.mubr.msk.bf16.gmra.mrb[36].mxu0 %vm246_vm2, %v690_v15  ;;  %v1154_v15 = vor.u32 %v1153_v11, %v1150_v10 }
  0x5a   : > { %2810 = vmatmul.mubr.msk.bf16.gmra.mrb[36].mxu1 %vm246_vm2, %v477_v14  ;;  %2839 = vmatprep.mubr.msk.bf16.mxu0 %vm3107_vm1, %v3106_v1  ;;  %v3067_v14 = vld [vmem:[%s3165_s26 + $0x34] ss:$0 sps:$4 sm:$0x77]  }
  0x5b   : > { %2845 = vmatprep.mubr.msk.bf16.mxu1 %vm3107_vm1, %v3106_v1  ;;  %v901_v18 = vrot.slane %v3067_v14, 1  ;;  %v1155_v19 = vsel %vm1102_vm5, %v1145_v5, %v1154_v15  ;;  %v1164_v24 = vsel %vm1102_vm5, %v1154_v15, %v1163_v23  ;;  %v3085_v5 = vld [vmem:[%s3165_s26 + $0x10] sm:$0xff]   ;;  %vm2363_vm5 = vsmask.f32 7440 }
  0x5c   : > { %v1805_v10 = vshll.u32 %v3085_v5, 16 }
  0x5d   : > { %v902_v22 = vsel %vm677_vm4, %v899_v8, %v901_v18 }
  0x5e   : > { %v1807_v15 = vrot.slane %v1805_v10, 3 }
  0x61   : > { %2840 = vmatmul.mubr.msk.bf16.gmra.mrb[40].mxu0 %vm246_vm2, %v689_v13  ;;  %v900_v13 = vsel %vm677_vm4, %v897_v61, %v899_v8  ;;  %v3081_v61 = vld [vmem:[%s3165_s26 + $0x34] ss:$0 sps:$4 sm:$0xff]   ;;  %v1797_v8 = vshll.u32 %v3084_v4, 16 }
  0x62   : > { %2846 = vmatmul.mubr.msk.bf16.vlgmr.msra.gmra.mrb[40].mxu1 %vm246_vm2, %v892_v32  ;;  %2875 = vmatprep.mubr.msk.bf16.mxu0 %vm3107_vm1, %v3106_v1  ;;  %v1367_v32 = vsel %vm1364_vm6, %v1365_v27, %v1366_v28  ;;  %v1376_v63 = vrot.slane %v3081_v61, 2  ;;  %v2058_v27 = vrot.slane %v3087_v21, 3 }
  0x63   : > { %2904 = vmatpush3.bf16.msra.mxu1 %v1400_v34  ;;  %2849 = vmatprep.mubr.msk.bf16.mxu1 %vm3107_vm1, %v3106_v1  ;;  %v1877_v34 = vsel %vm268_vm0, %v2621_v29, 0  ;;  %vm2342_vm0 = vsmask.f32 256 }
  0x64   : > { %2963 = vmatprep.subr.bf16.mxu1 %v3106_v1 }
  0x69   : > { %2876 = vmatmul.mubr.msk.bf16.vlgmr.msra.gmra.mrb[44].mxu0 %vm246_vm2, %v1119_v41  ;;  %v1369_v41 = vsel %vm1364_vm6, %v1366_v28, %v1368_v37 }
  0x6a   : > { %2850 = vmatmul.mubr.msk.bf16.gmra.mrb[44].mxu1 %vm246_vm2, %v894_v45  ;;  %2934 = vmatpush3.bf16.msra.mxu0 %v1612_v46  ;;  %v1370_v45 = vrot.slane %v3075_v43, 2  ;;  %v1581_v46 = vsel %vm1364_vm6, %v1578_v36, %v1580_v44  ;;  %v1825_v36 = vrot.slane %v1823_v31, 3  ;;  %v3092_v43 = vld [vmem:[%s3165_s26 + $0x20] sm:$0xff]  }
  0x6b   : > { %2853 = vmatprep.mubr.msk.bf16.mxu1 %vm3107_vm1, %v3106_v1  ;;  %2879 = vmatprep.mubr.msk.bf16.mxu0 %vm3107_vm1, %v3106_v1 }
  0x6c   : > { %2993 = vmatprep.subr.bf16.mxu0 %v3106_v1  ;;  %v1371_v48 = vsel %vm1364_vm6, %v1368_v37, %v1370_v45  ;;  %v1373_v54 = vsel %vm1364_vm6, %v1370_v45, %v1372_v51  ;;  %v3091_v37 = vld [vmem:[%s3165_s26 + $0x28] sm:$0xff]   ;;  %v1841_v51 = vshll.u32 %v3093_v47, 16 }
  0x6d   : > { %v1829_v40 = vshrl.u32 %v3091_v37, 16 }
  0x6f   : > { %v1831_v45 = vrot.slane %v1829_v40, 2 }
  0x71   : > { %2880 = vmatmul.mubr.msk.bf16.gmra.mrb[48].mxu0 %vm246_vm2, %v1128_v52  ;;  %v1583_v52 = vsel %vm1364_vm6, %v1580_v44, %v1582_v50 }
  0x72   : > { %2854 = vmatmul.mubr.msk.bf16.gmra.mrb[48].mxu1 %vm246_vm2, %v896_v56  ;;  %2883 = vmatprep.mubr.msk.bf16.mxu0 %vm3107_vm1, %v3106_v1  ;;  %v1584_v56 = vrot.slane %v3080_v53, 2 }
  0x73   : > { %2857 = vmatprep.mubr.msk.bf16.mxu1 %vm3107_vm1, %v3106_v1 }
  0x74   : > { %v1585_v58 = vsel %vm1364_vm6, %v1582_v50, %v1584_v56  ;;  %v1838_v50 = vshrl.u32 %v3093_v47, 16 }
  0x79   : > { %2884 = vmatmul.mubr.msk.bf16.gmra.mrb[52].mxu0 %vm246_vm2, %v1137_v62  ;;  %v1586_v62 = vrot.slane %v3082_v59, 2 }
  0x7a   : > { %2858 = vmatmul.mubr.msk.bf16.gmra.mrb[52].mxu1 %vm246_vm2, %v898_v3  ;;  %2887 = vmatprep.mubr.msk.bf16.mxu0 %vm3107_vm1, %v3106_v1  ;;  %v1377_v3 = vsel %vm1364_vm6, %v1374_v57, %v1376_v63 }
  0x7b   : > { %2861 = vmatprep.mubr.msk.bf16.mxu1 %vm3107_vm1, %v3106_v1  ;;  %v1587_v0 = vsel %vm1364_vm6, %v1584_v56, %v1586_v62  ;;  %v1589_v11 = vsel %vm1364_vm6, %v1586_v62, %v1588_v6  ;;  %v1840_v62 = vrot.slane %v1838_v50, 2  ;;  %vm3681_vm6 = vmor %vm2362_vm3, %vm2363_vm5 }
  0x81   : > { %2888 = vmatmul.mubr.msk.bf16.gmra.mrb[56].mxu0 %vm246_vm2, %v1146_v9  ;;  %v1802_v9 = vshrl.u32 %v3085_v5, 16 }
  0x82   : > { %2862 = vmatmul.mubr.msk.bf16.gmra.mrb[56].mxu1 %vm246_vm2, %v900_v13  ;;  %2891 = vmatprep.mubr.msk.bf16.mxu0 %vm3107_vm1, %v3106_v1  ;;  %v1799_v13 = vrot.slane %v1797_v8, 3 }
  0x83   : > { %2865 = vmatprep.mubr.msk.bf16.mxu1 %vm3107_vm1, %v3106_v1  ;;  %v1804_v14 = vrot.slane %v1802_v9, 2 }
  0x84   : > { %v1800_v17 = vor.u32 %v1799_v13, %v1796_v12  ;;  %v3096_v13 = vld [vmem:[%s3165_s26 + $0x30] sm:$0xff]  }
  0x85   : > { %v2067_v20 = vrot.slane %v3096_v13, 3 }
  0x89   : > { %2892 = vmatmul.mubr.msk.bf16.gmra.mrb[60].mxu0 %vm246_vm2, %v1155_v19  ;;  %v1811_v19 = vshrl.u32 %v3086_v16, 16 }
  0x8a   : > { %2866 = vmatmul.mubr.msk.bf16.gmra.mrb[60].mxu1 %vm246_vm2, %v902_v22  ;;  %2895 = vmatprep.mubr.msk.bf16.mxu0 %vm3107_vm1, %v3106_v1  ;;  %v3088_v22 = vld [vmem:[%s3165_s26 + $0x10] sm:$0xff]  }
  0x8b   : > { %2869 = vmatprep.mubr.msk.bf16.mxu1 %vm3107_vm1, %v3106_v1  ;;  %v2059_v28 = vrot.slane %v3088_v22, 3 }
  0x91   : > { %2896 = vmatmul.mubr.msk.bf16.gmra.mrb[64].mxu0 %vm246_vm2, %v1164_v24  ;;  %v1813_v24 = vrot.slane %v1811_v19, 2 }
  0x92   : > { %2870 = vmatmul.mubr.msk.bf16.gmra.mrb[64].mxu1 %vm246_vm2, %v901_v18  ;;  %2899 = vmatprep.mubr.msk.bf16.mxu0 %vm3107_vm1, %v3106_v1  ;;  %v1808_v18 = vor.u32 %v1807_v15, %v1804_v14 }
  0x93   : > { %2905 = vmatprep.mubr.msk.bf16.mxu1 %vm3107_vm1, %v3106_v1  ;;  %v1817_v29 = vor.u32 %v1816_v25, %v1813_v24 }
  0x99   : > { %2900 = vmatmul.mubr.msk.bf16.gmra.mrb[68].mxu0 %vm246_vm2, %v1163_v23  ;;  %v1809_v23 = vsel %vm1792_vm7, %v1800_v17, %v1808_v18 }
  0x9a   : > { %2906 = vmatmul.mubr.msk.bf16.vlgmr.msra.gmra.mrb[68].mxu1 %vm246_vm2, %v1367_v32  ;;  %2935 = vmatprep.mubr.msk.bf16.mxu0 %vm3107_vm1, %v3106_v1  ;;  %v2060_v32 = vsel %vm2057_vm8, %v2058_v27, %v2059_v28 }
  0x9b   : > { %2964 = vmatpush3.bf16.msra.mxu1 %v1877_v34  ;;  %2909 = vmatprep.mubr.msk.bf16.mxu1 %vm3107_vm1, %v3106_v1  ;;  %v1818_v34 = vsel %vm1792_vm7, %v1808_v18, %v1817_v29 }
  0xa1   : > { %2936 = vmatmul.mubr.msk.bf16.vlgmr.msra.gmra.mrb[72].mxu0 %vm246_vm2, %v1579_v39  ;;  %v1826_v39 = vor.u32 %v1825_v36, %v1822_v35 }
  0xa2   : > { %2910 = vmatmul.mubr.msk.bf16.gmra.mrb[72].mxu1 %vm246_vm2, %v1369_v41  ;;  %2994 = vmatpush3.bf16.msra.mxu0 %v2093_v42  ;;  %v1832_v41 = vshll.u32 %v3091_v37, 16  ;;  %v2062_v42 = vsel %vm2057_vm8, %v2059_v28, %v2061_v38  ;;  %v3097_v28 = vld [vmem:[%s3165_s26 + $0x38] sm:$0x1f]  }
  0xa3   : > { %2913 = vmatprep.mubr.msk.bf16.mxu1 %vm3107_vm1, %v3106_v1  ;;  %2939 = vmatprep.mubr.msk.bf16.mxu0 %vm3107_vm1, %v3106_v1  ;;  %v1827_v44 = vsel %vm1792_vm7, %v1817_v29, %v1826_v39  ;;  %v2069_v33 = vrot.slane %v3097_v28, 3 }
  0xa9   : > { %2940 = vmatmul.mubr.msk.bf16.gmra.mrb[76].mxu0 %vm246_vm2, %v1581_v46  ;;  %v1834_v46 = vrot.slane %v1832_v41, 3  ;;  %v2070_v41 = vsel %vm2057_vm8, %v2067_v20, %v2069_v33 }
  0xaa   : > { %2914 = vmatmul.mubr.msk.bf16.gmra.mrb[76].mxu1 %vm246_vm2, %v1371_v48  ;;  %2943 = vmatprep.mubr.msk.bf16.mxu0 %vm3107_vm1, %v3106_v1  ;;  %v2063_v48 = vrot.slane %v3092_v43, 3 }
  0xab   : > { %2917 = vmatprep.mubr.msk.bf16.mxu1 %vm3107_vm1, %v3106_v1  ;;  %v1835_v49 = vor.u32 %v1834_v46, %v1831_v45 }
  0xac   : > { %v2064_v57 = vsel %vm2057_vm8, %v2061_v38, %v2063_v48 }
  0xad   : > { %v1836_v61 = vsel %vm1792_vm7, %v1826_v39, %v1835_v49 }
  0xb1   : > { %2944 = vmatmul.mubr.msk.bf16.gmra.mrb[80].mxu0 %vm246_vm2, %v1583_v52 }
  0xb2   : > { %2918 = vmatmul.mubr.msk.bf16.gmra.mrb[80].mxu1 %vm246_vm2, %v1373_v54  ;;  %2947 = vmatprep.mubr.msk.bf16.mxu0 %vm3107_vm1, %v3106_v1 }
  0xb3   : > { %2921 = vmatprep.mubr.msk.bf16.mxu1 %vm3107_vm1, %v3106_v1 }
  0xb9   : > { %2948 = vmatmul.mubr.msk.bf16.gmra.mrb[84].mxu0 %vm246_vm2, %v1585_v58  ;;  %v3094_v58 = vld [vmem:[%s3165_s26 + $0x28] sm:$0xff]  }
  0xba   : > { %2922 = vmatmul.mubr.msk.bf16.gmra.mrb[84].mxu1 %vm246_vm2, %v1375_v60  ;;  %2951 = vmatprep.mubr.msk.bf16.mxu0 %vm3107_vm1, %v3106_v1 }
  0xbb   : > { %2925 = vmatprep.mubr.msk.bf16.mxu1 %vm3107_vm1, %v3106_v1 }
  0xc1   : > { %2952 = vmatmul.mubr.msk.bf16.gmra.mrb[88].mxu0 %vm246_vm2, %v1587_v0  ;;  %v3095_v0 = vld [vmem:[%s3165_s26 + $0x38] sm:$0x1f]  }
  0xc2   : > { %2926 = vmatmul.mubr.msk.bf16.gmra.mrb[88].mxu1 %vm246_vm2, %v1377_v3  ;;  %2955 = vmatprep.mubr.msk.bf16.mxu0 %vm3107_vm1, %v3106_v1  ;;  %v2065_v3 = vrot.slane %v3094_v58, 3  ;;  %v1847_v5 = vshrl.u32 %v3095_v0, 16 }
  0xc3   : > { %2929 = vmatprep.mubr.msk.bf16.mxu1 %vm3107_vm1, %v3106_v1 }
  0xc4   : > { %v2066_v12 = vsel %vm2057_vm8, %v2063_v48, %v2065_v3  ;;  %v1849_v17 = vrot.slane %v1847_v5, 2  ;;  %v2068_v27 = vsel %vm2057_vm8, %v2065_v3, %v2067_v20 }
  0xc9   : > { %2956 = vmatmul.mubr.msk.bf16.gmra.mrb[92].mxu0 %vm246_vm2, %v1589_v11 }
  0xca   : > { %2930 = vmatmul.mubr.msk.bf16.gmra.mrb[92].mxu1 %vm246_vm2, %v1376_v63  ;;  %2959 = vmatprep.mubr.msk.bf16.mxu0 %vm3107_vm1, %v3106_v1  ;;  %v1843_v63 = vrot.slane %v1841_v51, 3 }
  0xcb   : > { %2965 = vmatprep.mubr.msk.bf16.mxu1 %vm3107_vm1, %v3106_v1 }
  0xcc   : > { %v1844_v4 = vor.u32 %v1843_v63, %v1840_v62 }
  0xce   : > { %v1845_v16 = vsel %vm1792_vm7, %v1835_v49, %v1844_v4 }
  0xd1   : > { %2960 = vmatmul.mubr.msk.bf16.gmra.mrb[96].mxu0 %vm246_vm2, %v1588_v6  ;;  %v1850_v6 = vshll.u32 %v3095_v0, 16 }
  0xd2   : > { %2966 = vmatmul.mubr.msk.bf16.vlgmr.msra.gmra.mrb[96].mxu1 %vm246_vm2, %v1809_v23  ;;  %2995 = vmatprep.mubr.msk.bf16.mxu0 %vm3107_vm1, %v3106_v1 }
  0xd3   : > { %2969 = vmatprep.mubr.msk.bf16.mxu1 %vm3107_vm1, %v3106_v1  ;;  %v1852_v18 = vrot.slane %v1850_v6, 3 }
  0xd5   : > { %v1853_v21 = vor.u32 %v1852_v18, %v1849_v17 }
  0xd7   : > { %v1854_v31 = vsel %vm1792_vm7, %v1844_v4, %v1853_v21 }
  0xd9   : > { %2996 = vmatmul.mubr.msk.bf16.vlgmr.msra.gmra.mrb[100].mxu0 %vm246_vm2, %v2060_v32 }
  0xda   : > { %2970 = vmatmul.mubr.msk.bf16.gmra.mrb[100].mxu1 %vm246_vm2, %v1818_v34  ;;  %2999 = vmatprep.mubr.msk.bf16.mxu0 %vm3107_vm1, %v3106_v1 }
  0xdb   : > { %2973 = vmatprep.mubr.msk.bf16.mxu1 %vm3107_vm1, %v3106_v1 }
  0xe1   : > { %3000 = vmatmul.mubr.msk.bf16.gmra.mrb[104].mxu0 %vm246_vm2, %v2062_v42 }
  0xe2   : > { %2974 = vmatmul.mubr.msk.bf16.gmra.mrb[104].mxu1 %vm246_vm2, %v1827_v44  ;;  %3003 = vmatprep.mubr.msk.bf16.mxu0 %vm3107_vm1, %v3106_v1 }
  0xe3   : > { %2977 = vmatprep.mubr.msk.bf16.mxu1 %vm3107_vm1, %v3106_v1 }
  0xe4   : > { %v306_v52 = vpop.f32.mrb[0].mxu0 }
  0xe5   : > { %360 = vst.msk [vmem:[#allocation2] sm:$0xff] %vm246_vm2, %v306_v52  ;;  %v338_v53 = vpop.f32.mrb[0].mxu1  ;;  %v2757_v54 = vpop.f32.mrb[1].mxu0 }
  0xe6   : > { %368 = vst.msk [vmem:[#allocation2 + $0x40] sm:$0xff] %vm246_vm2, %v338_v53  ;;  %v2773_v55 = vpop.f32.mrb[1].mxu1  ;;  %v309_v56 = vpop.f32.mrb[2].mxu0 }
  0xe7   : > { %361 = vst.msk [vmem:[#allocation2 + $0x8] sm:$0xff] %vm246_vm2, %v309_v56  ;;  %v341_v59 = vpop.f32.mrb[2].mxu1  ;;  %v2758_v60 = vpop.f32.mrb[3].mxu0 }
  0xe8   : > { %369 = vst.msk [vmem:[#allocation2 + $0x48] sm:$0xff] %vm246_vm2, %v341_v59  ;;  %v2774_v2 = vpop.f32.mrb[3].mxu1 }
  0xe9   : > { %3004 = vmatmul.mubr.msk.bf16.gmra.mrb[108].mxu0 %vm246_vm2, %v2064_v57 }
  0xea   : > { %2978 = vmatmul.mubr.msk.bf16.gmra.mrb[108].mxu1 %vm246_vm2, %v1836_v61  ;;  %3007 = vmatprep.mubr.msk.bf16.mxu0 %vm3107_vm1, %v3106_v1 }
  0xeb   : > { %2981 = vmatprep.mubr.msk.bf16.mxu1 %vm3107_vm1, %v3106_v1 }
  0xec   : > { %v314_v7 = vpop.f32.mrb[4].mxu0  ;;  %v590_v36 = vld [vmem:[#allocation2] sm:$0xff] }
  0xed   : > { %362 = vst.msk [vmem:[#allocation2 + $0x10] sm:$0xff] %vm246_vm2, %v314_v7  ;;  %v346_v8 = vpop.f32.mrb[4].mxu1  ;;  %v2761_v9 = vpop.f32.mrb[5].mxu0 }
  0xee   : > { %370 = vst.msk [vmem:[#allocation2 + $0x50] sm:$0xff] %vm246_vm2, %v346_v8  ;;  %v2777_v10 = vpop.f32.mrb[5].mxu1  ;;  %v317_v11 = vpop.f32.mrb[6].mxu0  ;;  %v591_v43 = vld [vmem:[#allocation2 + $0x8] sm:$0xff] }
  0xef   : > { %363 = vst.msk [vmem:[#allocation2 + $0x18] sm:$0xff] %vm246_vm2, %v317_v11  ;;  %v349_v14 = vpop.f32.mrb[6].mxu1  ;;  %v2762_v15 = vpop.f32.mrb[7].mxu0 }
  0xf0   : > { %371 = vst.msk [vmem:[#allocation2 + $0x58] sm:$0xff] %vm246_vm2, %v349_v14  ;;  %v2778_v19 = vpop.f32.mrb[7].mxu1 }
  0xf1   : > { %3008 = vmatmul.mubr.msk.bf16.gmra.mrb[112].mxu0 %vm246_vm2, %v2066_v12 }
  0xf2   : > { %2982 = vmatmul.mubr.msk.bf16.gmra.mrb[112].mxu1 %vm246_vm2, %v1845_v16  ;;  %3011 = vmatprep.mubr.msk.bf16.mxu0 %vm3107_vm1, %v3106_v1 }
  0xf3   : > { %2985 = vmatprep.mubr.msk.bf16.mxu1 %vm3107_vm1, %v3106_v1 }
  0xf4   : > { %v322_v22 = vpop.f32.mrb[8].mxu0  ;;  %v592_v49 = vld [vmem:[#allocation2 + $0x10] sm:$0xff] }
  0xf5   : > { %364 = vst.msk [vmem:[#allocation2 + $0x20] sm:$0xff] %vm246_vm2, %v322_v22  ;;  %v354_v23 = vpop.f32.mrb[8].mxu1  ;;  %v2765_v24 = vpop.f32.mrb[9].mxu0 }
  0xf6   : > { %373 = vst.msk [vmem:[#allocation2 + $0x60] sm:$0xf] %vm372_vm9, %v354_v23  ;;  %v2781_v25 = vpop.f32.mrb[9].mxu1  ;;  %v325_v26 = vpop.f32.mrb[10].mxu0  ;;  %v593_v56 = vld [vmem:[#allocation2 + $0x18] sm:$0xff] }
  0xf7   : > { %365 = vst.msk [vmem:[#allocation2 + $0x28] sm:$0xff] %vm246_vm2, %v325_v26  ;;  %v357_v29 = vpop.f32.mrb[10].mxu1  ;;  %v2766_v30 = vpop.f32.mrb[11].mxu0 }
  0xf8   : > { %v2782_v32 = vpop.f32.mrb[11].mxu1 }
  0xf9   : > { %3012 = vmatmul.mubr.msk.bf16.gmra.mrb[116].mxu0 %vm246_vm2, %v2068_v27 }
  0xfa   : > { %2986 = vmatmul.mubr.msk.bf16.gmra.mrb[116].mxu1 %vm246_vm2, %v1854_v31  ;;  %3015 = vmatprep.mubr.msk.bf16.mxu0 %vm3107_vm1, %v3106_v1 }
  0xfb   : > { %2989 = vmatprep.mubr.msk.bf16.mxu1 %vm3107_vm1, %v3106_v1 }
  0xfc   : > { %v330_v34 = vpop.f32.mrb[12].mxu0  ;;  %v594_v0 = vld [vmem:[#allocation2 + $0x20] sm:$0xff] }
  0xfd   : > { %366 = vst.msk [vmem:[#allocation2 + $0x30] sm:$0xff] %vm246_vm2, %v330_v34  ;;  %v536_v35 = vpop.f32.mrb[12].mxu1  ;;  %v2769_v37 = vpop.f32.mrb[13].mxu0 }
  0xfe   : > { %v603_v38 = vadd.f32 %v590_v36, %v536_v35  ;;  %v2787_v39 = vpop.f32.mrb[13].mxu1  ;;  %v333_v40 = vpop.f32.mrb[14].mxu0  ;;  %v595_v8 = vld [vmem:[#allocation2 + $0x28] sm:$0xff] }
  0xff   : > { %367 = vst.msk [vmem:[#allocation2 + $0x38] sm:$0xff] %vm246_vm2, %v333_v40  ;;  %v539_v42 = vpop.f32.mrb[14].mxu1  ;;  %v2770_v44 = vpop.f32.mrb[15].mxu0  ;;  %v599_v40 = vld [vmem:[#allocation2 + $0x48] sm:$0xff] }
 0x100   : > { %616 = vst.msk [vmem:[#allocation2] sm:$0xff] %vm246_vm2, %v603_v38  ;;  %v604_v45 = vadd.f32 %v591_v43, %v539_v42  ;;  %v2788_v46 = vpop.f32.mrb[15].mxu1 }
 0x101   : > { %3016 = vmatmul.mubr.msk.bf16.gmra.mrb[120].mxu0 %vm246_vm2, %v2070_v41 }
 0x102   : > { %617 = vst.msk [vmem:[#allocation2 + $0x8] sm:$0xff] %vm246_vm2, %v604_v45  ;;  %2990 = vmatmul.mubr.msk.bf16.gmra.mrb[120].mxu1 %vm246_vm2, %v1853_v21  ;;  %3019 = vmatprep.mubr.msk.bf16.mxu0 %vm3107_vm1, %v3106_v1  ;;  %vm2343_vm1 = vsmask.f32 4368 }
 0x103   : > { %vm3665_vm4 = vmor %vm2342_vm0, %vm2343_vm1 }
 0x104   : > { %v749_v47 = vpop.f32.mrb[16].mxu0  ;;  %v596_v17 = vld [vmem:[#allocation2 + $0x30] sm:$0xff] }
 0x105   : > { %v544_v48 = vpop.f32.mrb[16].mxu1  ;;  %v2817_v50 = vpop.f32.mrb[17].mxu0 }
 0x106   : > { %v605_v51 = vadd.f32 %v592_v49, %v544_v48  ;;  %v2791_v52 = vpop.f32.mrb[17].mxu1  ;;  %v752_v53 = vpop.f32.mrb[18].mxu0  ;;  %v597_v24 = vld [vmem:[#allocation2 + $0x38] sm:$0xff]  ;;  %v600_v49 = vld [vmem:[#allocation2 + $0x50] sm:$0xff] }
 0x107   : > { %v803_v54 = vld [vmem:[#allocation2] sm:$0xff]  ;;  %v547_v55 = vpop.f32.mrb[18].mxu1  ;;  %v2818_v57 = vpop.f32.mrb[19].mxu0 }
 0x108   : > { %618 = vst.msk [vmem:[#allocation2 + $0x10] sm:$0xff] %vm246_vm2, %v605_v51  ;;  %v816_v58 = vadd.f32 %v803_v54, %v749_v47  ;;  %v606_v59 = vadd.f32 %v593_v56, %v547_v55  ;;  %v2792_v60 = vpop.f32.mrb[19].mxu1  ;;  %v601_v56 = vld [vmem:[#allocation2 + $0x58] sm:$0xff] }
 0x109   : > { %v804_v61 = vld [vmem:[#allocation2 + $0x8] sm:$0xff]  ;;  %3020 = vmatmul.mubr.msk.bf16.gmra.mrb[124].mxu0 %vm246_vm2, %v2069_v33  ;;  %v598_v33 = vld [vmem:[#allocation2 + $0x40] sm:$0xff] }
 0x10a   : > { %829 = vst.msk [vmem:[#allocation2] sm:$0xff] %vm246_vm2, %v816_v58  ;;  %619 = vst.msk [vmem:[#allocation2 + $0x18] sm:$0xff] %vm246_vm2, %v606_v59  ;;  %v817_v1 = vadd.f32 %v804_v61, %v752_v53 }
 0x10c   : > { %830 = vst.msk [vmem:[#allocation2 + $0x8] sm:$0xff] %vm246_vm2, %v817_v1  ;;  %v757_v62 = vpop.f32.mrb[20].mxu0 }
 0x10d   : > { %v552_v63 = vpop.f32.mrb[20].mxu1  ;;  %v2821_v2 = vpop.f32.mrb[21].mxu0 }
 0x10e   : > { %v607_v3 = vadd.f32 %v594_v0, %v552_v63  ;;  %v2795_v4 = vpop.f32.mrb[21].mxu1  ;;  %v760_v5 = vpop.f32.mrb[22].mxu0  ;;  %v602_v0 = vld [vmem:[#allocation2 + $0x60] sm:$0xf] }
 0x10f   : > { %v805_v6 = vld [vmem:[#allocation2 + $0x10] sm:$0xff]  ;;  %v555_v7 = vpop.f32.mrb[22].mxu1  ;;  %v2822_v9 = vpop.f32.mrb[23].mxu0 }
 0x110   : > { %620 = vst.msk [vmem:[#allocation2 + $0x20] sm:$0xff] %vm246_vm2, %v607_v3  ;;  %v818_v10 = vadd.f32 %v805_v6, %v757_v62  ;;  %v608_v11 = vadd.f32 %v595_v8, %v555_v7  ;;  %v2796_v12 = vpop.f32.mrb[23].mxu1 }
 0x111   : > { %v806_v13 = vld [vmem:[#allocation2 + $0x18] sm:$0xff] }
 0x112   : > { %831 = vst.msk [vmem:[#allocation2 + $0x10] sm:$0xff] %vm246_vm2, %v818_v10  ;;  %621 = vst.msk [vmem:[#allocation2 + $0x28] sm:$0xff] %vm246_vm2, %v608_v11  ;;  %v819_v14 = vadd.f32 %v806_v13, %v760_v5 }
 0x114   : > { %832 = vst.msk [vmem:[#allocation2 + $0x18] sm:$0xff] %vm246_vm2, %v819_v14  ;;  %v765_v15 = vpop.f32.mrb[24].mxu0 }
 0x115   : > { %v560_v16 = vpop.f32.mrb[24].mxu1  ;;  %v2825_v18 = vpop.f32.mrb[25].mxu0 }
 0x116   : > { %v609_v19 = vadd.f32 %v596_v17, %v560_v16  ;;  %v2799_v20 = vpop.f32.mrb[25].mxu1  ;;  %v768_v21 = vpop.f32.mrb[26].mxu0 }
 0x117   : > { %v807_v22 = vld [vmem:[#allocation2 + $0x20] sm:$0xff]  ;;  %v563_v23 = vpop.f32.mrb[26].mxu1  ;;  %v2826_v25 = vpop.f32.mrb[27].mxu0 }
 0x118   : > { %622 = vst.msk [vmem:[#allocation2 + $0x30] sm:$0xff] %vm246_vm2, %v609_v19  ;;  %v820_v26 = vadd.f32 %v807_v22, %v765_v15  ;;  %v610_v27 = vadd.f32 %v597_v24, %v563_v23  ;;  %v2800_v28 = vpop.f32.mrb[27].mxu1  ;;  %v1015_v15 = vld [vmem:[#allocation2] sm:$0xff]  ;;  %v1016_v22 = vld [vmem:[#allocation2 + $0x8] sm:$0xff] }
 0x119   : > { %v808_v29 = vld [vmem:[#allocation2 + $0x28] sm:$0xff] }
 0x11a   : > { %833 = vst.msk [vmem:[#allocation2 + $0x20] sm:$0xff] %vm246_vm2, %v820_v26  ;;  %623 = vst.msk [vmem:[#allocation2 + $0x38] sm:$0xff] %vm246_vm2, %v610_v27  ;;  %v821_v30 = vadd.f32 %v808_v29, %v768_v21  ;;  %v1017_v29 = vld [vmem:[#allocation2 + $0x10] sm:$0xff] }
 0x11c   : > { %834 = vst.msk [vmem:[#allocation2 + $0x28] sm:$0xff] %vm246_vm2, %v821_v30  ;;  %v773_v31 = vpop.f32.mrb[28].mxu0 }
 0x11d   : > { %v568_v32 = vpop.f32.mrb[28].mxu1  ;;  %v2829_v34 = vpop.f32.mrb[29].mxu0 }
 0x11e   : > { %v611_v35 = vadd.f32 %v598_v33, %v568_v32  ;;  %v2803_v36 = vpop.f32.mrb[29].mxu1  ;;  %v776_v37 = vpop.f32.mrb[30].mxu0 }
 0x11f   : > { %v809_v38 = vld [vmem:[#allocation2 + $0x30] sm:$0xff]  ;;  %v571_v39 = vpop.f32.mrb[30].mxu1  ;;  %v2830_v41 = vpop.f32.mrb[31].mxu0  ;;  %v1018_v36 = vld [vmem:[#allocation2 + $0x18] sm:$0xff] }
 0x120   : > { %624 = vst.msk [vmem:[#allocation2 + $0x40] sm:$0xff] %vm246_vm2, %v611_v35  ;;  %v822_v42 = vadd.f32 %v809_v38, %v773_v31  ;;  %v612_v43 = vadd.f32 %v599_v40, %v571_v39  ;;  %v2804_v44 = vpop.f32.mrb[31].mxu1 }
 0x121   : > { %v810_v45 = vld [vmem:[#allocation2 + $0x38] sm:$0xff] }
 0x122   : > { %835 = vst.msk [vmem:[#allocation2 + $0x30] sm:$0xff] %vm246_vm2, %v822_v42  ;;  %625 = vst.msk [vmem:[#allocation2 + $0x48] sm:$0xff] %vm246_vm2, %v612_v43  ;;  %v823_v46 = vadd.f32 %v810_v45, %v776_v37  ;;  %v1019_v45 = vld [vmem:[#allocation2 + $0x20] sm:$0xff] }
 0x124   : > { %836 = vst.msk [vmem:[#allocation2 + $0x38] sm:$0xff] %vm246_vm2, %v823_v46  ;;  %v781_v47 = vpop.f32.mrb[32].mxu0 }
 0x125   : > { %v576_v48 = vpop.f32.mrb[32].mxu1  ;;  %v2833_v50 = vpop.f32.mrb[33].mxu0 }
 0x126   : > { %v613_v51 = vadd.f32 %v600_v49, %v576_v48  ;;  %v2807_v52 = vpop.f32.mrb[33].mxu1  ;;  %v784_v53 = vpop.f32.mrb[34].mxu0 }
 0x127   : > { %v811_v54 = vld [vmem:[#allocation2 + $0x40] sm:$0xff]  ;;  %v579_v55 = vpop.f32.mrb[34].mxu1  ;;  %v2834_v57 = vpop.f32.mrb[35].mxu0  ;;  %v1020_v52 = vld [vmem:[#allocation2 + $0x28] sm:$0xff] }
 0x128   : > { %626 = vst.msk [vmem:[#allocation2 + $0x50] sm:$0xff] %vm246_vm2, %v613_v51  ;;  %v824_v58 = vadd.f32 %v811_v54, %v781_v47  ;;  %v614_v59 = vadd.f32 %v601_v56, %v579_v55  ;;  %v2808_v60 = vpop.f32.mrb[35].mxu1 }
 0x129   : > { %v812_v61 = vld [vmem:[#allocation2 + $0x48] sm:$0xff] }
 0x12a   : > { %837 = vst.msk [vmem:[#allocation2 + $0x40] sm:$0xff] %vm246_vm2, %v824_v58  ;;  %627 = vst.msk [vmem:[#allocation2 + $0x58] sm:$0xff] %vm246_vm2, %v614_v59  ;;  %v825_v1 = vadd.f32 %v812_v61, %v784_v53  ;;  %v1021_v61 = vld [vmem:[#allocation2 + $0x30] sm:$0xff] }
 0x12c   : > { %838 = vst.msk [vmem:[#allocation2 + $0x48] sm:$0xff] %vm246_vm2, %v825_v1  ;;  %v789_v62 = vpop.f32.mrb[36].mxu0 }
 0x12d   : > { %v584_v63 = vpop.f32.mrb[36].mxu1  ;;  %v2837_v2 = vpop.f32.mrb[37].mxu0 }
 0x12e   : > { %v615_v3 = vadd.f32 %v602_v0, %v584_v63  ;;  %v2811_v4 = vpop.f32.mrb[37].mxu1  ;;  %v792_v5 = vpop.f32.mrb[38].mxu0 }
 0x12f   : > { %v813_v6 = vld [vmem:[#allocation2 + $0x50] sm:$0xff]  ;;  %v587_v7 = vpop.f32.mrb[38].mxu1  ;;  %v2838_v8 = vpop.f32.mrb[39].mxu0  ;;  %v1022_v4 = vld [vmem:[#allocation2 + $0x38] sm:$0xff] }
 0x130   : > { %628 = vst.msk [vmem:[#allocation2 + $0x60] sm:$0xf] %vm372_vm9, %v615_v3  ;;  %v826_v9 = vadd.f32 %v813_v6, %v789_v62  ;;  %v2812_v10 = vpop.f32.mrb[39].mxu1 }
 0x131   : > { %v814_v11 = vld [vmem:[#allocation2 + $0x58] sm:$0xff] }
 0x132   : > { %839 = vst.msk [vmem:[#allocation2 + $0x50] sm:$0xff] %vm246_vm2, %v826_v9  ;;  %v827_v12 = vadd.f32 %v814_v11, %v792_v5 }
 0x134   : > { %840 = vst.msk [vmem:[#allocation2 + $0x58] sm:$0xff] %vm246_vm2, %v827_v12  ;;  %v797_v13 = vpop.f32.mrb[40].mxu0 }
 0x135   : > { %v961_v14 = vpop.f32.mrb[40].mxu1  ;;  %v2841_v16 = vpop.f32.mrb[41].mxu0 }
 0x136   : > { %v1028_v17 = vadd.f32 %v1015_v15, %v961_v14  ;;  %v2847_v18 = vpop.f32.mrb[41].mxu1  ;;  %v800_v19 = vpop.f32.mrb[42].mxu0 }
 0x137   : > { %v815_v20 = vld [vmem:[#allocation2 + $0x60] sm:$0xf]  ;;  %v964_v21 = vpop.f32.mrb[42].mxu1  ;;  %v2842_v23 = vpop.f32.mrb[43].mxu0 }
 0x138   : > { %v828_v24 = vadd.f32 %v815_v20, %v797_v13  ;;  %1041 = vst.msk [vmem:[#allocation2] sm:$0xff] %vm246_vm2, %v1028_v17  ;;  %v1029_v25 = vadd.f32 %v1016_v22, %v964_v21  ;;  %v2848_v26 = vpop.f32.mrb[43].mxu1  ;;  %v1023_v13 = vld [vmem:[#allocation2 + $0x40] sm:$0xff]  ;;  %v1024_v20 = vld [vmem:[#allocation2 + $0x48] sm:$0xff] }
 0x13a   : > { %841 = vst.msk [vmem:[#allocation2 + $0x60] sm:$0xf] %vm372_vm9, %v828_v24 }
 0x13b   : > { %1042 = vst.msk [vmem:[#allocation2 + $0x8] sm:$0xff] %vm246_vm2, %v1029_v25 }
 0x13c   : > { %v1223_v27 = vpop.f32.mrb[44].mxu0 }
 0x13d   : > { %v969_v28 = vpop.f32.mrb[44].mxu1  ;;  %v2877_v30 = vpop.f32.mrb[45].mxu0 }
 0x13e   : > { %v1030_v31 = vadd.f32 %v1017_v29, %v969_v28  ;;  %v2851_v32 = vpop.f32.mrb[45].mxu1  ;;  %v1226_v33 = vpop.f32.mrb[46].mxu0  ;;  %v1025_v29 = vld [vmem:[#allocation2 + $0x50] sm:$0xff] }
 0x13f   : > { %v1277_v34 = vld [vmem:[#allocation2] sm:$0xff]  ;;  %v972_v35 = vpop.f32.mrb[46].mxu1  ;;  %v2878_v37 = vpop.f32.mrb[47].mxu0 }
 0x140   : > { %1043 = vst.msk [vmem:[#allocation2 + $0x10] sm:$0xff] %vm246_vm2, %v1030_v31  ;;  %v1290_v38 = vadd.f32 %v1277_v34, %v1223_v27  ;;  %v1031_v39 = vadd.f32 %v1018_v36, %v972_v35  ;;  %v2852_v40 = vpop.f32.mrb[47].mxu1  ;;  %v1026_v36 = vld [vmem:[#allocation2 + $0x58] sm:$0xff] }
 0x142   : > { %v1278_v41 = vld [vmem:[#allocation2 + $0x8] sm:$0xff]  ;;  %1303 = vst.msk [vmem:[#allocation2] sm:$0xff] %vm246_vm2, %v1290_v38  ;;  %1044 = vst.msk [vmem:[#allocation2 + $0x18] sm:$0xff] %vm246_vm2, %v1031_v39 }
 0x143   : > { %v1291_v42 = vadd.f32 %v1278_v41, %v1226_v33 }
 0x144   : > { %v1231_v43 = vpop.f32.mrb[48].mxu0 }
 0x145   : > { %1304 = vst.msk [vmem:[#allocation2 + $0x8] sm:$0xff] %vm246_vm2, %v1291_v42  ;;  %v977_v44 = vpop.f32.mrb[48].mxu1  ;;  %v2881_v46 = vpop.f32.mrb[49].mxu0 }
 0x146   : > { %v1032_v47 = vadd.f32 %v1019_v45, %v977_v44  ;;  %v2855_v48 = vpop.f32.mrb[49].mxu1  ;;  %v1234_v49 = vpop.f32.mrb[50].mxu0  ;;  %v1027_v45 = vld [vmem:[#allocation2 + $0x60] sm:$0xf] }
 0x147   : > { %v1279_v50 = vld [vmem:[#allocation2 + $0x10] sm:$0xff]  ;;  %v980_v51 = vpop.f32.mrb[50].mxu1  ;;  %v2882_v53 = vpop.f32.mrb[51].mxu0 }
 0x148   : > { %1045 = vst.msk [vmem:[#allocation2 + $0x20] sm:$0xff] %vm246_vm2, %v1032_v47  ;;  %v1292_v54 = vadd.f32 %v1279_v50, %v1231_v43  ;;  %v1033_v55 = vadd.f32 %v1020_v52, %v980_v51  ;;  %v2856_v56 = vpop.f32.mrb[51].mxu1 }
 0x149   : > { %v1280_v57 = vld [vmem:[#allocation2 + $0x18] sm:$0xff] }
 0x14a   : > { %1305 = vst.msk [vmem:[#allocation2 + $0x10] sm:$0xff] %vm246_vm2, %v1292_v54  ;;  %1046 = vst.msk [vmem:[#allocation2 + $0x28] sm:$0xff] %vm246_vm2, %v1033_v55  ;;  %v1293_v58 = vadd.f32 %v1280_v57, %v1234_v49 }
 0x14c   : > { %1306 = vst.msk [vmem:[#allocation2 + $0x18] sm:$0xff] %vm246_vm2, %v1293_v58  ;;  %v1239_v59 = vpop.f32.mrb[52].mxu0 }
 0x14d   : > { %v985_v60 = vpop.f32.mrb[52].mxu1  ;;  %v2885_v1 = vpop.f32.mrb[53].mxu0 }
 0x14e   : > { %v1034_v62 = vadd.f32 %v1021_v61, %v985_v60  ;;  %v2859_v63 = vpop.f32.mrb[53].mxu1  ;;  %v1242_v0 = vpop.f32.mrb[54].mxu0 }
 0x14f   : > { %v1281_v2 = vld [vmem:[#allocation2 + $0x20] sm:$0xff]  ;;  %v988_v3 = vpop.f32.mrb[54].mxu1  ;;  %v2886_v5 = vpop.f32.mrb[55].mxu0 }
 0x150   : > { %1047 = vst.msk [vmem:[#allocation2 + $0x30] sm:$0xff] %vm246_vm2, %v1034_v62  ;;  %v1294_v6 = vadd.f32 %v1281_v2, %v1239_v59  ;;  %v1035_v7 = vadd.f32 %v1022_v4, %v988_v3  ;;  %v2860_v8 = vpop.f32.mrb[55].mxu1  ;;  %v1490_v59 = vld [vmem:[#allocation2] sm:$0xff]  ;;  %v1491_v2 = vld [vmem:[#allocation2 + $0x8] sm:$0xff] }
 0x151   : > { %v1282_v9 = vld [vmem:[#allocation2 + $0x28] sm:$0xff] }
 0x152   : > { %1307 = vst.msk [vmem:[#allocation2 + $0x20] sm:$0xff] %vm246_vm2, %v1294_v6  ;;  %1048 = vst.msk [vmem:[#allocation2 + $0x38] sm:$0xff] %vm246_vm2, %v1035_v7  ;;  %v1295_v10 = vadd.f32 %v1282_v9, %v1242_v0  ;;  %v1492_v9 = vld [vmem:[#allocation2 + $0x10] sm:$0xff] }
 0x154   : > { %1308 = vst.msk [vmem:[#allocation2 + $0x28] sm:$0xff] %vm246_vm2, %v1295_v10  ;;  %v1247_v11 = vpop.f32.mrb[56].mxu0 }
 0x155   : > { %v993_v12 = vpop.f32.mrb[56].mxu1  ;;  %v2889_v14 = vpop.f32.mrb[57].mxu0 }
 0x156   : > { %v1036_v15 = vadd.f32 %v1023_v13, %v993_v12  ;;  %v2863_v16 = vpop.f32.mrb[57].mxu1  ;;  %v1250_v17 = vpop.f32.mrb[58].mxu0 }
 0x157   : > { %v1283_v18 = vld [vmem:[#allocation2 + $0x30] sm:$0xff]  ;;  %v996_v19 = vpop.f32.mrb[58].mxu1  ;;  %v2890_v21 = vpop.f32.mrb[59].mxu0  ;;  %v1493_v16 = vld [vmem:[#allocation2 + $0x18] sm:$0xff] }
 0x158   : > { %1049 = vst.msk [vmem:[#allocation2 + $0x40] sm:$0xff] %vm246_vm2, %v1036_v15  ;;  %v1296_v22 = vadd.f32 %v1283_v18, %v1247_v11  ;;  %v1037_v23 = vadd.f32 %v1024_v20, %v996_v19  ;;  %v2864_v24 = vpop.f32.mrb[59].mxu1 }
 0x159   : > { %v1284_v25 = vld [vmem:[#allocation2 + $0x38] sm:$0xff] }
 0x15a   : > { %1309 = vst.msk [vmem:[#allocation2 + $0x30] sm:$0xff] %vm246_vm2, %v1296_v22  ;;  %1050 = vst.msk [vmem:[#allocation2 + $0x48] sm:$0xff] %vm246_vm2, %v1037_v23  ;;  %v1297_v26 = vadd.f32 %v1284_v25, %v1250_v17  ;;  %v1494_v25 = vld [vmem:[#allocation2 + $0x20] sm:$0xff] }
 0x15c   : > { %1310 = vst.msk [vmem:[#allocation2 + $0x38] sm:$0xff] %vm246_vm2, %v1297_v26  ;;  %v1255_v27 = vpop.f32.mrb[60].mxu0 }
 0x15d   : > { %v1001_v28 = vpop.f32.mrb[60].mxu1  ;;  %v2893_v30 = vpop.f32.mrb[61].mxu0 }
 0x15e   : > { %v1038_v31 = vadd.f32 %v1025_v29, %v1001_v28  ;;  %v2867_v32 = vpop.f32.mrb[61].mxu1  ;;  %v1258_v33 = vpop.f32.mrb[62].mxu0 }
 0x15f   : > { %v1285_v34 = vld [vmem:[#allocation2 + $0x40] sm:$0xff]  ;;  %v1004_v35 = vpop.f32.mrb[62].mxu1  ;;  %v2894_v37 = vpop.f32.mrb[63].mxu0  ;;  %v1495_v32 = vld [vmem:[#allocation2 + $0x28] sm:$0xff] }
 0x160   : > { %1051 = vst.msk [vmem:[#allocation2 + $0x50] sm:$0xff] %vm246_vm2, %v1038_v31  ;;  %v1298_v38 = vadd.f32 %v1285_v34, %v1255_v27  ;;  %v1039_v39 = vadd.f32 %v1026_v36, %v1004_v35  ;;  %v2868_v40 = vpop.f32.mrb[63].mxu1 }
 0x161   : > { %v1286_v41 = vld [vmem:[#allocation2 + $0x48] sm:$0xff] }
 0x162   : > { %1311 = vst.msk [vmem:[#allocation2 + $0x40] sm:$0xff] %vm246_vm2, %v1298_v38  ;;  %1052 = vst.msk [vmem:[#allocation2 + $0x58] sm:$0xff] %vm246_vm2, %v1039_v39  ;;  %v1299_v42 = vadd.f32 %v1286_v41, %v1258_v33  ;;  %v1496_v41 = vld [vmem:[#allocation2 + $0x30] sm:$0xff] }
 0x164   : > { %1312 = vst.msk [vmem:[#allocation2 + $0x48] sm:$0xff] %vm246_vm2, %v1299_v42  ;;  %v1263_v43 = vpop.f32.mrb[64].mxu0 }
 0x165   : > { %v1009_v44 = vpop.f32.mrb[64].mxu1  ;;  %v2897_v46 = vpop.f32.mrb[65].mxu0 }
 0x166   : > { %v1040_v47 = vadd.f32 %v1027_v45, %v1009_v44  ;;  %v2871_v48 = vpop.f32.mrb[65].mxu1  ;;  %v1266_v49 = vpop.f32.mrb[66].mxu0 }
 0x167   : > { %v1287_v50 = vld [vmem:[#allocation2 + $0x50] sm:$0xff]  ;;  %v1012_v51 = vpop.f32.mrb[66].mxu1  ;;  %v2898_v52 = vpop.f32.mrb[67].mxu0  ;;  %v1497_v48 = vld [vmem:[#allocation2 + $0x38] sm:$0xff] }
 0x168   : > { %1053 = vst.msk [vmem:[#allocation2 + $0x60] sm:$0xf] %vm372_vm9, %v1040_v47  ;;  %v1300_v53 = vadd.f32 %v1287_v50, %v1263_v43  ;;  %v2872_v54 = vpop.f32.mrb[67].mxu1 }
 0x169   : > { %v1288_v55 = vld [vmem:[#allocation2 + $0x58] sm:$0xff] }
 0x16a   : > { %1313 = vst.msk [vmem:[#allocation2 + $0x50] sm:$0xff] %vm246_vm2, %v1300_v53  ;;  %v1301_v56 = vadd.f32 %v1288_v55, %v1266_v49 }
 0x16c   : > { %1314 = vst.msk [vmem:[#allocation2 + $0x58] sm:$0xff] %vm246_vm2, %v1301_v56  ;;  %v1271_v57 = vpop.f32.mrb[68].mxu0 }
 0x16d   : > { %v1436_v58 = vpop.f32.mrb[68].mxu1  ;;  %v2901_v60 = vpop.f32.mrb[69].mxu0 }
 0x16e   : > { %v1503_v61 = vadd.f32 %v1490_v59, %v1436_v58  ;;  %v2907_v1 = vpop.f32.mrb[69].mxu1  ;;  %v1274_v62 = vpop.f32.mrb[70].mxu0 }
 0x16f   : > { %v1289_v63 = vld [vmem:[#allocation2 + $0x60] sm:$0xf]  ;;  %v1439_v0 = vpop.f32.mrb[70].mxu1  ;;  %v2902_v3 = vpop.f32.mrb[71].mxu0 }
 0x170   : > { %v1302_v4 = vadd.f32 %v1289_v63, %v1271_v57  ;;  %1516 = vst.msk [vmem:[#allocation2] sm:$0xff] %vm246_vm2, %v1503_v61  ;;  %v1504_v5 = vadd.f32 %v1491_v2, %v1439_v0  ;;  %v2908_v6 = vpop.f32.mrb[71].mxu1  ;;  %v1498_v57 = vld [vmem:[#allocation2 + $0x40] sm:$0xff]  ;;  %v1499_v63 = vld [vmem:[#allocation2 + $0x48] sm:$0xff] }
 0x172   : > { %1315 = vst.msk [vmem:[#allocation2 + $0x60] sm:$0xf] %vm372_vm9, %v1302_v4 }
 0x173   : > { %1517 = vst.msk [vmem:[#allocation2 + $0x8] sm:$0xff] %vm246_vm2, %v1504_v5 }
 0x174   : > { %v1648_v7 = vpop.f32.mrb[72].mxu0 }
 0x175   : > { %v1444_v8 = vpop.f32.mrb[72].mxu1  ;;  %v2937_v10 = vpop.f32.mrb[73].mxu0 }
 0x176   : > { %v1505_v11 = vadd.f32 %v1492_v9, %v1444_v8  ;;  %v2911_v12 = vpop.f32.mrb[73].mxu1  ;;  %v1651_v13 = vpop.f32.mrb[74].mxu0  ;;  %v1500_v9 = vld [vmem:[#allocation2 + $0x50] sm:$0xff] }
 0x177   : > { %v1702_v14 = vld [vmem:[#allocation2] sm:$0xff]  ;;  %v1447_v15 = vpop.f32.mrb[74].mxu1  ;;  %v2938_v17 = vpop.f32.mrb[75].mxu0 }
 0x178   : > { %1518 = vst.msk [vmem:[#allocation2 + $0x10] sm:$0xff] %vm246_vm2, %v1505_v11  ;;  %v1715_v18 = vadd.f32 %v1702_v14, %v1648_v7  ;;  %v1506_v19 = vadd.f32 %v1493_v16, %v1447_v15  ;;  %v2912_v20 = vpop.f32.mrb[75].mxu1  ;;  %v1501_v16 = vld [vmem:[#allocation2 + $0x58] sm:$0xff] }
 0x17a   : > { %v1703_v21 = vld [vmem:[#allocation2 + $0x8] sm:$0xff]  ;;  %1728 = vst.msk [vmem:[#allocation2] sm:$0xff] %vm246_vm2, %v1715_v18  ;;  %1519 = vst.msk [vmem:[#allocation2 + $0x18] sm:$0xff] %vm246_vm2, %v1506_v19 }
 0x17b   : > { %v1716_v22 = vadd.f32 %v1703_v21, %v1651_v13 }
 0x17c   : > { %v1656_v23 = vpop.f32.mrb[76].mxu0 }
 0x17d   : > { %1729 = vst.msk [vmem:[#allocation2 + $0x8] sm:$0xff] %vm246_vm2, %v1716_v22  ;;  %v1452_v24 = vpop.f32.mrb[76].mxu1  ;;  %v2941_v26 = vpop.f32.mrb[77].mxu0 }
 0x17e   : > { %v1507_v27 = vadd.f32 %v1494_v25, %v1452_v24  ;;  %v2915_v28 = vpop.f32.mrb[77].mxu1  ;;  %v1659_v29 = vpop.f32.mrb[78].mxu0  ;;  %v1502_v25 = vld [vmem:[#allocation2 + $0x60] sm:$0xf] }
 0x17f   : > { %v1704_v30 = vld [vmem:[#allocation2 + $0x10] sm:$0xff]  ;;  %v1455_v31 = vpop.f32.mrb[78].mxu1  ;;  %v2942_v33 = vpop.f32.mrb[79].mxu0 }
 0x180   : > { %1520 = vst.msk [vmem:[#allocation2 + $0x20] sm:$0xff] %vm246_vm2, %v1507_v27  ;;  %v1717_v34 = vadd.f32 %v1704_v30, %v1656_v23  ;;  %v1508_v35 = vadd.f32 %v1495_v32, %v1455_v31  ;;  %v2916_v36 = vpop.f32.mrb[79].mxu1 }
 0x181   : > { %v1705_v37 = vld [vmem:[#allocation2 + $0x18] sm:$0xff] }
 0x182   : > { %1730 = vst.msk [vmem:[#allocation2 + $0x10] sm:$0xff] %vm246_vm2, %v1717_v34  ;;  %1521 = vst.msk [vmem:[#allocation2 + $0x28] sm:$0xff] %vm246_vm2, %v1508_v35  ;;  %v1718_v38 = vadd.f32 %v1705_v37, %v1659_v29 }
 0x184   : > { %1731 = vst.msk [vmem:[#allocation2 + $0x18] sm:$0xff] %vm246_vm2, %v1718_v38  ;;  %v1664_v39 = vpop.f32.mrb[80].mxu0 }
 0x185   : > { %v1460_v40 = vpop.f32.mrb[80].mxu1  ;;  %v2945_v42 = vpop.f32.mrb[81].mxu0 }
 0x186   : > { %v1509_v43 = vadd.f32 %v1496_v41, %v1460_v40  ;;  %v2919_v44 = vpop.f32.mrb[81].mxu1  ;;  %v1667_v45 = vpop.f32.mrb[82].mxu0 }
 0x187   : > { %v1706_v46 = vld [vmem:[#allocation2 + $0x20] sm:$0xff]  ;;  %v1463_v47 = vpop.f32.mrb[82].mxu1  ;;  %v2946_v49 = vpop.f32.mrb[83].mxu0 }
 0x188   : > { %1522 = vst.msk [vmem:[#allocation2 + $0x30] sm:$0xff] %vm246_vm2, %v1509_v43  ;;  %v1719_v50 = vadd.f32 %v1706_v46, %v1664_v39  ;;  %v1510_v51 = vadd.f32 %v1497_v48, %v1463_v47  ;;  %v2920_v52 = vpop.f32.mrb[83].mxu1  ;;  %v1967_v39 = vld [vmem:[#allocation2] sm:$0xff]  ;;  %v1968_v46 = vld [vmem:[#allocation2 + $0x8] sm:$0xff] }
 0x189   : > { %v1707_v53 = vld [vmem:[#allocation2 + $0x28] sm:$0xff] }
 0x18a   : > { %1732 = vst.msk [vmem:[#allocation2 + $0x20] sm:$0xff] %vm246_vm2, %v1719_v50  ;;  %1523 = vst.msk [vmem:[#allocation2 + $0x38] sm:$0xff] %vm246_vm2, %v1510_v51  ;;  %v1720_v54 = vadd.f32 %v1707_v53, %v1667_v45  ;;  %v1969_v53 = vld [vmem:[#allocation2 + $0x10] sm:$0xff] }
 0x18c   : > { %1733 = vst.msk [vmem:[#allocation2 + $0x28] sm:$0xff] %vm246_vm2, %v1720_v54  ;;  %v1672_v55 = vpop.f32.mrb[84].mxu0 }
 0x18d   : > { %v1468_v56 = vpop.f32.mrb[84].mxu1  ;;  %v2949_v58 = vpop.f32.mrb[85].mxu0 }
 0x18e   : > { %v1511_v59 = vadd.f32 %v1498_v57, %v1468_v56  ;;  %v2923_v60 = vpop.f32.mrb[85].mxu1  ;;  %v1675_v61 = vpop.f32.mrb[86].mxu0 }
 0x18f   : > { %v1708_v1 = vld [vmem:[#allocation2 + $0x30] sm:$0xff]  ;;  %v1471_v62 = vpop.f32.mrb[86].mxu1  ;;  %v2950_v0 = vpop.f32.mrb[87].mxu0  ;;  %v1970_v60 = vld [vmem:[#allocation2 + $0x18] sm:$0xff] }
 0x190   : > { %1524 = vst.msk [vmem:[#allocation2 + $0x40] sm:$0xff] %vm246_vm2, %v1511_v59  ;;  %v1721_v2 = vadd.f32 %v1708_v1, %v1672_v55  ;;  %v1512_v3 = vadd.f32 %v1499_v63, %v1471_v62  ;;  %v2924_v4 = vpop.f32.mrb[87].mxu1 }
 0x191   : > { %v1709_v5 = vld [vmem:[#allocation2 + $0x38] sm:$0xff] }
 0x192   : > { %1734 = vst.msk [vmem:[#allocation2 + $0x30] sm:$0xff] %vm246_vm2, %v1721_v2  ;;  %1525 = vst.msk [vmem:[#allocation2 + $0x48] sm:$0xff] %vm246_vm2, %v1512_v3  ;;  %v1722_v6 = vadd.f32 %v1709_v5, %v1675_v61  ;;  %v1971_v5 = vld [vmem:[#allocation2 + $0x20] sm:$0xff] }
 0x194   : > { %1735 = vst.msk [vmem:[#allocation2 + $0x38] sm:$0xff] %vm246_vm2, %v1722_v6  ;;  %v1680_v7 = vpop.f32.mrb[88].mxu0 }
 0x195   : > { %v1476_v8 = vpop.f32.mrb[88].mxu1  ;;  %v2953_v10 = vpop.f32.mrb[89].mxu0 }
 0x196   : > { %v1513_v11 = vadd.f32 %v1500_v9, %v1476_v8  ;;  %v2927_v12 = vpop.f32.mrb[89].mxu1  ;;  %v1683_v13 = vpop.f32.mrb[90].mxu0 }
 0x197   : > { %v1710_v14 = vld [vmem:[#allocation2 + $0x40] sm:$0xff]  ;;  %v1479_v15 = vpop.f32.mrb[90].mxu1  ;;  %v2954_v17 = vpop.f32.mrb[91].mxu0  ;;  %v1972_v12 = vld [vmem:[#allocation2 + $0x28] sm:$0xff] }
 0x198   : > { %1526 = vst.msk [vmem:[#allocation2 + $0x50] sm:$0xff] %vm246_vm2, %v1513_v11  ;;  %v1723_v18 = vadd.f32 %v1710_v14, %v1680_v7  ;;  %v1514_v19 = vadd.f32 %v1501_v16, %v1479_v15  ;;  %v2928_v20 = vpop.f32.mrb[91].mxu1  ;;  %v3596_v17 = vld [vmem:[%s3719_s2] ss:$0 sm:$0xff] }
 0x199   : > { %v1711_v21 = vld [vmem:[#allocation2 + $0x48] sm:$0xff] }
 0x19a   : > { %1736 = vst.msk [vmem:[#allocation2 + $0x40] sm:$0xff] %vm246_vm2, %v1723_v18  ;;  %1527 = vst.msk [vmem:[#allocation2 + $0x58] sm:$0xff] %vm246_vm2, %v1514_v19  ;;  %v1724_v22 = vadd.f32 %v1711_v21, %v1683_v13  ;;  %v3603_v21 = vld [vmem:[%s3720_s3] ss:$0 sm:$0xff] }
 0x19c   : > { %1737 = vst.msk [vmem:[#allocation2 + $0x48] sm:$0xff] %vm246_vm2, %v1724_v22  ;;  %v1688_v23 = vpop.f32.mrb[92].mxu0 }
 0x19d   : > { %v1484_v24 = vpop.f32.mrb[92].mxu1  ;;  %v2957_v26 = vpop.f32.mrb[93].mxu0 }
 0x19e   : > { %v1515_v27 = vadd.f32 %v1502_v25, %v1484_v24  ;;  %v2931_v28 = vpop.f32.mrb[93].mxu1  ;;  %v1691_v29 = vpop.f32.mrb[94].mxu0  ;;  %v1973_v25 = vld [vmem:[#allocation2 + $0x30] sm:$0xff] }
 0x19f   : > { %v1712_v30 = vld [vmem:[#allocation2 + $0x50] sm:$0xff]  ;;  %v1487_v31 = vpop.f32.mrb[94].mxu1  ;;  %v2958_v32 = vpop.f32.mrb[95].mxu0 }
 0x1a0   : > { %1528 = vst.msk [vmem:[#allocation2 + $0x60] sm:$0xf] %vm372_vm9, %v1515_v27  ;;  %v1725_v33 = vadd.f32 %v1712_v30, %v1688_v23  ;;  %v2932_v34 = vpop.f32.mrb[95].mxu1 }
 0x1a1   : > { %v1713_v35 = vld [vmem:[#allocation2 + $0x58] sm:$0xff] }
 0x1a2   : > { %1738 = vst.msk [vmem:[#allocation2 + $0x50] sm:$0xff] %vm246_vm2, %v1725_v33  ;;  %v1726_v36 = vadd.f32 %v1713_v35, %v1691_v29  ;;  %v1974_v33 = vld [vmem:[#allocation2 + $0x38] sm:$0xff] }
 0x1a4   : > { %1739 = vst.msk [vmem:[#allocation2 + $0x58] sm:$0xff] %vm246_vm2, %v1726_v36  ;;  %v1696_v37 = vpop.f32.mrb[96].mxu0 }
 0x1a5   : > { %v1913_v38 = vpop.f32.mrb[96].mxu1  ;;  %v2961_v40 = vpop.f32.mrb[97].mxu0 }
 0x1a6   : > { %v1980_v41 = vadd.f32 %v1967_v39, %v1913_v38  ;;  %v2967_v42 = vpop.f32.mrb[97].mxu1  ;;  %v1699_v43 = vpop.f32.mrb[98].mxu0 }
 0x1a7   : > { %v1714_v44 = vld [vmem:[#allocation2 + $0x60] sm:$0xf]  ;;  %v1916_v45 = vpop.f32.mrb[98].mxu1  ;;  %v2962_v47 = vpop.f32.mrb[99].mxu0 }
 0x1a8   : > { %v1727_v48 = vadd.f32 %v1714_v44, %v1696_v37  ;;  %1993 = vst.msk [vmem:[#allocation2] sm:$0xff] %vm246_vm2, %v1980_v41  ;;  %v1981_v49 = vadd.f32 %v1968_v46, %v1916_v45  ;;  %v2968_v50 = vpop.f32.mrb[99].mxu1 }
 0x1aa   : > { %1740 = vst.msk [vmem:[#allocation2 + $0x60] sm:$0xf] %vm372_vm9, %v1727_v48 }
 0x1ab   : > { %1994 = vst.msk [vmem:[#allocation2 + $0x8] sm:$0xff] %vm246_vm2, %v1981_v49 }
 0x1ac   : > { %v2129_v51 = vpop.f32.mrb[100].mxu0 }
 0x1ad   : > { %v1921_v52 = vpop.f32.mrb[100].mxu1  ;;  %v2997_v54 = vpop.f32.mrb[101].mxu0 }
 0x1ae   : > { %v1982_v55 = vadd.f32 %v1969_v53, %v1921_v52  ;;  %v2971_v56 = vpop.f32.mrb[101].mxu1  ;;  %v2132_v57 = vpop.f32.mrb[102].mxu0 }
 0x1af   : > { %v2183_v58 = vld [vmem:[#allocation2] sm:$0xff]  ;;  %v1924_v59 = vpop.f32.mrb[102].mxu1  ;;  %v2998_v61 = vpop.f32.mrb[103].mxu0 }
 0x1b0   : > { %1995 = vst.msk [vmem:[#allocation2 + $0x10] sm:$0xff] %vm246_vm2, %v1982_v55  ;;  %v2196_v1 = vadd.f32 %v2183_v58, %v2129_v51  ;;  %v1983_v62 = vadd.f32 %v1970_v60, %v1924_v59  ;;  %v2972_v63 = vpop.f32.mrb[103].mxu1  ;;  %v1975_v56 = vld [vmem:[#allocation2 + $0x40] sm:$0xff] }
 0x1b2   : > { %v2184_v0 = vld [vmem:[#allocation2 + $0x8] sm:$0xff]  ;;  %2209 = vst.msk [vmem:[#allocation2] sm:$0xff] %vm246_vm2, %v2196_v1  ;;  %1996 = vst.msk [vmem:[#allocation2 + $0x18] sm:$0xff] %vm246_vm2, %v1983_v62 }
 0x1b3   : > { %v2197_v2 = vadd.f32 %v2184_v0, %v2132_v57 }
 0x1b4   : > { %v2137_v3 = vpop.f32.mrb[104].mxu0 }
 0x1b5   : > { %2210 = vst.msk [vmem:[#allocation2 + $0x8] sm:$0xff] %vm246_vm2, %v2197_v2  ;;  %v1929_v4 = vpop.f32.mrb[104].mxu1  ;;  %v3001_v6 = vpop.f32.mrb[105].mxu0  ;;  %v1976_v2 = vld [vmem:[#allocation2 + $0x48] sm:$0xff] }
 0x1b6   : > { %v1984_v7 = vadd.f32 %v1971_v5, %v1929_v4  ;;  %v2975_v8 = vpop.f32.mrb[105].mxu1  ;;  %v2140_v9 = vpop.f32.mrb[106].mxu0 }
 0x1b7   : > { %v2185_v10 = vld [vmem:[#allocation2 + $0x10] sm:$0xff]  ;;  %v1932_v11 = vpop.f32.mrb[106].mxu1  ;;  %v3002_v13 = vpop.f32.mrb[107].mxu0 }
 0x1b8   : > { %1997 = vst.msk [vmem:[#allocation2 + $0x20] sm:$0xff] %vm246_vm2, %v1984_v7  ;;  %v2198_v14 = vadd.f32 %v2185_v10, %v2137_v3  ;;  %v1985_v15 = vadd.f32 %v1972_v12, %v1932_v11  ;;  %v2976_v16 = vpop.f32.mrb[107].mxu1 }
 0x1b9   : > { %v2186_v18 = vld [vmem:[#allocation2 + $0x18] sm:$0xff] }
 0x1ba   : > { %2211 = vst.msk [vmem:[#allocation2 + $0x10] sm:$0xff] %vm246_vm2, %v2198_v14  ;;  %1998 = vst.msk [vmem:[#allocation2 + $0x28] sm:$0xff] %vm246_vm2, %v1985_v15  ;;  %v2199_v19 = vadd.f32 %v2186_v18, %v2140_v9 }
 0x1bc   : > { %v2223_v20 = vld [vmem:[#allocation2 + $0x8] sm:$0xff]  ;;  %2212 = vst.msk [vmem:[#allocation2 + $0x18] sm:$0xff] %vm246_vm2, %v2199_v19  ;;  %v2145_v23 = vpop.f32.mrb[108].mxu0 }
 0x1bd   : > { %v2242_v22 = vmul.f32 %v3596_v17, %v2223_v20  ;;  %v1937_v24 = vpop.f32.mrb[108].mxu1  ;;  %v3005_v26 = vpop.f32.mrb[109].mxu0 }
 0x1be   : > { %v1986_v28 = vadd.f32 %v1973_v25, %v1937_v24  ;;  %v2979_v29 = vpop.f32.mrb[109].mxu1  ;;  %v2148_v30 = vpop.f32.mrb[110].mxu0 }
 0x1bf   : > { %v2261_v27 = vadd.f32 %v3603_v21, %v2242_v22  ;;  %v2187_v31 = vld [vmem:[#allocation2 + $0x20] sm:$0xff]  ;;  %v1940_v32 = vpop.f32.mrb[110].mxu1  ;;  %v3006_v34 = vpop.f32.mrb[111].mxu0 }
 0x1c0   : > { %1999 = vst.msk [vmem:[#allocation2 + $0x30] sm:$0xff] %vm246_vm2, %v1986_v28  ;;  %v2200_v36 = vadd.f32 %v2187_v31, %v2145_v23  ;;  %v1987_v37 = vadd.f32 %v1974_v33, %v1940_v32  ;;  %v2980_v38 = vpop.f32.mrb[111].mxu1 }
 0x1c1   : > { %v2273_v35 = vmax.f32 %v2261_v27, 0.0  ;;  %v2224_v39 = vld [vmem:[#allocation2 + $0x10] sm:$0xff]  ;;  %v2188_v40 = vld [vmem:[#allocation2 + $0x28] sm:$0xff] }
 0x1c2   : > { %v2243_v42 = vmul.f32 %v3596_v17, %v2224_v39  ;;  %2213 = vst.msk [vmem:[#allocation2 + $0x20] sm:$0xff] %vm246_vm2, %v2200_v36  ;;  %2000 = vst.msk [vmem:[#allocation2 + $0x38] sm:$0xff] %vm246_vm2, %v1987_v37  ;;  %v2201_v43 = vadd.f32 %v2188_v40, %v2148_v30  ;;  %v1977_v27 = vld [vmem:[#allocation2 + $0x50] sm:$0xff]  ;;  %v1978_v39 = vld [vmem:[#allocation2 + $0x58] sm:$0xff] }
 0x1c3   : > { %v2670_v41 = vpack.c.bf16 %v2273_v35, %v2273_v35  ;;  %v2225_v44 = vld [vmem:[#allocation2 + $0x18] sm:$0xff] }
 0x1c4   : > { %v2262_v47 = vadd.f32 %v3603_v21, %v2243_v42  ;;  %v2244_v48 = vmul.f32 %v3596_v17, %v2225_v44  ;;  %2214 = vst.msk [vmem:[#allocation2 + $0x28] sm:$0xff] %vm246_vm2, %v2201_v43  ;;  %v2153_v49 = vpop.f32.mrb[112].mxu0 }
 0x1c5   : > { %v2300_v45 = vshrl.u32 %v2670_v41, 16  ;;  %v2303_v46 = vshll.u32 %v2670_v41, 16  ;;  %v1945_v50 = vpop.f32.mrb[112].mxu1  ;;  %v3009_v51 = vpop.f32.mrb[113].mxu0 }
 0x1c6   : > { %v2274_v54 = vmax.f32 %v2262_v47, 0.0  ;;  %v2263_v55 = vadd.f32 %v3603_v21, %v2244_v48  ;;  %v2983_v57 = vpop.f32.mrb[113].mxu1  ;;  %v2156_v58 = vpop.f32.mrb[114].mxu0  ;;  %v1988_v59 = vadd.f32 %v1975_v56, %v1945_v50 }
 0x1c7   : > { %v2302_v52 = vrot.slane %v2300_v45, 5  ;;  %v2305_v53 = vrot.slane %v2303_v46, 6  ;;  %v2189_v60 = vld [vmem:[#allocation2 + $0x30] sm:$0xff]  ;;  %v1948_v61 = vpop.f32.mrb[114].mxu1  ;;  %v3010_v1 = vpop.f32.mrb[115].mxu0 }
 0x1c8   : > { %v2671_v62 = vpack.c.bf16 %v2274_v54, %v2274_v54  ;;  %v2275_v63 = vmax.f32 %v2263_v55, 0.0  ;;  %v2202_v0 = vadd.f32 %v2189_v60, %v2153_v49  ;;  %v2984_v3 = vpop.f32.mrb[115].mxu1  ;;  %2001 = vst.msk [vmem:[#allocation2 + $0x40] sm:$0xff] %vm246_vm2, %v1988_v59  ;;  %v1989_v5 = vadd.f32 %v1976_v2, %v1948_v61  ;;  %v1979_v2 = vld [vmem:[#allocation2 + $0x60] sm:$0xf] }
 0x1c9   : > { %v2226_v4 = vld [vmem:[#allocation2 + $0x20] sm:$0xff]  ;;  %v2190_v6 = vld [vmem:[#allocation2 + $0x38] sm:$0xff]  ;;  %v2306_v7 = vor.u32 %v2305_v53, %v2302_v52 }
 0x1ca   : > { %v2309_v8 = vshrl.u32 %v2671_v62, 16  ;;  %v2312_v9 = vshll.u32 %v2671_v62, 16  ;;  %v3617_v10 = vpack.c.bf16 %v2275_v63, %v2275_v63  ;;  %2215 = vst.msk [vmem:[#allocation2 + $0x30] sm:$0xff] %vm246_vm2, %v2202_v0  ;;  %v2245_v11 = vmul.f32 %v3596_v17, %v2226_v4  ;;  %2002 = vst.msk [vmem:[#allocation2 + $0x48] sm:$0xff] %vm246_vm2, %v1989_v5 }
 0x1cb   : > { %v2227_v12 = vld [vmem:[#allocation2 + $0x28] sm:$0xff]  ;;  %v2203_v13 = vadd.f32 %v2190_v6, %v2156_v58  ;;  %v2307_v29 = vrot.slane %v2306_v7, 4 }
 0x1cc   : > { %v2311_v14 = vrot.slane %v2309_v8, 5  ;;  %v2314_v15 = vrot.slane %v2312_v9, 6  ;;  %v2324_v16 = vrot.slane %v2309_v8, 6  ;;  %v2325_v18 = vrot.slane %v2312_v9, 7  ;;  %v2161_v19 = vpop.f32.mrb[116].mxu0 }
 0x1cd   : > { %v2329_v22 = vshrl.u32 %v3617_v10, 16  ;;  %v2332_v23 = vshll.u32 %v3617_v10, 16  ;;  %v2264_v24 = vadd.f32 %v3603_v21, %v2245_v11  ;;  %v2246_v25 = vmul.f32 %v3596_v17, %v2227_v12  ;;  %2216 = vst.msk [vmem:[#allocation2 + $0x38] sm:$0xff] %vm246_vm2, %v2203_v13  ;;  %v1953_v26 = vpop.f32.mrb[116].mxu1  ;;  %v3013_v28 = vpop.f32.mrb[117].mxu0 }
 0x1ce   : > { %v2315_v30 = vor.u32 %v2314_v15, %v2311_v14  ;;  %v2326_v31 = vor.u32 %v2325_v18, %v2324_v16  ;;  %v1990_v32 = vadd.f32 %v1977_v27, %v1953_v26  ;;  %v2987_v33 = vpop.f32.mrb[117].mxu1  ;;  %v2164_v34 = vpop.f32.mrb[118].mxu0 }
 0x1cf   : > { %v2331_v35 = vrot.slane %v2329_v22, 6  ;;  %v2334_v36 = vrot.slane %v2332_v23, 7  ;;  %v2276_v37 = vmax.f32 %v2264_v24, 0.0  ;;  %v1956_v38 = vpop.f32.mrb[118].mxu1  ;;  %v3014_v40 = vpop.f32.mrb[119].mxu0  ;;  %v2265_v44 = vadd.f32 %v3603_v21, %v2246_v25  ;;  %v2191_v45 = vld [vmem:[#allocation2 + $0x40] sm:$0xff] }
 0x1d0   : > { %v2316_v41 = vsel %vm3625_vm14, %v2307_v29, %v2315_v30  ;;  %v2327_v42 = vrot.slane %v2326_v31, 4  ;;  %2003 = vst.msk [vmem:[#allocation2 + $0x50] sm:$0xff] %vm246_vm2, %v1990_v32  ;;  %v1991_v46 = vadd.f32 %v1978_v39, %v1956_v38  ;;  %v2988_v47 = vpop.f32.mrb[119].mxu1  ;;  %v2204_v51 = vadd.f32 %v2191_v45, %v2161_v19 }
 0x1d1   : > { %2318 = vst.msk [vmem:[%s3637_s21] sm:$0xf] %vm372_vm9, %v2316_v41  ;;  %v2335_v48 = vor.u32 %v2334_v36, %v2331_v35  ;;  %v2673_v49 = vpack.c.bf16 %v2276_v37, %v2276_v37  ;;  %v2228_v50 = vld [vmem:[#allocation2 + $0x30] sm:$0xff]  ;;  %v2277_v52 = vmax.f32 %v2265_v44, 0.0  ;;  %v2192_v54 = vld [vmem:[#allocation2 + $0x48] sm:$0xff]  ;;  %v2657_v12 = vrot.slane %v2329_v22, 11 }
 0x1d2   : > { %v2247_v53 = vmul.f32 %v3596_v17, %v2228_v50  ;;  %2004 = vst.msk [vmem:[#allocation2 + $0x58] sm:$0xff] %vm246_vm2, %v1991_v46  ;;  %2217 = vst.msk [vmem:[#allocation2 + $0x40] sm:$0xff] %vm246_vm2, %v2204_v51  ;;  %v2205_v57 = vadd.f32 %v2192_v54, %v2164_v34 }
 0x1d3   : > { %v2336_v55 = vsel %vm3645_vm15, %v2327_v42, %v2335_v48  ;;  %v2348_v56 = vshrl.u32 %v2673_v49, 16  ;;  %v2674_v58 = vpack.c.bf16 %v2277_v52, %v2277_v52  ;;  %v2351_v62 = vshll.u32 %v2673_v49, 16 }
 0x1d4   : > { %2338 = vst.msk [vmem:[%s3637_s21 + $0x4] sm:$0xf] %vm372_vm9, %v2336_v55  ;;  %v2266_v59 = vadd.f32 %v3603_v21, %v2247_v53  ;;  %v2229_v60 = vld [vmem:[#allocation2 + $0x38] sm:$0xff]  ;;  %v2169_v61 = vpop.f32.mrb[120].mxu0 }
 0x1d5   : > { %v2350_v1 = vrot.slane %v2348_v56, 7  ;;  %v2248_v63 = vmul.f32 %v3596_v17, %v2229_v60  ;;  %2218 = vst.msk [vmem:[#allocation2 + $0x48] sm:$0xff] %vm246_vm2, %v2205_v57  ;;  %v1961_v0 = vpop.f32.mrb[120].mxu1  ;;  %v3017_v3 = vpop.f32.mrb[121].mxu0  ;;  %v2366_v5 = vshrl.u32 %v2674_v58, 16  ;;  %v2369_v6 = vshll.u32 %v2674_v58, 16 }
 0x1d6   : > { %v2278_v7 = vmax.f32 %v2266_v59, 0.0  ;;  %v1992_v8 = vadd.f32 %v1979_v2, %v1961_v0  ;;  %v2172_v9 = vpop.f32.mrb[122].mxu0  ;;  %v2991_v11 = vpop.f32.mrb[121].mxu1 }
 0x1d7   : > { %v2353_v13 = vor.u32 %v2351_v62, %v2350_v1  ;;  %v2267_v14 = vadd.f32 %v3603_v21, %v2248_v63  ;;  %v2193_v15 = vld [vmem:[#allocation2 + $0x50] sm:$0xff]  ;;  %v3018_v16 = vpop.f32.mrb[123].mxu0  ;;  %v1964_v18 = vpop.f32.mrb[122].mxu1  ;;  %v2368_v19 = vrot.slane %v2366_v5, 4  ;;  %v2371_v23 = vrot.slane %v2369_v6, 5 }
 0x1d8   : > { %v2675_v24 = vpack.c.bf16 %v2278_v7, %v2278_v7  ;;  %2005 = vst.msk [vmem:[#allocation2 + $0x60] sm:$0xf] %vm372_vm9, %v1992_v8  ;;  %v2206_v25 = vadd.f32 %v2193_v15, %v2169_v61  ;;  %v2992_v26 = vpop.f32.mrb[123].mxu1 }
 0x1d9   : > { %v2354_v27 = vsel %vm3665_vm4, %v2657_v12, %v2353_v13  ;;  %v2279_v10 = vmax.f32 %v2267_v14, 0.0  ;;  %v2194_v22 = vld [vmem:[#allocation2 + $0x58] sm:$0xff]  ;;  %v2372_v28 = vor.u32 %v2371_v23, %v2368_v19  ;;  %v2230_v31 = vld [vmem:[#allocation2 + $0x40] sm:$0xff] }
 0x1da   : > { %2356 = vst.msk [vmem:[%s3637_s21 + $0x8] sm:$0xf] %vm372_vm9, %v2354_v27  ;;  %v2375_v29 = vshll.u32 %v2675_v24, 16  ;;  %v2383_v30 = vshrl.u32 %v2675_v24, 16  ;;  %v2207_v32 = vadd.f32 %v2194_v22, %v2172_v9  ;;  %v2249_v34 = vmul.f32 %v3596_v17, %v2230_v31 }
 0x1db   : > { %2219 = vst.msk [vmem:[#allocation2 + $0x50] sm:$0xff] %vm246_vm2, %v2206_v25  ;;  %v2676_v33 = vpack.c.bf16 %v2279_v10, %v2279_v10  ;;  %v2373_v36 = vrot.slane %v2372_v28, 4 }
 0x1dc   : > { %v2377_v37 = vrot.slane %v2375_v29, 5  ;;  %v2385_v38 = vrot.slane %v2383_v30, 5  ;;  %v2386_v39 = vrot.slane %v2375_v29, 6  ;;  %v2231_v40 = vld [vmem:[#allocation2 + $0x48] sm:$0xff]  ;;  %2220 = vst.msk [vmem:[#allocation2 + $0x58] sm:$0xff] %vm246_vm2, %v2207_v32  ;;  %v2177_v41 = vpop.f32.mrb[124].mxu0  ;;  %v2268_v45 = vadd.f32 %v3603_v21, %v2249_v34 }
 0x1dd   : > { %v2390_v42 = vshrl.u32 %v2676_v33, 16  ;;  %v2393_v44 = vshll.u32 %v2676_v33, 16  ;;  %v2250_v46 = vmul.f32 %v3596_v17, %v2231_v40  ;;  %v3021_v47 = vpop.f32.mrb[125].mxu0 }
 0x1de   : > { %v2387_v48 = vor.u32 %v2386_v39, %v2385_v38  ;;  %v2378_v49 = vsel %vm3681_vm6, %v2373_v36, %v2377_v37  ;;  %v2180_v50 = vpop.f32.mrb[126].mxu0  ;;  %v2280_v57 = vmax.f32 %v2268_v45, 0.0 }
 0x1df   : > { %v2392_v51 = vrot.slane %v2390_v42, 5  ;;  %v2395_v52 = vrot.slane %v2393_v44, 6  ;;  %v2403_v53 = vrot.slane %v2390_v42, 6  ;;  %v2404_v54 = vrot.slane %v2393_v44, 7  ;;  %2380 = vst.msk [vmem:[%s3637_s21 + $0xc] sm:$0xf] %vm372_vm9, %v2378_v49 }
 0x1e0   : > { %v2195_v55 = vld [vmem:[#allocation2 + $0x60] sm:$0xf]  ;;  %v2388_v56 = vrot.slane %v2387_v48, 4  ;;  %v2269_v58 = vadd.f32 %v3603_v21, %v2250_v46  ;;  %v3022_v60 = vpop.f32.mrb[127].mxu0  ;;  %v2677_v62 = vpack.c.bf16 %v2280_v57, %v2280_v57 }
 0x1e1   : > { %v2208_v59 = vadd.f32 %v2195_v55, %v2177_v41  ;;  %v2396_v61 = vor.u32 %v2395_v52, %v2392_v51  ;;  %v2405_v3 = vor.u32 %v2404_v54, %v2403_v53 }
 0x1e2   : > { %v2232_v1 = vld [vmem:[#allocation2 + $0x50] sm:$0xff]  ;;  %v2281_v63 = vmax.f32 %v2269_v58, 0.0  ;;  %v2408_v6 = vshrl.u32 %v2677_v62, 16  ;;  %v2411_v7 = vshll.u32 %v2677_v62, 16 }
 0x1e3   : > { %v2251_v0 = vmul.f32 %v3596_v17, %v2232_v1  ;;  %2221 = vst.msk [vmem:[#allocation2 + $0x60] sm:$0xf] %vm372_vm9, %v2208_v59  ;;  %v2397_v2 = vsel %vm3625_vm14, %v2388_v56, %v2396_v61  ;;  %v2233_v5 = vld [vmem:[#allocation2 + $0x58] sm:$0xff]  ;;  %v2406_v16 = vrot.slane %v2405_v3, 4 }
 0x1e4   : > { %2399 = vst.msk [vmem:[%s3637_s21 + $0x10] sm:$0xf] %vm372_vm9, %v2397_v2  ;;  %v2678_v8 = vpack.c.bf16 %v2281_v63, %v2281_v63  ;;  %v2252_v11 = vmul.f32 %v3596_v17, %v2233_v5  ;;  %v2410_v12 = vrot.slane %v2408_v6, 6  ;;  %v2413_v13 = vrot.slane %v2411_v7, 7 }
 0x1e5   : > { %v2270_v9 = vadd.f32 %v3603_v21, %v2251_v0  ;;  %v2663_v27 = vrot.slane %v2408_v6, 11 }
 0x1e6   : > { %v2423_v14 = vshrl.u32 %v2678_v8, 16  ;;  %v2271_v20 = vadd.f32 %v3603_v21, %v2252_v11  ;;  %v2414_v18 = vor.u32 %v2413_v13, %v2410_v12  ;;  %v2426_v23 = vshll.u32 %v2678_v8, 16 }
 0x1e7   : > { %v2282_v15 = vmax.f32 %v2270_v9, 0.0 }
 0x1e8   : > { %v2425_v19 = vrot.slane %v2423_v14, 7  ;;  %v2283_v25 = vmax.f32 %v2271_v20, 0.0  ;;  %v2415_v26 = vsel %vm3645_vm15, %v2406_v16, %v2414_v18 }
 0x1e9   : > { %v2679_v24 = vpack.c.bf16 %v2282_v15, %v2282_v15  ;;  %2417 = vst.msk [vmem:[%s3637_s21 + $0x14] sm:$0xf] %vm372_vm9, %v2415_v26 }
 0x1ea   : > { %v2428_v10 = vor.u32 %v2426_v23, %v2425_v19  ;;  %v2680_v28 = vpack.c.bf16 %v2283_v25, %v2283_v25 }
 0x1eb   : > { %v2438_v17 = vshrl.u32 %v2679_v24, 16  ;;  %v2441_v22 = vshll.u32 %v2679_v24, 16 }
 0x1ec   : > { %v2429_v21 = vsel %vm3665_vm4, %v2663_v27, %v2428_v10  ;;  %v2447_v31 = vshll.u32 %v2680_v28, 16 }
 0x1ed   : > { %2431 = vst.msk [vmem:[%s3637_s21 + $0x18] sm:$0xf] %vm372_vm9, %v2429_v21  ;;  %v2440_v29 = vrot.slane %v2438_v17, 4  ;;  %v2443_v30 = vrot.slane %v2441_v22, 5 }
 0x1ee   : > { %v2449_v43 = vrot.slane %v2447_v31, 5 }
 0x1ef   : > { %v2444_v32 = vor.u32 %v2443_v30, %v2440_v29 }
 0x1f1   : > { %v2445_v33 = vrot.slane %v2444_v32, 4 }
 0x1f3   : > { %v2450_v34 = vsel %vm3681_vm6, %v2445_v33, %v2449_v43 }
 0x1f4   : > { %2452 = vst.msk [vmem:[%s3637_s21 + $0x1c] sm:$0xf] %vm372_vm9, %v2450_v34 }
 0x1f5 PF: > { %s14_s15 = sadd.s32 1, %s3104_s15  }
 0x1f6   : > { %p11_p4 = scmp.ge.s32.totalorder %s14_s15, 4  }
 0x1f8   :  { %13 = sbr.rel (!%p11_p4) target bundleno = 1 (0x1), region = 74 }

</bundles_post_ra>
